<compile_context>
chip_gen: v7x
topology: tpu7x:2x2x1
jax: 0.10.0
libtpu: 0.0.40
codegen_flags: <defaults>
</compile_context>

<pallas_src>
import functools

import jax
import jax.numpy as jnp
from jax import lax
from jax.experimental import pallas as pl
from jax.experimental.pallas import tpu as pltpu


# =============================================================================
# Fused bidirectional GRU layer.
#   grid=(2,): grid point d = direction (0=fwd, 1=bwd), "parallel" semantics.
#   Inside one grid point:
#     1) input projection for ALL timesteps -> VMEM scratch gx_scr (S, B, 3H)
#     2) unrolled in-kernel recurrence, one (B,H)@(H,3H) matmul per step
#     3) outputs written straight into this direction's (S,B,H) output block
# =============================================================================
def _bidir_gru_layer_kernel(x_ref, w_ih_ref, w_hh_ref, bx_ref, bhn_ref,
                            h0_ref, lens_ref, out_ref, gx_scr,
                            *, seq_len, batch, hidden, dir_split_input):
    d = pl.program_id(0)                    # 0 = forward, 1 = backward
    bx = bx_ref[...]                        # (1, 3H): b_ih + [b_hr, b_hz, 0]

    # ---- 1. input projection, hoisted out of the recurrence -----------------
    for b in range(batch):                  # static tiny loop over batch
        if dir_split_input:
            # x_ref: (2, S, B, Hin) direction-stacked output of previous layer.
            # w_ih_ref: (2*Hin, 3H) rows ordered [fwd features | bwd features].
            hin = w_ih_ref.shape[0] // 2
            g = (jnp.dot(x_ref[0, :, b, :], w_ih_ref[:hin, :],
                         preferred_element_type=jnp.float32)
                 + jnp.dot(x_ref[1, :, b, :], w_ih_ref[hin:, :],
                           preferred_element_type=jnp.float32)
                 + bx)
        else:
            # x_ref: (B, S, Din) raw batch-major network input.
            g = jnp.dot(x_ref[b], w_ih_ref[...],
                        preferred_element_type=jnp.float32) + bx
        gx_scr[:, b, :] = g                 # (S, 3H), time-major scratch

    # ---- 2. recurrence -------------------------------------------------------
    w_hh = w_hh_ref[...]                    # (H, 3H) = [W_hr | W_hz | W_hn]^T
    bhn = bhn_ref[...]                      # (1, H)  = b_hn
    lens = lens_ref[...]                    # (B, 1) int32
    reverse = d == 1
    H = hidden

    def step(t, h):
        pos = jnp.where(reverse, seq_len - 1 - t, t)
        gx = gx_scr[pos]                                            # (B, 3H)
        gh = jnp.dot(h, w_hh, preferred_element_type=jnp.float32)   # (B, 3H)
        r = jax.nn.sigmoid(gx[:, :H] + gh[:, :H])
        z = jax.nn.sigmoid(gx[:, H:2 * H] + gh[:, H:2 * H])
        n = jnp.tanh(gx[:, 2 * H:] + r * (gh[:, 2 * H:] + bhn))
        h_new = (1.0 - z) * n + z * h
        # pack_padded_sequence semantics: freeze state / zero output past length.
        valid = pos < lens                                          # (B, 1)
        h_keep = jnp.where(valid, h_new, h)
        out_ref[pos] = jnp.where(valid, h_keep, 0.0).astype(out_ref.dtype)
        return h_keep

    lax.fori_loop(0, seq_len, step, h0_ref[...].astype(jnp.float32),
                  unroll=True)


def _prep_layer(pf, pb, h0):
    """Stack per-direction GRU params. p = (w_ih (3H,Din), w_hh (3H,H), b_ih, b_hh)."""
    def one(p):
        w_ih, w_hh, b_ih, b_hh = p
        hid = w_hh.shape[1]
        # Fold b_hr / b_hz into the dense bias; b_hn stays inside r*(.) term.
        bx = b_ih + jnp.concatenate([b_hh[:2 * hid],
                                     jnp.zeros((hid,), b_hh.dtype)])
        return (w_ih.T, w_hh.T, bx.reshape(1, 3 * hid),
                b_hh[2 * hid:].reshape(1, hid))
    f, b = one(pf), one(pb)
    return (jnp.stack([f[0], b[0]]),        # (2, Din, 3H)
            jnp.stack([f[1], b[1]]),        # (2, H,   3H)
            jnp.stack([f[2], b[2]]),        # (2, 1,   3H)
            jnp.stack([f[3], b[3]]),        # (2, 1,   H)
            h0)                             # (2, B,   H)


def bidir_gru_layer(x, layer_params, lens2, *, dir_split_input):
    w_ih, w_hh, bx, bhn, h0 = layer_params
    B, H = h0.shape[1], h0.shape[2]
    din_total = w_ih.shape[1]
    if dir_split_input:
        _, S, _, hin = x.shape
        x_spec = pl.BlockSpec((2, S, B, hin), lambda d: (0, 0, 0, 0))
    else:
        S = x.shape[1]
        x_spec = pl.BlockSpec((B, S, din_total), lambda d: (0, 0, 0))

    kernel = functools.partial(_bidir_gru_layer_kernel, seq_len=S, batch=B,
                               hidden=H, dir_split_input=dir_split_input)
    flops = 2 * (2 * S * B * din_total * 3 * H        # input projection
                 + S * (6 * B * H * H + 15 * B * H))  # recurrence
    return pl.pallas_call(
        kernel,
        out_shape=jax.ShapeDtypeStruct((2, S, B, H), jnp.float32),
        grid_spec=pltpu.PrefetchScalarGridSpec(
            num_scalar_prefetch=0,
            grid=(2,),                                  # direction axis
            in_specs=[
                x_spec,
                pl.BlockSpec((None, din_total, 3 * H), lambda d: (d, 0, 0)),
                pl.BlockSpec((None, H, 3 * H), lambda d: (d, 0, 0)),
                pl.BlockSpec((None, 1, 3 * H), lambda d: (d, 0, 0)),
                pl.BlockSpec((None, 1, H), lambda d: (d, 0, 0)),
                pl.BlockSpec((None, B, H), lambda d: (d, 0, 0)),
                pl.BlockSpec((B, 1), lambda d: (0, 0)),
            ],
            out_specs=pl.BlockSpec((None, S, B, H), lambda d: (d, 0, 0, 0)),
            scratch_shapes=[pltpu.VMEM((S, B, 3 * H), jnp.float32)],
        ),
        compiler_params=pltpu.CompilerParams(
            dimension_semantics=("parallel",)),          # both TCs on v7x
        cost_estimate=pl.CostEstimate(
            flops=flops,
            transcendentals=2 * 3 * S * B * H,
            bytes_accessed=4 * (x.size + w_ih.size + w_hh.size + bx.size
                                + bhn.size + h0.size + 2 * S * B * H + B)),
    )(x, w_ih, w_hh, bx, bhn, h0, lens2)


# =============================================================================
# Fused classifier + log_softmax over the *sequence* axis (torch dim=1).
# Consumes the direction-stacked (2, S, B, H2) GRU output directly and writes
# the final (B, S, T) log-probs in one kernel (no intermediate logits in HBM).
# =============================================================================
def _classifier_logsoftmax_kernel(h_ref, w_ref, b_ref, out_ref, *, batch, hidden):
    w_f = w_ref[:hidden, :]                 # weights for the forward features
    w_b = w_ref[hidden:, :]                 # weights for the backward features
    bias = b_ref[...]                       # (1, T)
    for b in range(batch):                  # static tiny loop over batch
        logits = (jnp.dot(h_ref[0, :, b, :], w_f,
                          preferred_element_type=jnp.float32)
                  + jnp.dot(h_ref[1, :, b, :], w_b,
                            preferred_element_type=jnp.float32)
                  + bias)                                   # (S, T)
        m = jnp.max(logits, axis=0, keepdims=True)          # reduce over seq
        lse = m + jnp.log(jnp.sum(jnp.exp(logits - m), axis=0, keepdims=True))
        out_ref[b] = (logits - lse).astype(out_ref.dtype)


def classifier_logsoftmax(h, w_cls, b_cls):
    _, S, B, H2 = h.shape
    T = b_cls.shape[0]
    kernel = functools.partial(_classifier_logsoftmax_kernel, batch=B, hidden=H2)
    return pl.pallas_call(
        kernel,
        out_shape=jax.ShapeDtypeStruct((B, S, T), jnp.float32),
        grid=(1,),
        in_specs=[pl.BlockSpec((2, S, B, H2), lambda i: (0, 0, 0, 0)),
                  pl.BlockSpec((2 * H2, T), lambda i: (0, 0)),
                  pl.BlockSpec((1, T), lambda i: (0, 0))],
        out_specs=pl.BlockSpec((B, S, T), lambda i: (0, 0, 0)),
        compiler_params=pltpu.CompilerParams(
            dimension_semantics=("arbitrary",)),
        cost_estimate=pl.CostEstimate(
            flops=2 * B * S * 2 * H2 * T + 5 * B * S * T,
            transcendentals=B * S * T,
            bytes_accessed=4 * (2 * S * B * H2 + 2 * H2 * T + T + B * S * T)),
    )(h, w_cls.T, b_cls.reshape(1, T))


# =============================================================================
# Full PosTagger forward (4 pallas_call launches total).
# =============================================================================
def pos_tagger_forward(x, lens, params):
    """x: (B, S, input_size), lens: (B,) int.  Returns (B, S, tagset) log-probs."""
    B = x.shape[0]
    lens2 = lens.reshape(B, 1).astype(jnp.int32)

    l0 = _prep_layer(params["gru1_l0_f"], params["gru1_l0_b"], params["h1_0"][0:2])
    l1 = _prep_layer(params["gru1_l1_f"], params["gru1_l1_b"], params["h1_0"][2:4])
    l2 = _prep_layer(params["gru2_f"], params["gru2_b"], params["h2_0"][0:2])

    # layer_1: nn.GRU(num_layers=2, bidirectional=True)
    h = bidir_gru_layer(x, l0, lens2, dir_split_input=False)   # (2, S, B, H1)
    h = bidir_gru_layer(h, l1, lens2, dir_split_input=True)    # (2, S, B, H1)
    # layer_2: nn.GRU(num_layers=1, bidirectional=True)
    h = bidir_gru_layer(h, l2, lens2, dir_split_input=True)    # (2, S, B, H2)

    # TODO(synk): the original forward also computes pre_alphas from
    # context_processing / context_vector / masks, but that result never
    # affects the returned tensor (dead code), so it is not reproduced here.

    return classifier_logsoftmax(h, params["w_cls"], params["b_cls"])


# =============================================================================
# Pure-JAX reference (same semantics) for correctness checking.
# =============================================================================
def _gru_cell_ref(x_t, h, w_ih, w_hh, b_ih, b_hh):
    H = h.shape[-1]
    gi = x_t @ w_ih.T + b_ih
    gh = h @ w_hh.T + b_hh
    r = jax.nn.sigmoid(gi[:, :H] + gh[:, :H])
    z = jax.nn.sigmoid(gi[:, H:2 * H] + gh[:, H:2 * H])
    n = jnp.tanh(gi[:, 2 * H:] + r * gh[:, 2 * H:])
    return (1.0 - z) * n + z * h


def _gru_dir_ref(x, h0, p, lens, reverse):
    w_ih, w_hh, b_ih, b_hh = p
    B, S, _ = x.shape
    H = h0.shape[-1]
    h = h0
    out = jnp.zeros((B, S, H), jnp.float32)
    order = range(S - 1, -1, -1) if reverse else range(S)
    for t in order:
        h_new = _gru_cell_ref(x[:, t], h, w_ih, w_hh, b_ih, b_hh)
        valid = (t < lens)[:, None]
        h = jnp.where(valid, h_new, h)
        out = out.at[:, t].set(jnp.where(valid, h, 0.0))
    return out


def pos_tagger_reference(x, lens, params):
    def bidir(inp, h0f, h0b, pf, pb):
        return jnp.concatenate([_gru_dir_ref(inp, h0f, pf, lens, False),
                                _gru_dir_ref(inp, h0b, pb, lens, True)], axis=-1)
    h = bidir(x, params["h1_0"][0], params["h1_0"][1],
              params["gru1_l0_f"], params["gru1_l0_b"])
    h = bidir(h, params["h1_0"][2], params["h1_0"][3],
              params["gru1_l1_f"], params["gru1_l1_b"])
    h = bidir(h, params["h2_0"][0], params["h2_0"][1],
              params["gru2_f"], params["gru2_b"])
    logits = h @ params["w_cls"].T + params["b_cls"]
    return jax.nn.log_softmax(logits, axis=1)


if __name__ == "__main__":
    jax.config.update("jax_default_matmul_precision", "highest")

    INPUT_SIZE, H1, H2, TAGS = 8, 16, 16, 10
    B, S = 2, 8

    key = jax.random.PRNGKey(0)
    keys = jax.random.split(key, 16)

    def gru_params(k, in_dim, hid):
        k1, k2, k3, k4 = jax.random.split(k, 4)
        lim = 1.0 / (hid ** 0.5)
        u = lambda kk, shp: jax.random.uniform(kk, shp, minval=-lim, maxval=lim,
                                               dtype=jnp.float32)
        return (u(k1, (3 * hid, in_dim)), u(k2, (3 * hid, hid)),
                u(k3, (3 * hid,)), u(k4, (3 * hid,)))

    params = {
        "gru1_l0_f": gru_params(keys[0], INPUT_SIZE, H1),
        "gru1_l0_b": gru_params(keys[1], INPUT_SIZE, H1),
        "gru1_l1_f": gru_params(keys[2], 2 * H1, H1),
        "gru1_l1_b": gru_params(keys[3], 2 * H1, H1),
        "gru2_f": gru_params(keys[4], 2 * H1, H2),
        "gru2_b": gru_params(keys[5], 2 * H1, H2),
        "w_cls": jax.random.uniform(keys[6], (TAGS, 2 * H2), minval=-0.25,
                                    maxval=0.25, dtype=jnp.float32),
        "b_cls": jax.random.uniform(keys[7], (TAGS,), minval=-0.25,
                                    maxval=0.25, dtype=jnp.float32),
        # The PyTorch forward draws these from torch.randn on every call; we
        # pass deterministic normals so kernel and reference see the same init.
        "h1_0": jax.random.normal(keys[8], (4, B, H1), dtype=jnp.float32),
        "h2_0": jax.random.normal(keys[9], (2, B, H2), dtype=jnp.float32),
    }

    x = jax.random.normal(keys[10], (B, S, INPUT_SIZE), dtype=jnp.float32)
    lens = jnp.array([S, S - 3], dtype=jnp.int32)   # exercises the masking path
    # `masks` only feeds the unused pre_alphas branch -> not needed here.

    out = jax.jit(pos_tagger_forward)(x, lens, params)
    out = jax.block_until_ready(out)

    ref = pos_tagger_reference(x, lens, params)
    assert out.shape == (B, S, TAGS)
    assert jnp.allclose(out, ref, atol=1e-3, rtol=1e-3), "mismatch vs reference"

    print("KERNEL_OK")
</pallas_src>

<mosaic_0001>
module attributes {stable_mosaic.version = 11 : i64} {
  func.func @_bidir_gru_layer_kernel(%arg0: i32, %arg1: memref<2x8x2x16xf32, #tpu.memory_space<vmem>>, %arg2: memref<1x32x48xf32, #tpu.memory_space<vmem>>, %arg3: memref<1x16x48xf32, #tpu.memory_space<vmem>>, %arg4: memref<1x1x48xf32, #tpu.memory_space<vmem>>, %arg5: memref<1x1x16xf32, #tpu.memory_space<vmem>>, %arg6: memref<1x2x16xf32, #tpu.memory_space<vmem>>, %arg7: memref<2x1xi32, #tpu.memory_space<vmem>>, %arg8: memref<1x8x2x16xf32, #tpu.memory_space<vmem>>, %arg9: memref<8x2x48xf32, #tpu.memory_space<vmem>>) attributes {dimension_semantics = [#tpu.dimension_semantics<parallel>], iteration_bounds = array<i64: 2>, scalar_prefetch = 0 : i64, scratch_operands = 1 : i64, tpu.core_type = #tpu.core_type<tc>, window_params = [{pipeline_mode = #tpu.pipeline_mode<synchronous>, transform_indices = @transform_0, window_bounds = array<i64: 2, 8, 2, 16>}, {transform_indices = @transform_1, window_bounds = array<i64: 1, 32, 48>}, {transform_indices = @transform_2, window_bounds = array<i64: 1, 16, 48>}, {transform_indices = @transform_3, window_bounds = array<i64: 1, 1, 48>}, {transform_indices = @transform_4, window_bounds = array<i64: 1, 1, 16>}, {transform_indices = @transform_5, window_bounds = array<i64: 1, 2, 16>}, {pipeline_mode = #tpu.pipeline_mode<synchronous>, transform_indices = @transform_6, window_bounds = array<i64: 2, 1>}, {transform_indices = @transform_7, window_bounds = array<i64: 1, 8, 2, 16>}]} {
    %c0 = arith.constant 0 : index
    %c0_0 = arith.constant 0 : index
    %c0_1 = arith.constant 0 : index
    %0 = vector.load %arg4[%c0, %c0_0, %c0_1] : memref<1x1x48xf32, #tpu.memory_space<vmem>>, vector<1x1x48xf32>
    %1 = vector.shape_cast %0 : vector<1x1x48xf32> to vector<1x48xf32>
    %c0_2 = arith.constant 0 : index
    %c0_3 = arith.constant 0 : index
    %c0_4 = arith.constant 0 : index
    %c0_5 = arith.constant 0 : index
    %2 = vector.load %arg1[%c0_2, %c0_3, %c0_4, %c0_5] : memref<2x8x2x16xf32, #tpu.memory_space<vmem>>, vector<1x8x1x16xf32>
    %3 = vector.shape_cast %2 : vector<1x8x1x16xf32> to vector<8x16xf32>
    %c0_6 = arith.constant 0 : index
    %c0_7 = arith.constant 0 : index
    %c0_8 = arith.constant 0 : index
    %4 = vector.load %arg2[%c0_6, %c0_7, %c0_8] : memref<1x32x48xf32, #tpu.memory_space<vmem>>, vector<1x16x48xf32>
    %5 = vector.shape_cast %4 : vector<1x16x48xf32> to vector<16x48xf32>
    %cst = arith.constant dense<0.000000e+00> : vector<8x48xf32>
    %6 = tpu.matmul %3, %5, %cst {dimension_numbers = #tpu.dot_dimension_numbers<[1], [0], [0], [1], [0, 0, 1, 1], [], []>, precision = #tpu.contract_precision<fp32>} : vector<8x16xf32>, vector<16x48xf32>, vector<8x48xf32> -> vector<8x48xf32>
    %c1 = arith.constant 1 : index
    %c0_9 = arith.constant 0 : index
    %c0_10 = arith.constant 0 : index
    %c0_11 = arith.constant 0 : index
    %7 = vector.load %arg1[%c1, %c0_9, %c0_10, %c0_11] : memref<2x8x2x16xf32, #tpu.memory_space<vmem>>, vector<1x8x1x16xf32>
    %8 = vector.shape_cast %7 : vector<1x8x1x16xf32> to vector<8x16xf32>
    %c0_12 = arith.constant 0 : index
    %c16 = arith.constant 16 : index
    %c0_13 = arith.constant 0 : index
    %9 = vector.load %arg2[%c0_12, %c16, %c0_13] : memref<1x32x48xf32, #tpu.memory_space<vmem>>, vector<1x16x48xf32>
    %10 = vector.shape_cast %9 : vector<1x16x48xf32> to vector<16x48xf32>
    %cst_14 = arith.constant dense<0.000000e+00> : vector<8x48xf32>
    %11 = tpu.matmul %8, %10, %cst_14 {dimension_numbers = #tpu.dot_dimension_numbers<[1], [0], [0], [1], [0, 0, 1, 1], [], []>, precision = #tpu.contract_precision<fp32>} : vector<8x16xf32>, vector<16x48xf32>, vector<8x48xf32> -> vector<8x48xf32>
    %12 = arith.addf %6, %11 : vector<8x48xf32>
    %13 = vector.broadcast %1 : vector<1x48xf32> to vector<8x48xf32>
    %14 = arith.addf %12, %13 : vector<8x48xf32>
    %c0_15 = arith.constant 0 : index
    %c0_16 = arith.constant 0 : index
    %c0_17 = arith.constant 0 : index
    %15 = vector.load %arg9[%c0_15, %c0_16, %c0_17] : memref<8x2x48xf32, #tpu.memory_space<vmem>>, vector<8x1x48xf32>
    %16 = vector.shape_cast %15 : vector<8x1x48xf32> to vector<8x48xf32>
    %17 = vector.shape_cast %14 : vector<8x48xf32> to vector<8x1x48xf32>
    tpu.vector_store %arg9[%c0_15, %c0_16, %c0_17], %17 {strides = array<i32>} : memref<8x2x48xf32, #tpu.memory_space<vmem>>, vector<8x1x48xf32>,
    %c0_18 = arith.constant 0 : index
    %c0_19 = arith.constant 0 : index
    %c1_20 = arith.constant 1 : index
    %c0_21 = arith.constant 0 : index
    %18 = vector.load %arg1[%c0_18, %c0_19, %c1_20, %c0_21] : memref<2x8x2x16xf32, #tpu.memory_space<vmem>>, vector<1x8x1x16xf32>
    %19 = vector.shape_cast %18 : vector<1x8x1x16xf32> to vector<8x16xf32>
    %c0_22 = arith.constant 0 : index
    %c0_23 = arith.constant 0 : index
    %c0_24 = arith.constant 0 : index
    %20 = vector.load %arg2[%c0_22, %c0_23, %c0_24] : memref<1x32x48xf32, #tpu.memory_space<vmem>>, vector<1x16x48xf32>
    %21 = vector.shape_cast %20 : vector<1x16x48xf32> to vector<16x48xf32>
    %cst_25 = arith.constant dense<0.000000e+00> : vector<8x48xf32>
    %22 = tpu.matmul %19, %21, %cst_25 {dimension_numbers = #tpu.dot_dimension_numbers<[1], [0], [0], [1], [0, 0, 1, 1], [], []>, precision = #tpu.contract_precision<fp32>} : vector<8x16xf32>, vector<16x48xf32>, vector<8x48xf32> -> vector<8x48xf32>
    %c1_26 = arith.constant 1 : index
    %c0_27 = arith.constant 0 : index
    %c1_28 = arith.constant 1 : index
    %c0_29 = arith.constant 0 : index
    %23 = vector.load %arg1[%c1_26, %c0_27, %c1_28, %c0_29] : memref<2x8x2x16xf32, #tpu.memory_space<vmem>>, vector<1x8x1x16xf32>
    %24 = vector.shape_cast %23 : vector<1x8x1x16xf32> to vector<8x16xf32>
    %c0_30 = arith.constant 0 : index
    %c16_31 = arith.constant 16 : index
    %c0_32 = arith.constant 0 : index
    %25 = vector.load %arg2[%c0_30, %c16_31, %c0_32] : memref<1x32x48xf32, #tpu.memory_space<vmem>>, vector<1x16x48xf32>
    %26 = vector.shape_cast %25 : vector<1x16x48xf32> to vector<16x48xf32>
    %cst_33 = arith.constant dense<0.000000e+00> : vector<8x48xf32>
    %27 = tpu.matmul %24, %26, %cst_33 {dimension_numbers = #tpu.dot_dimension_numbers<[1], [0], [0], [1], [0, 0, 1, 1], [], []>, precision = #tpu.contract_precision<fp32>} : vector<8x16xf32>, vector<16x48xf32>, vector<8x48xf32> -> vector<8x48xf32>
    %28 = arith.addf %22, %27 : vector<8x48xf32>
    %29 = vector.broadcast %1 : vector<1x48xf32> to vector<8x48xf32>
    %30 = arith.addf %28, %29 : vector<8x48xf32>
    %c0_34 = arith.constant 0 : index
    %c1_35 = arith.constant 1 : index
    %c0_36 = arith.constant 0 : index
    %31 = vector.load %arg9[%c0_34, %c1_35, %c0_36] : memref<8x2x48xf32, #tpu.memory_space<vmem>>, vector<8x1x48xf32>
    %32 = vector.shape_cast %31 : vector<8x1x48xf32> to vector<8x48xf32>
    %33 = vector.shape_cast %30 : vector<8x48xf32> to vector<8x1x48xf32>
    tpu.vector_store %arg9[%c0_34, %c1_35, %c0_36], %33 {strides = array<i32>} : memref<8x2x48xf32, #tpu.memory_space<vmem>>, vector<8x1x48xf32>,
    %c0_37 = arith.constant 0 : index
    %c0_38 = arith.constant 0 : index
    %c0_39 = arith.constant 0 : index
    %34 = vector.load %arg3[%c0_37, %c0_38, %c0_39] : memref<1x16x48xf32, #tpu.memory_space<vmem>>, vector<1x16x48xf32>
    %35 = vector.shape_cast %34 : vector<1x16x48xf32> to vector<16x48xf32>
    %c0_40 = arith.constant 0 : index
    %c0_41 = arith.constant 0 : index
    %c0_42 = arith.constant 0 : index
    %36 = vector.load %arg5[%c0_40, %c0_41, %c0_42] : memref<1x1x16xf32, #tpu.memory_space<vmem>>, vector<1x1x16xf32>
    %37 = vector.shape_cast %36 : vector<1x1x16xf32> to vector<1x16xf32>
    %c0_43 = arith.constant 0 : index
    %c0_44 = arith.constant 0 : index
    %38 = vector.load %arg7[%c0_43, %c0_44] : memref<2x1xi32, #tpu.memory_space<vmem>>, vector<2x1xi32>
    %c1_i32 = arith.constant 1 : i32
    %39 = arith.cmpi eq, %arg0, %c1_i32 : i32
    %c0_45 = arith.constant 0 : index
    %c0_46 = arith.constant 0 : index
    %c0_47 = arith.constant 0 : index
    %40 = vector.load %arg6[%c0_45, %c0_46, %c0_47] : memref<1x2x16xf32, #tpu.memory_space<vmem>>, vector<1x2x16xf32>
    %41 = vector.shape_cast %40 : vector<1x2x16xf32> to vector<2x16xf32>
    %c0_i32 = arith.constant 0 : i32
    %c7_i32 = arith.constant 7 : i32
    %42 = arith.subi %c7_i32, %c0_i32 : i32
    %43 = arith.select %39, %42, %c0_i32 : i32
    %44 = arith.index_cast %43 : i32 to index
    %c0_48 = arith.constant 0 : index
    %c0_49 = arith.constant 0 : index
    %45 = vector.load %arg9[%44, %c0_48, %c0_49] : memref<8x2x48xf32, #tpu.memory_space<vmem>>, vector<1x2x48xf32>
    %46 = vector.shape_cast %45 : vector<1x2x48xf32> to vector<2x48xf32>
    %cst_50 = arith.constant dense<0.000000e+00> : vector<2x48xf32>
    %47 = tpu.matmul %41, %35, %cst_50 {dimension_numbers = #tpu.dot_dimension_numbers<[1], [0], [0], [1], [0, 0, 1, 1], [], []>, precision = #tpu.contract_precision<fp32>} : vector<2x16xf32>, vector<16x48xf32>, vector<2x48xf32> -> vector<2x48xf32>
    %48 = vector.extract_strided_slice %46 {offsets = [0, 0], sizes = [2, 16], strides = [1, 1]} : vector<2x48xf32> to vector<2x16xf32>
    %49 = vector.extract_strided_slice %47 {offsets = [0, 0], sizes = [2, 16], strides = [1, 1]} : vector<2x48xf32> to vector<2x16xf32>
    %50 = arith.addf %48, %49 : vector<2x16xf32>
    %51 = arith.negf %50 : vector<2x16xf32>
    %52 = math.exp %51 : vector<2x16xf32>
    %cst_51 = arith.constant 1.000000e+00 : f32
    %53 = vector.broadcast %cst_51 : f32 to vector<2x16xf32>
    %54 = arith.addf %53, %52 : vector<2x16xf32>
    %55 = arith.divf %53, %54 : vector<2x16xf32>
    %56 = vector.extract_strided_slice %46 {offsets = [0, 16], sizes = [2, 16], strides = [1, 1]} : vector<2x48xf32> to vector<2x16xf32>
    %57 = vector.extract_strided_slice %47 {offsets = [0, 16], sizes = [2, 16], strides = [1, 1]} : vector<2x48xf32> to vector<2x16xf32>
    %58 = arith.addf %56, %57 : vector<2x16xf32>
    %59 = arith.negf %58 : vector<2x16xf32>
    %60 = math.exp %59 : vector<2x16xf32>
    %cst_52 = arith.constant 1.000000e+00 : f32
    %61 = vector.broadcast %cst_52 : f32 to vector<2x16xf32>
    %62 = arith.addf %61, %60 : vector<2x16xf32>
    %63 = arith.divf %61, %62 : vector<2x16xf32>
    %64 = vector.extract_strided_slice %46 {offsets = [0, 32], sizes = [2, 16], strides = [1, 1]} : vector<2x48xf32> to vector<2x16xf32>
    %65 = vector.extract_strided_slice %47 {offsets = [0, 32], sizes = [2, 16], strides = [1, 1]} : vector<2x48xf32> to vector<2x16xf32>
    %66 = vector.broadcast %37 : vector<1x16xf32> to vector<2x16xf32>
    %67 = arith.addf %65, %66 : vector<2x16xf32>
    %68 = arith.mulf %55, %67 : vector<2x16xf32>
    %69 = arith.addf %64, %68 : vector<2x16xf32>
    %70 = math.tanh %69 : vector<2x16xf32>
    %cst_53 = arith.constant 1.000000e+00 : f32
    %71 = vector.broadcast %cst_53 : f32 to vector<2x16xf32>
    %72 = arith.subf %71, %63 : vector<2x16xf32>
    %73 = arith.mulf %72, %70 : vector<2x16xf32>
    %74 = arith.mulf %63, %41 : vector<2x16xf32>
    %75 = arith.addf %73, %74 : vector<2x16xf32>
    %76 = vector.broadcast %43 : i32 to vector<2x1xi32>
    %77 = arith.cmpi slt, %76, %38 : vector<2x1xi32>
    %78 = vector.shape_cast %77 : vector<2x1xi1> to vector<2x1xi1>
    %79 = vector.broadcast %78 : vector<2x1xi1> to vector<2x16xi1>
    %80 = arith.select %79, %75, %41 : vector<2x16xi1>, vector<2x16xf32>
    %cst_54 = arith.constant 0.000000e+00 : f32
    %81 = vector.shape_cast %77 : vector<2x1xi1> to vector<2x1xi1>
    %82 = vector.broadcast %81 : vector<2x1xi1> to vector<2x16xi1>
    %83 = vector.broadcast %cst_54 : f32 to vector<2x16xf32>
    %84 = arith.select %82, %80, %83 : vector<2x16xi1>, vector<2x16xf32>
    %c0_55 = arith.constant 0 : index
    %85 = arith.index_cast %43 : i32 to index
    %c0_56 = arith.constant 0 : index
    %c0_57 = arith.constant 0 : index
    %86 = vector.load %arg8[%c0_55, %85, %c0_56, %c0_57] : memref<1x8x2x16xf32, #tpu.memory_space<vmem>>, vector<1x1x2x16xf32>
    %87 = vector.shape_cast %86 : vector<1x1x2x16xf32> to vector<2x16xf32>
    %88 = vector.shape_cast %84 : vector<2x16xf32> to vector<1x1x2x16xf32>
    tpu.vector_store %arg8[%c0_55, %85, %c0_56, %c0_57], %88 {strides = array<i32>} : memref<1x8x2x16xf32, #tpu.memory_space<vmem>>, vector<1x1x2x16xf32>,
    %c1_i32_58 = arith.constant 1 : i32
    %c7_i32_59 = arith.constant 7 : i32
    %89 = arith.subi %c7_i32_59, %c1_i32_58 : i32
    %90 = arith.select %39, %89, %c1_i32_58 : i32
    %91 = arith.index_cast %90 : i32 to index
    %c0_60 = arith.constant 0 : index
    %c0_61 = arith.constant 0 : index
    %92 = vector.load %arg9[%91, %c0_60, %c0_61] : memref<8x2x48xf32, #tpu.memory_space<vmem>>, vector<1x2x48xf32>
    %93 = vector.shape_cast %92 : vector<1x2x48xf32> to vector<2x48xf32>
    %cst_62 = arith.constant dense<0.000000e+00> : vector<2x48xf32>
    %94 = tpu.matmul %80, %35, %cst_62 {dimension_numbers = #tpu.dot_dimension_numbers<[1], [0], [0], [1], [0, 0, 1, 1], [], []>, precision = #tpu.contract_precision<fp32>} : vector<2x16xf32>, vector<16x48xf32>, vector<2x48xf32> -> vector<2x48xf32>
    %95 = vector.extract_strided_slice %93 {offsets = [0, 0], sizes = [2, 16], strides = [1, 1]} : vector<2x48xf32> to vector<2x16xf32>
    %96 = vector.extract_strided_slice %94 {offsets = [0, 0], sizes = [2, 16], strides = [1, 1]} : vector<2x48xf32> to vector<2x16xf32>
    %97 = arith.addf %95, %96 : vector<2x16xf32>
    %98 = arith.negf %97 : vector<2x16xf32>
    %99 = math.exp %98 : vector<2x16xf32>
    %cst_63 = arith.constant 1.000000e+00 : f32
    %100 = vector.broadcast %cst_63 : f32 to vector<2x16xf32>
    %101 = arith.addf %100, %99 : vector<2x16xf32>
    %102 = arith.divf %100, %101 : vector<2x16xf32>
    %103 = vector.extract_strided_slice %93 {offsets = [0, 16], sizes = [2, 16], strides = [1, 1]} : vector<2x48xf32> to vector<2x16xf32>
    %104 = vector.extract_strided_slice %94 {offsets = [0, 16], sizes = [2, 16], strides = [1, 1]} : vector<2x48xf32> to vector<2x16xf32>
    %105 = arith.addf %103, %104 : vector<2x16xf32>
    %106 = arith.negf %105 : vector<2x16xf32>
    %107 = math.exp %106 : vector<2x16xf32>
    %cst_64 = arith.constant 1.000000e+00 : f32
    %108 = vector.broadcast %cst_64 : f32 to vector<2x16xf32>
    %109 = arith.addf %108, %107 : vector<2x16xf32>
    %110 = arith.divf %108, %109 : vector<2x16xf32>
    %111 = vector.extract_strided_slice %93 {offsets = [0, 32], sizes = [2, 16], strides = [1, 1]} : vector<2x48xf32> to vector<2x16xf32>
    %112 = vector.extract_strided_slice %94 {offsets = [0, 32], sizes = [2, 16], strides = [1, 1]} : vector<2x48xf32> to vector<2x16xf32>
    %113 = vector.broadcast %37 : vector<1x16xf32> to vector<2x16xf32>
    %114 = arith.addf %112, %113 : vector<2x16xf32>
    %115 = arith.mulf %102, %114 : vector<2x16xf32>
    %116 = arith.addf %111, %115 : vector<2x16xf32>
    %117 = math.tanh %116 : vector<2x16xf32>
    %cst_65 = arith.constant 1.000000e+00 : f32
    %118 = vector.broadcast %cst_65 : f32 to vector<2x16xf32>
    %119 = arith.subf %118, %110 : vector<2x16xf32>
    %120 = arith.mulf %119, %117 : vector<2x16xf32>
    %121 = arith.mulf %110, %80 : vector<2x16xf32>
    %122 = arith.addf %120, %121 : vector<2x16xf32>
    %123 = vector.broadcast %90 : i32 to vector<2x1xi32>
    %124 = arith.cmpi slt, %123, %38 : vector<2x1xi32>
    %125 = vector.shape_cast %124 : vector<2x1xi1> to vector<2x1xi1>
    %126 = vector.broadcast %125 : vector<2x1xi1> to vector<2x16xi1>
    %127 = arith.select %126, %122, %80 : vector<2x16xi1>, vector<2x16xf32>
    %cst_66 = arith.constant 0.000000e+00 : f32
    %128 = vector.shape_cast %124 : vector<2x1xi1> to vector<2x1xi1>
    %129 = vector.broadcast %128 : vector<2x1xi1> to vector<2x16xi1>
    %130 = vector.broadcast %cst_66 : f32 to vector<2x16xf32>
    %131 = arith.select %129, %127, %130 : vector<2x16xi1>, vector<2x16xf32>
    %c0_67 = arith.constant 0 : index
    %132 = arith.index_cast %90 : i32 to index
    %c0_68 = arith.constant 0 : index
    %c0_69 = arith.constant 0 : index
    %133 = vector.load %arg8[%c0_67, %132, %c0_68, %c0_69] : memref<1x8x2x16xf32, #tpu.memory_space<vmem>>, vector<1x1x2x16xf32>
    %134 = vector.shape_cast %133 : vector<1x1x2x16xf32> to vector<2x16xf32>
    %135 = vector.shape_cast %131 : vector<2x16xf32> to vector<1x1x2x16xf32>
    tpu.vector_store %arg8[%c0_67, %132, %c0_68, %c0_69], %135 {strides = array<i32>} : memref<1x8x2x16xf32, #tpu.memory_space<vmem>>, vector<1x1x2x16xf32>,
    %c2_i32 = arith.constant 2 : i32
    %c7_i32_70 = arith.constant 7 : i32
    %136 = arith.subi %c7_i32_70, %c2_i32 : i32
    %137 = arith.select %39, %136, %c2_i32 : i32
    %138 = arith.index_cast %137 : i32 to index
    %c0_71 = arith.constant 0 : index
    %c0_72 = arith.constant 0 : index
    %139 = vector.load %arg9[%138, %c0_71, %c0_72] : memref<8x2x48xf32, #tpu.memory_space<vmem>>, vector<1x2x48xf32>
    %140 = vector.shape_cast %139 : vector<1x2x48xf32> to vector<2x48xf32>
    %cst_73 = arith.constant dense<0.000000e+00> : vector<2x48xf32>
    %141 = tpu.matmul %127, %35, %cst_73 {dimension_numbers = #tpu.dot_dimension_numbers<[1], [0], [0], [1], [0, 0, 1, 1], [], []>, precision = #tpu.contract_precision<fp32>} : vector<2x16xf32>, vector<16x48xf32>, vector<2x48xf32> -> vector<2x48xf32>
    %142 = vector.extract_strided_slice %140 {offsets = [0, 0], sizes = [2, 16], strides = [1, 1]} : vector<2x48xf32> to vector<2x16xf32>
    %143 = vector.extract_strided_slice %141 {offsets = [0, 0], sizes = [2, 16], strides = [1, 1]} : vector<2x48xf32> to vector<2x16xf32>
    %144 = arith.addf %142, %143 : vector<2x16xf32>
    %145 = arith.negf %144 : vector<2x16xf32>
    %146 = math.exp %145 : vector<2x16xf32>
    %cst_74 = arith.constant 1.000000e+00 : f32
    %147 = vector.broadcast %cst_74 : f32 to vector<2x16xf32>
    %148 = arith.addf %147, %146 : vector<2x16xf32>
    %149 = arith.divf %147, %148 : vector<2x16xf32>
    %150 = vector.extract_strided_slice %140 {offsets = [0, 16], sizes = [2, 16], strides = [1, 1]} : vector<2x48xf32> to vector<2x16xf32>
    %151 = vector.extract_strided_slice %141 {offsets = [0, 16], sizes = [2, 16], strides = [1, 1]} : vector<2x48xf32> to vector<2x16xf32>
    %152 = arith.addf %150, %151 : vector<2x16xf32>
    %153 = arith.negf %152 : vector<2x16xf32>
    %154 = math.exp %153 : vector<2x16xf32>
    %cst_75 = arith.constant 1.000000e+00 : f32
    %155 = vector.broadcast %cst_75 : f32 to vector<2x16xf32>
    %156 = arith.addf %155, %154 : vector<2x16xf32>
    %157 = arith.divf %155, %156 : vector<2x16xf32>
    %158 = vector.extract_strided_slice %140 {offsets = [0, 32], sizes = [2, 16], strides = [1, 1]} : vector<2x48xf32> to vector<2x16xf32>
    %159 = vector.extract_strided_slice %141 {offsets = [0, 32], sizes = [2, 16], strides = [1, 1]} : vector<2x48xf32> to vector<2x16xf32>
    %160 = vector.broadcast %37 : vector<1x16xf32> to vector<2x16xf32>
    %161 = arith.addf %159, %160 : vector<2x16xf32>
    %162 = arith.mulf %149, %161 : vector<2x16xf32>
    %163 = arith.addf %158, %162 : vector<2x16xf32>
    %164 = math.tanh %163 : vector<2x16xf32>
    %cst_76 = arith.constant 1.000000e+00 : f32
    %165 = vector.broadcast %cst_76 : f32 to vector<2x16xf32>
    %166 = arith.subf %165, %157 : vector<2x16xf32>
    %167 = arith.mulf %166, %164 : vector<2x16xf32>
    %168 = arith.mulf %157, %127 : vector<2x16xf32>
    %169 = arith.addf %167, %168 : vector<2x16xf32>
    %170 = vector.broadcast %137 : i32 to vector<2x1xi32>
    %171 = arith.cmpi slt, %170, %38 : vector<2x1xi32>
    %172 = vector.shape_cast %171 : vector<2x1xi1> to vector<2x1xi1>
    %173 = vector.broadcast %172 : vector<2x1xi1> to vector<2x16xi1>
    %174 = arith.select %173, %169, %127 : vector<2x16xi1>, vector<2x16xf32>
    %cst_77 = arith.constant 0.000000e+00 : f32
    %175 = vector.shape_cast %171 : vector<2x1xi1> to vector<2x1xi1>
    %176 = vector.broadcast %175 : vector<2x1xi1> to vector<2x16xi1>
    %177 = vector.broadcast %cst_77 : f32 to vector<2x16xf32>
    %178 = arith.select %176, %174, %177 : vector<2x16xi1>, vector<2x16xf32>
    %c0_78 = arith.constant 0 : index
    %179 = arith.index_cast %137 : i32 to index
    %c0_79 = arith.constant 0 : index
    %c0_80 = arith.constant 0 : index
    %180 = vector.load %arg8[%c0_78, %179, %c0_79, %c0_80] : memref<1x8x2x16xf32, #tpu.memory_space<vmem>>, vector<1x1x2x16xf32>
    %181 = vector.shape_cast %180 : vector<1x1x2x16xf32> to vector<2x16xf32>
    %182 = vector.shape_cast %178 : vector<2x16xf32> to vector<1x1x2x16xf32>
    tpu.vector_store %arg8[%c0_78, %179, %c0_79, %c0_80], %182 {strides = array<i32>} : memref<1x8x2x16xf32, #tpu.memory_space<vmem>>, vector<1x1x2x16xf32>,
    %c3_i32 = arith.constant 3 : i32
    %c7_i32_81 = arith.constant 7 : i32
    %183 = arith.subi %c7_i32_81, %c3_i32 : i32
    %184 = arith.select %39, %183, %c3_i32 : i32
    %185 = arith.index_cast %184 : i32 to index
    %c0_82 = arith.constant 0 : index
    %c0_83 = arith.constant 0 : index
    %186 = vector.load %arg9[%185, %c0_82, %c0_83] : memref<8x2x48xf32, #tpu.memory_space<vmem>>, vector<1x2x48xf32>
    %187 = vector.shape_cast %186 : vector<1x2x48xf32> to vector<2x48xf32>
    %cst_84 = arith.constant dense<0.000000e+00> : vector<2x48xf32>
    %188 = tpu.matmul %174, %35, %cst_84 {dimension_numbers = #tpu.dot_dimension_numbers<[1], [0], [0], [1], [0, 0, 1, 1], [], []>, precision = #tpu.contract_precision<fp32>} : vector<2x16xf32>, vector<16x48xf32>, vector<2x48xf32> -> vector<2x48xf32>
    %189 = vector.extract_strided_slice %187 {offsets = [0, 0], sizes = [2, 16], strides = [1, 1]} : vector<2x48xf32> to vector<2x16xf32>
    %190 = vector.extract_strided_slice %188 {offsets = [0, 0], sizes = [2, 16], strides = [1, 1]} : vector<2x48xf32> to vector<2x16xf32>
    %191 = arith.addf %189, %190 : vector<2x16xf32>
    %192 = arith.negf %191 : vector<2x16xf32>
    %193 = math.exp %192 : vector<2x16xf32>
    %cst_85 = arith.constant 1.000000e+00 : f32
    %194 = vector.broadcast %cst_85 : f32 to vector<2x16xf32>
    %195 = arith.addf %194, %193 : vector<2x16xf32>
    %196 = arith.divf %194, %195 : vector<2x16xf32>
    %197 = vector.extract_strided_slice %187 {offsets = [0, 16], sizes = [2, 16], strides = [1, 1]} : vector<2x48xf32> to vector<2x16xf32>
    %198 = vector.extract_strided_slice %188 {offsets = [0, 16], sizes = [2, 16], strides = [1, 1]} : vector<2x48xf32> to vector<2x16xf32>
    %199 = arith.addf %197, %198 : vector<2x16xf32>
    %200 = arith.negf %199 : vector<2x16xf32>
    %201 = math.exp %200 : vector<2x16xf32>
    %cst_86 = arith.constant 1.000000e+00 : f32
    %202 = vector.broadcast %cst_86 : f32 to vector<2x16xf32>
    %203 = arith.addf %202, %201 : vector<2x16xf32>
    %204 = arith.divf %202, %203 : vector<2x16xf32>
    %205 = vector.extract_strided_slice %187 {offsets = [0, 32], sizes = [2, 16], strides = [1, 1]} : vector<2x48xf32> to vector<2x16xf32>
    %206 = vector.extract_strided_slice %188 {offsets = [0, 32], sizes = [2, 16], strides = [1, 1]} : vector<2x48xf32> to vector<2x16xf32>
    %207 = vector.broadcast %37 : vector<1x16xf32> to vector<2x16xf32>
    %208 = arith.addf %206, %207 : vector<2x16xf32>
    %209 = arith.mulf %196, %208 : vector<2x16xf32>
    %210 = arith.addf %205, %209 : vector<2x16xf32>
    %211 = math.tanh %210 : vector<2x16xf32>
    %cst_87 = arith.constant 1.000000e+00 : f32
    %212 = vector.broadcast %cst_87 : f32 to vector<2x16xf32>
    %213 = arith.subf %212, %204 : vector<2x16xf32>
    %214 = arith.mulf %213, %211 : vector<2x16xf32>
    %215 = arith.mulf %204, %174 : vector<2x16xf32>
    %216 = arith.addf %214, %215 : vector<2x16xf32>
    %217 = vector.broadcast %184 : i32 to vector<2x1xi32>
    %218 = arith.cmpi slt, %217, %38 : vector<2x1xi32>
    %219 = vector.shape_cast %218 : vector<2x1xi1> to vector<2x1xi1>
    %220 = vector.broadcast %219 : vector<2x1xi1> to vector<2x16xi1>
    %221 = arith.select %220, %216, %174 : vector<2x16xi1>, vector<2x16xf32>
    %cst_88 = arith.constant 0.000000e+00 : f32
    %222 = vector.shape_cast %218 : vector<2x1xi1> to vector<2x1xi1>
    %223 = vector.broadcast %222 : vector<2x1xi1> to vector<2x16xi1>
    %224 = vector.broadcast %cst_88 : f32 to vector<2x16xf32>
    %225 = arith.select %223, %221, %224 : vector<2x16xi1>, vector<2x16xf32>
    %c0_89 = arith.constant 0 : index
    %226 = arith.index_cast %184 : i32 to index
    %c0_90 = arith.constant 0 : index
    %c0_91 = arith.constant 0 : index
    %227 = vector.load %arg8[%c0_89, %226, %c0_90, %c0_91] : memref<1x8x2x16xf32, #tpu.memory_space<vmem>>, vector<1x1x2x16xf32>
    %228 = vector.shape_cast %227 : vector<1x1x2x16xf32> to vector<2x16xf32>
    %229 = vector.shape_cast %225 : vector<2x16xf32> to vector<1x1x2x16xf32>
    tpu.vector_store %arg8[%c0_89, %226, %c0_90, %c0_91], %229 {strides = array<i32>} : memref<1x8x2x16xf32, #tpu.memory_space<vmem>>, vector<1x1x2x16xf32>,
    %c4_i32 = arith.constant 4 : i32
    %c7_i32_92 = arith.constant 7 : i32
    %230 = arith.subi %c7_i32_92, %c4_i32 : i32
    %231 = arith.select %39, %230, %c4_i32 : i32
    %232 = arith.index_cast %231 : i32 to index
    %c0_93 = arith.constant 0 : index
    %c0_94 = arith.constant 0 : index
    %233 = vector.load %arg9[%232, %c0_93, %c0_94] : memref<8x2x48xf32, #tpu.memory_space<vmem>>, vector<1x2x48xf32>
    %234 = vector.shape_cast %233 : vector<1x2x48xf32> to vector<2x48xf32>
    %cst_95 = arith.constant dense<0.000000e+00> : vector<2x48xf32>
    %235 = tpu.matmul %221, %35, %cst_95 {dimension_numbers = #tpu.dot_dimension_numbers<[1], [0], [0], [1], [0, 0, 1, 1], [], []>, precision = #tpu.contract_precision<fp32>} : vector<2x16xf32>, vector<16x48xf32>, vector<2x48xf32> -> vector<2x48xf32>
    %236 = vector.extract_strided_slice %234 {offsets = [0, 0], sizes = [2, 16], strides = [1, 1]} : vector<2x48xf32> to vector<2x16xf32>
    %237 = vector.extract_strided_slice %235 {offsets = [0, 0], sizes = [2, 16], strides = [1, 1]} : vector<2x48xf32> to vector<2x16xf32>
    %238 = arith.addf %236, %237 : vector<2x16xf32>
    %239 = arith.negf %238 : vector<2x16xf32>
    %240 = math.exp %239 : vector<2x16xf32>
    %cst_96 = arith.constant 1.000000e+00 : f32
    %241 = vector.broadcast %cst_96 : f32 to vector<2x16xf32>
    %242 = arith.addf %241, %240 : vector<2x16xf32>
    %243 = arith.divf %241, %242 : vector<2x16xf32>
    %244 = vector.extract_strided_slice %234 {offsets = [0, 16], sizes = [2, 16], strides = [1, 1]} : vector<2x48xf32> to vector<2x16xf32>
    %245 = vector.extract_strided_slice %235 {offsets = [0, 16], sizes = [2, 16], strides = [1, 1]} : vector<2x48xf32> to vector<2x16xf32>
    %246 = arith.addf %244, %245 : vector<2x16xf32>
    %247 = arith.negf %246 : vector<2x16xf32>
    %248 = math.exp %247 : vector<2x16xf32>
    %cst_97 = arith.constant 1.000000e+00 : f32
    %249 = vector.broadcast %cst_97 : f32 to vector<2x16xf32>
    %250 = arith.addf %249, %248 : vector<2x16xf32>
    %251 = arith.divf %249, %250 : vector<2x16xf32>
    %252 = vector.extract_strided_slice %234 {offsets = [0, 32], sizes = [2, 16], strides = [1, 1]} : vector<2x48xf32> to vector<2x16xf32>
    %253 = vector.extract_strided_slice %235 {offsets = [0, 32], sizes = [2, 16], strides = [1, 1]} : vector<2x48xf32> to vector<2x16xf32>
    %254 = vector.broadcast %37 : vector<1x16xf32> to vector<2x16xf32>
    %255 = arith.addf %253, %254 : vector<2x16xf32>
    %256 = arith.mulf %243, %255 : vector<2x16xf32>
    %257 = arith.addf %252, %256 : vector<2x16xf32>
    %258 = math.tanh %257 : vector<2x16xf32>
    %cst_98 = arith.constant 1.000000e+00 : f32
    %259 = vector.broadcast %cst_98 : f32 to vector<2x16xf32>
    %260 = arith.subf %259, %251 : vector<2x16xf32>
    %261 = arith.mulf %260, %258 : vector<2x16xf32>
    %262 = arith.mulf %251, %221 : vector<2x16xf32>
    %263 = arith.addf %261, %262 : vector<2x16xf32>
    %264 = vector.broadcast %231 : i32 to vector<2x1xi32>
    %265 = arith.cmpi slt, %264, %38 : vector<2x1xi32>
    %266 = vector.shape_cast %265 : vector<2x1xi1> to vector<2x1xi1>
    %267 = vector.broadcast %266 : vector<2x1xi1> to vector<2x16xi1>
    %268 = arith.select %267, %263, %221 : vector<2x16xi1>, vector<2x16xf32>
    %cst_99 = arith.constant 0.000000e+00 : f32
    %269 = vector.shape_cast %265 : vector<2x1xi1> to vector<2x1xi1>
    %270 = vector.broadcast %269 : vector<2x1xi1> to vector<2x16xi1>
    %271 = vector.broadcast %cst_99 : f32 to vector<2x16xf32>
    %272 = arith.select %270, %268, %271 : vector<2x16xi1>, vector<2x16xf32>
    %c0_100 = arith.constant 0 : index
    %273 = arith.index_cast %231 : i32 to index
    %c0_101 = arith.constant 0 : index
    %c0_102 = arith.constant 0 : index
    %274 = vector.load %arg8[%c0_100, %273, %c0_101, %c0_102] : memref<1x8x2x16xf32, #tpu.memory_space<vmem>>, vector<1x1x2x16xf32>
    %275 = vector.shape_cast %274 : vector<1x1x2x16xf32> to vector<2x16xf32>
    %276 = vector.shape_cast %272 : vector<2x16xf32> to vector<1x1x2x16xf32>
    tpu.vector_store %arg8[%c0_100, %273, %c0_101, %c0_102], %276 {strides = array<i32>} : memref<1x8x2x16xf32, #tpu.memory_space<vmem>>, vector<1x1x2x16xf32>,
    %c5_i32 = arith.constant 5 : i32
    %c7_i32_103 = arith.constant 7 : i32
    %277 = arith.subi %c7_i32_103, %c5_i32 : i32
    %278 = arith.select %39, %277, %c5_i32 : i32
    %279 = arith.index_cast %278 : i32 to index
    %c0_104 = arith.constant 0 : index
    %c0_105 = arith.constant 0 : index
    %280 = vector.load %arg9[%279, %c0_104, %c0_105] : memref<8x2x48xf32, #tpu.memory_space<vmem>>, vector<1x2x48xf32>
    %281 = vector.shape_cast %280 : vector<1x2x48xf32> to vector<2x48xf32>
    %cst_106 = arith.constant dense<0.000000e+00> : vector<2x48xf32>
    %282 = tpu.matmul %268, %35, %cst_106 {dimension_numbers = #tpu.dot_dimension_numbers<[1], [0], [0], [1], [0, 0, 1, 1], [], []>, precision = #tpu.contract_precision<fp32>} : vector<2x16xf32>, vector<16x48xf32>, vector<2x48xf32> -> vector<2x48xf32>
    %283 = vector.extract_strided_slice %281 {offsets = [0, 0], sizes = [2, 16], strides = [1, 1]} : vector<2x48xf32> to vector<2x16xf32>
    %284 = vector.extract_strided_slice %282 {offsets = [0, 0], sizes = [2, 16], strides = [1, 1]} : vector<2x48xf32> to vector<2x16xf32>
    %285 = arith.addf %283, %284 : vector<2x16xf32>
    %286 = arith.negf %285 : vector<2x16xf32>
    %287 = math.exp %286 : vector<2x16xf32>
    %cst_107 = arith.constant 1.000000e+00 : f32
    %288 = vector.broadcast %cst_107 : f32 to vector<2x16xf32>
    %289 = arith.addf %288, %287 : vector<2x16xf32>
    %290 = arith.divf %288, %289 : vector<2x16xf32>
    %291 = vector.extract_strided_slice %281 {offsets = [0, 16], sizes = [2, 16], strides = [1, 1]} : vector<2x48xf32> to vector<2x16xf32>
    %292 = vector.extract_strided_slice %282 {offsets = [0, 16], sizes = [2, 16], strides = [1, 1]} : vector<2x48xf32> to vector<2x16xf32>
    %293 = arith.addf %291, %292 : vector<2x16xf32>
    %294 = arith.negf %293 : vector<2x16xf32>
    %295 = math.exp %294 : vector<2x16xf32>
    %cst_108 = arith.constant 1.000000e+00 : f32
    %296 = vector.broadcast %cst_108 : f32 to vector<2x16xf32>
    %297 = arith.addf %296, %295 : vector<2x16xf32>
    %298 = arith.divf %296, %297 : vector<2x16xf32>
    %299 = vector.extract_strided_slice %281 {offsets = [0, 32], sizes = [2, 16], strides = [1, 1]} : vector<2x48xf32> to vector<2x16xf32>
    %300 = vector.extract_strided_slice %282 {offsets = [0, 32], sizes = [2, 16], strides = [1, 1]} : vector<2x48xf32> to vector<2x16xf32>
    %301 = vector.broadcast %37 : vector<1x16xf32> to vector<2x16xf32>
    %302 = arith.addf %300, %301 : vector<2x16xf32>
    %303 = arith.mulf %290, %302 : vector<2x16xf32>
    %304 = arith.addf %299, %303 : vector<2x16xf32>
    %305 = math.tanh %304 : vector<2x16xf32>
    %cst_109 = arith.constant 1.000000e+00 : f32
    %306 = vector.broadcast %cst_109 : f32 to vector<2x16xf32>
    %307 = arith.subf %306, %298 : vector<2x16xf32>
    %308 = arith.mulf %307, %305 : vector<2x16xf32>
    %309 = arith.mulf %298, %268 : vector<2x16xf32>
    %310 = arith.addf %308, %309 : vector<2x16xf32>
    %311 = vector.broadcast %278 : i32 to vector<2x1xi32>
    %312 = arith.cmpi slt, %311, %38 : vector<2x1xi32>
    %313 = vector.shape_cast %312 : vector<2x1xi1> to vector<2x1xi1>
    %314 = vector.broadcast %313 : vector<2x1xi1> to vector<2x16xi1>
    %315 = arith.select %314, %310, %268 : vector<2x16xi1>, vector<2x16xf32>
    %cst_110 = arith.constant 0.000000e+00 : f32
    %316 = vector.shape_cast %312 : vector<2x1xi1> to vector<2x1xi1>
    %317 = vector.broadcast %316 : vector<2x1xi1> to vector<2x16xi1>
    %318 = vector.broadcast %cst_110 : f32 to vector<2x16xf32>
    %319 = arith.select %317, %315, %318 : vector<2x16xi1>, vector<2x16xf32>
    %c0_111 = arith.constant 0 : index
    %320 = arith.index_cast %278 : i32 to index
    %c0_112 = arith.constant 0 : index
    %c0_113 = arith.constant 0 : index
    %321 = vector.load %arg8[%c0_111, %320, %c0_112, %c0_113] : memref<1x8x2x16xf32, #tpu.memory_space<vmem>>, vector<1x1x2x16xf32>
    %322 = vector.shape_cast %321 : vector<1x1x2x16xf32> to vector<2x16xf32>
    %323 = vector.shape_cast %319 : vector<2x16xf32> to vector<1x1x2x16xf32>
    tpu.vector_store %arg8[%c0_111, %320, %c0_112, %c0_113], %323 {strides = array<i32>} : memref<1x8x2x16xf32, #tpu.memory_space<vmem>>, vector<1x1x2x16xf32>,
    %c6_i32 = arith.constant 6 : i32
    %c7_i32_114 = arith.constant 7 : i32
    %324 = arith.subi %c7_i32_114, %c6_i32 : i32
    %325 = arith.select %39, %324, %c6_i32 : i32
    %326 = arith.index_cast %325 : i32 to index
    %c0_115 = arith.constant 0 : index
    %c0_116 = arith.constant 0 : index
    %327 = vector.load %arg9[%326, %c0_115, %c0_116] : memref<8x2x48xf32, #tpu.memory_space<vmem>>, vector<1x2x48xf32>
    %328 = vector.shape_cast %327 : vector<1x2x48xf32> to vector<2x48xf32>
    %cst_117 = arith.constant dense<0.000000e+00> : vector<2x48xf32>
    %329 = tpu.matmul %315, %35, %cst_117 {dimension_numbers = #tpu.dot_dimension_numbers<[1], [0], [0], [1], [0, 0, 1, 1], [], []>, precision = #tpu.contract_precision<fp32>} : vector<2x16xf32>, vector<16x48xf32>, vector<2x48xf32> -> vector<2x48xf32>
    %330 = vector.extract_strided_slice %328 {offsets = [0, 0], sizes = [2, 16], strides = [1, 1]} : vector<2x48xf32> to vector<2x16xf32>
    %331 = vector.extract_strided_slice %329 {offsets = [0, 0], sizes = [2, 16], strides = [1, 1]} : vector<2x48xf32> to vector<2x16xf32>
    %332 = arith.addf %330, %331 : vector<2x16xf32>
    %333 = arith.negf %332 : vector<2x16xf32>
    %334 = math.exp %333 : vector<2x16xf32>
    %cst_118 = arith.constant 1.000000e+00 : f32
    %335 = vector.broadcast %cst_118 : f32 to vector<2x16xf32>
    %336 = arith.addf %335, %334 : vector<2x16xf32>
    %337 = arith.divf %335, %336 : vector<2x16xf32>
    %338 = vector.extract_strided_slice %328 {offsets = [0, 16], sizes = [2, 16], strides = [1, 1]} : vector<2x48xf32> to vector<2x16xf32>
    %339 = vector.extract_strided_slice %329 {offsets = [0, 16], sizes = [2, 16], strides = [1, 1]} : vector<2x48xf32> to vector<2x16xf32>
    %340 = arith.addf %338, %339 : vector<2x16xf32>
    %341 = arith.negf %340 : vector<2x16xf32>
    %342 = math.exp %341 : vector<2x16xf32>
    %cst_119 = arith.constant 1.000000e+00 : f32
    %343 = vector.broadcast %cst_119 : f32 to vector<2x16xf32>
    %344 = arith.addf %343, %342 : vector<2x16xf32>
    %345 = arith.divf %343, %344 : vector<2x16xf32>
    %346 = vector.extract_strided_slice %328 {offsets = [0, 32], sizes = [2, 16], strides = [1, 1]} : vector<2x48xf32> to vector<2x16xf32>
    %347 = vector.extract_strided_slice %329 {offsets = [0, 32], sizes = [2, 16], strides = [1, 1]} : vector<2x48xf32> to vector<2x16xf32>
    %348 = vector.broadcast %37 : vector<1x16xf32> to vector<2x16xf32>
    %349 = arith.addf %347, %348 : vector<2x16xf32>
    %350 = arith.mulf %337, %349 : vector<2x16xf32>
    %351 = arith.addf %346, %350 : vector<2x16xf32>
    %352 = math.tanh %351 : vector<2x16xf32>
    %cst_120 = arith.constant 1.000000e+00 : f32
    %353 = vector.broadcast %cst_120 : f32 to vector<2x16xf32>
    %354 = arith.subf %353, %345 : vector<2x16xf32>
    %355 = arith.mulf %354, %352 : vector<2x16xf32>
    %356 = arith.mulf %345, %315 : vector<2x16xf32>
    %357 = arith.addf %355, %356 : vector<2x16xf32>
    %358 = vector.broadcast %325 : i32 to vector<2x1xi32>
    %359 = arith.cmpi slt, %358, %38 : vector<2x1xi32>
    %360 = vector.shape_cast %359 : vector<2x1xi1> to vector<2x1xi1>
    %361 = vector.broadcast %360 : vector<2x1xi1> to vector<2x16xi1>
    %362 = arith.select %361, %357, %315 : vector<2x16xi1>, vector<2x16xf32>
    %cst_121 = arith.constant 0.000000e+00 : f32
    %363 = vector.shape_cast %359 : vector<2x1xi1> to vector<2x1xi1>
    %364 = vector.broadcast %363 : vector<2x1xi1> to vector<2x16xi1>
    %365 = vector.broadcast %cst_121 : f32 to vector<2x16xf32>
    %366 = arith.select %364, %362, %365 : vector<2x16xi1>, vector<2x16xf32>
    %c0_122 = arith.constant 0 : index
    %367 = arith.index_cast %325 : i32 to index
    %c0_123 = arith.constant 0 : index
    %c0_124 = arith.constant 0 : index
    %368 = vector.load %arg8[%c0_122, %367, %c0_123, %c0_124] : memref<1x8x2x16xf32, #tpu.memory_space<vmem>>, vector<1x1x2x16xf32>
    %369 = vector.shape_cast %368 : vector<1x1x2x16xf32> to vector<2x16xf32>
    %370 = vector.shape_cast %366 : vector<2x16xf32> to vector<1x1x2x16xf32>
    tpu.vector_store %arg8[%c0_122, %367, %c0_123, %c0_124], %370 {strides = array<i32>} : memref<1x8x2x16xf32, #tpu.memory_space<vmem>>, vector<1x1x2x16xf32>,
    %c7_i32_125 = arith.constant 7 : i32
    %c7_i32_126 = arith.constant 7 : i32
    %371 = arith.subi %c7_i32_126, %c7_i32_125 : i32
    %372 = arith.select %39, %371, %c7_i32_125 : i32
    %373 = arith.index_cast %372 : i32 to index
    %c0_127 = arith.constant 0 : index
    %c0_128 = arith.constant 0 : index
    %374 = vector.load %arg9[%373, %c0_127, %c0_128] : memref<8x2x48xf32, #tpu.memory_space<vmem>>, vector<1x2x48xf32>
    %375 = vector.shape_cast %374 : vector<1x2x48xf32> to vector<2x48xf32>
    %cst_129 = arith.constant dense<0.000000e+00> : vector<2x48xf32>
    %376 = tpu.matmul %362, %35, %cst_129 {dimension_numbers = #tpu.dot_dimension_numbers<[1], [0], [0], [1], [0, 0, 1, 1], [], []>, precision = #tpu.contract_precision<fp32>} : vector<2x16xf32>, vector<16x48xf32>, vector<2x48xf32> -> vector<2x48xf32>
    %377 = vector.extract_strided_slice %375 {offsets = [0, 0], sizes = [2, 16], strides = [1, 1]} : vector<2x48xf32> to vector<2x16xf32>
    %378 = vector.extract_strided_slice %376 {offsets = [0, 0], sizes = [2, 16], strides = [1, 1]} : vector<2x48xf32> to vector<2x16xf32>
    %379 = arith.addf %377, %378 : vector<2x16xf32>
    %380 = arith.negf %379 : vector<2x16xf32>
    %381 = math.exp %380 : vector<2x16xf32>
    %cst_130 = arith.constant 1.000000e+00 : f32
    %382 = vector.broadcast %cst_130 : f32 to vector<2x16xf32>
    %383 = arith.addf %382, %381 : vector<2x16xf32>
    %384 = arith.divf %382, %383 : vector<2x16xf32>
    %385 = vector.extract_strided_slice %375 {offsets = [0, 16], sizes = [2, 16], strides = [1, 1]} : vector<2x48xf32> to vector<2x16xf32>
    %386 = vector.extract_strided_slice %376 {offsets = [0, 16], sizes = [2, 16], strides = [1, 1]} : vector<2x48xf32> to vector<2x16xf32>
    %387 = arith.addf %385, %386 : vector<2x16xf32>
    %388 = arith.negf %387 : vector<2x16xf32>
    %389 = math.exp %388 : vector<2x16xf32>
    %cst_131 = arith.constant 1.000000e+00 : f32
    %390 = vector.broadcast %cst_131 : f32 to vector<2x16xf32>
    %391 = arith.addf %390, %389 : vector<2x16xf32>
    %392 = arith.divf %390, %391 : vector<2x16xf32>
    %393 = vector.extract_strided_slice %375 {offsets = [0, 32], sizes = [2, 16], strides = [1, 1]} : vector<2x48xf32> to vector<2x16xf32>
    %394 = vector.extract_strided_slice %376 {offsets = [0, 32], sizes = [2, 16], strides = [1, 1]} : vector<2x48xf32> to vector<2x16xf32>
    %395 = vector.broadcast %37 : vector<1x16xf32> to vector<2x16xf32>
    %396 = arith.addf %394, %395 : vector<2x16xf32>
    %397 = arith.mulf %384, %396 : vector<2x16xf32>
    %398 = arith.addf %393, %397 : vector<2x16xf32>
    %399 = math.tanh %398 : vector<2x16xf32>
    %cst_132 = arith.constant 1.000000e+00 : f32
    %400 = vector.broadcast %cst_132 : f32 to vector<2x16xf32>
    %401 = arith.subf %400, %392 : vector<2x16xf32>
    %402 = arith.mulf %401, %399 : vector<2x16xf32>
    %403 = arith.mulf %392, %362 : vector<2x16xf32>
    %404 = arith.addf %402, %403 : vector<2x16xf32>
    %405 = vector.broadcast %372 : i32 to vector<2x1xi32>
    %406 = arith.cmpi slt, %405, %38 : vector<2x1xi32>
    %407 = vector.shape_cast %406 : vector<2x1xi1> to vector<2x1xi1>
    %408 = vector.broadcast %407 : vector<2x1xi1> to vector<2x16xi1>
    %409 = arith.select %408, %404, %362 : vector<2x16xi1>, vector<2x16xf32>
    %cst_133 = arith.constant 0.000000e+00 : f32
    %410 = vector.shape_cast %406 : vector<2x1xi1> to vector<2x1xi1>
    %411 = vector.broadcast %410 : vector<2x1xi1> to vector<2x16xi1>
    %412 = vector.broadcast %cst_133 : f32 to vector<2x16xf32>
    %413 = arith.select %411, %409, %412 : vector<2x16xi1>, vector<2x16xf32>
    %c0_134 = arith.constant 0 : index
    %414 = arith.index_cast %372 : i32 to index
    %c0_135 = arith.constant 0 : index
    %c0_136 = arith.constant 0 : index
    %415 = vector.load %arg8[%c0_134, %414, %c0_135, %c0_136] : memref<1x8x2x16xf32, #tpu.memory_space<vmem>>, vector<1x1x2x16xf32>
    %416 = vector.shape_cast %415 : vector<1x1x2x16xf32> to vector<2x16xf32>
    %417 = vector.shape_cast %413 : vector<2x16xf32> to vector<1x1x2x16xf32>
    tpu.vector_store %arg8[%c0_134, %414, %c0_135, %c0_136], %417 {strides = array<i32>} : memref<1x8x2x16xf32, #tpu.memory_space<vmem>>, vector<1x1x2x16xf32>,
    %c8_i32 = arith.constant 8 : i32
    return
  }
  func.func @transform_0(%arg0: i32) -> (i32, i32, i32, i32) {
    %c0_i32 = arith.constant 0 : i32
    %c0_i32_0 = arith.constant 0 : i32
    %c0_i32_1 = arith.constant 0 : i32
    %c0_i32_2 = arith.constant 0 : i32
    %c0_i32_3 = arith.constant 0 : i32
    return %c0_i32, %c0_i32_0, %c0_i32_1, %c0_i32_2 : i32, i32, i32, i32
  }
  func.func @transform_1(%arg0: i32) -> (i32, i32, i32) {
    %c0_i32 = arith.constant 0 : i32
    %c0_i32_0 = arith.constant 0 : i32
    %c0_i32_1 = arith.constant 0 : i32
    return %arg0, %c0_i32, %c0_i32_0 : i32, i32, i32
  }
  func.func @transform_2(%arg0: i32) -> (i32, i32, i32) {
    %c0_i32 = arith.constant 0 : i32
    %c0_i32_0 = arith.constant 0 : i32
    %c0_i32_1 = arith.constant 0 : i32
    return %arg0, %c0_i32, %c0_i32_0 : i32, i32, i32
  }
  func.func @transform_3(%arg0: i32) -> (i32, i32, i32) {
    %c0_i32 = arith.constant 0 : i32
    %c0_i32_0 = arith.constant 0 : i32
    %c0_i32_1 = arith.constant 0 : i32
    return %arg0, %c0_i32, %c0_i32_0 : i32, i32, i32
  }
  func.func @transform_4(%arg0: i32) -> (i32, i32, i32) {
    %c0_i32 = arith.constant 0 : i32
    %c0_i32_0 = arith.constant 0 : i32
    %c0_i32_1 = arith.constant 0 : i32
    return %arg0, %c0_i32, %c0_i32_0 : i32, i32, i32
  }
  func.func @transform_5(%arg0: i32) -> (i32, i32, i32) {
    %c0_i32 = arith.constant 0 : i32
    %c0_i32_0 = arith.constant 0 : i32
    %c0_i32_1 = arith.constant 0 : i32
    return %arg0, %c0_i32, %c0_i32_0 : i32, i32, i32
  }
  func.func @transform_6(%arg0: i32) -> (i32, i32) {
    %c0_i32 = arith.constant 0 : i32
    %c0_i32_0 = arith.constant 0 : i32
    %c0_i32_1 = arith.constant 0 : i32
    return %c0_i32, %c0_i32_0 : i32, i32
  }
  func.func @transform_7(%arg0: i32) -> (i32, i32, i32, i32) {
    %c0_i32 = arith.constant 0 : i32
    %c0_i32_0 = arith.constant 0 : i32
    %c0_i32_1 = arith.constant 0 : i32
    %c0_i32_2 = arith.constant 0 : i32
    return %arg0, %c0_i32, %c0_i32_0, %c0_i32_1 : i32, i32, i32, i32
  }
}

module attributes {stable_mosaic.version = 11 : i64} {
  func.func @_classifier_logsoftmax_kernel(%arg0: i32, %arg1: memref<2x8x2x16xf32, #tpu.memory_space<vmem>>, %arg2: memref<32x10xf32, #tpu.memory_space<vmem>>, %arg3: memref<1x10xf32, #tpu.memory_space<vmem>>, %arg4: memref<2x8x10xf32, #tpu.memory_space<vmem>>) attributes {dimension_semantics = [#tpu.dimension_semantics<arbitrary>], iteration_bounds = array<i64: 1>, scalar_prefetch = 0 : i64, scratch_operands = 0 : i64, tpu.core_type = #tpu.core_type<tc>, window_params = [{pipeline_mode = #tpu.pipeline_mode<synchronous>, transform_indices = @transform_0, window_bounds = array<i64: 2, 8, 2, 16>}, {pipeline_mode = #tpu.pipeline_mode<synchronous>, transform_indices = @transform_1, window_bounds = array<i64: 32, 10>}, {pipeline_mode = #tpu.pipeline_mode<synchronous>, transform_indices = @transform_2, window_bounds = array<i64: 1, 10>}, {pipeline_mode = #tpu.pipeline_mode<synchronous>, transform_indices = @transform_3, window_bounds = array<i64: 2, 8, 10>}]} {
    %c0 = arith.constant 0 : index
    %c0_0 = arith.constant 0 : index
    %0 = vector.load %arg2[%c0, %c0_0] : memref<32x10xf32, #tpu.memory_space<vmem>>, vector<16x10xf32>
    %c16 = arith.constant 16 : index
    %c0_1 = arith.constant 0 : index
    %1 = vector.load %arg2[%c16, %c0_1] : memref<32x10xf32, #tpu.memory_space<vmem>>, vector<16x10xf32>
    %c0_2 = arith.constant 0 : index
    %c0_3 = arith.constant 0 : index
    %2 = vector.load %arg3[%c0_2, %c0_3] : memref<1x10xf32, #tpu.memory_space<vmem>>, vector<1x10xf32>
    %c0_4 = arith.constant 0 : index
    %c0_5 = arith.constant 0 : index
    %c0_6 = arith.constant 0 : index
    %c0_7 = arith.constant 0 : index
    %3 = vector.load %arg1[%c0_4, %c0_5, %c0_6, %c0_7] : memref<2x8x2x16xf32, #tpu.memory_space<vmem>>, vector<1x8x1x16xf32>
    %4 = vector.shape_cast %3 : vector<1x8x1x16xf32> to vector<8x16xf32>
    %cst = arith.constant dense<0.000000e+00> : vector<8x10xf32>
    %5 = tpu.matmul %4, %0, %cst {dimension_numbers = #tpu.dot_dimension_numbers<[1], [0], [0], [1], [0, 0, 1, 1], [], []>, precision = #tpu.contract_precision<fp32>} : vector<8x16xf32>, vector<16x10xf32>, vector<8x10xf32> -> vector<8x10xf32>
    %c1 = arith.constant 1 : index
    %c0_8 = arith.constant 0 : index
    %c0_9 = arith.constant 0 : index
    %c0_10 = arith.constant 0 : index
    %6 = vector.load %arg1[%c1, %c0_8, %c0_9, %c0_10] : memref<2x8x2x16xf32, #tpu.memory_space<vmem>>, vector<1x8x1x16xf32>
    %7 = vector.shape_cast %6 : vector<1x8x1x16xf32> to vector<8x16xf32>
    %cst_11 = arith.constant dense<0.000000e+00> : vector<8x10xf32>
    %8 = tpu.matmul %7, %1, %cst_11 {dimension_numbers = #tpu.dot_dimension_numbers<[1], [0], [0], [1], [0, 0, 1, 1], [], []>, precision = #tpu.contract_precision<fp32>} : vector<8x16xf32>, vector<16x10xf32>, vector<8x10xf32> -> vector<8x10xf32>
    %9 = arith.addf %5, %8 : vector<8x10xf32>
    %10 = vector.broadcast %2 : vector<1x10xf32> to vector<8x10xf32>
    %11 = arith.addf %9, %10 : vector<8x10xf32>
    %cst_12 = arith.constant dense<0xFF800000> : vector<10xf32>
    %12 = vector.multi_reduction <maximumf>, %11, %cst_12 [0] : vector<8x10xf32> to vector<10xf32>
    %13 = vector.shape_cast %12 : vector<10xf32> to vector<1x10xf32>
    %14 = vector.broadcast %13 : vector<1x10xf32> to vector<8x10xf32>
    %15 = arith.subf %11, %14 : vector<8x10xf32>
    %16 = math.exp %15 : vector<8x10xf32>
    %cst_13 = arith.constant dense<0.000000e+00> : vector<10xf32>
    %17 = vector.multi_reduction <add>, %16, %cst_13 [0] : vector<8x10xf32> to vector<10xf32>
    %18 = vector.shape_cast %17 : vector<10xf32> to vector<1x10xf32>
    %19 = math.log %18 : vector<1x10xf32>
    %20 = arith.addf %13, %19 : vector<1x10xf32>
    %21 = vector.broadcast %20 : vector<1x10xf32> to vector<8x10xf32>
    %22 = arith.subf %11, %21 : vector<8x10xf32>
    %c0_14 = arith.constant 0 : index
    %c0_15 = arith.constant 0 : index
    %c0_16 = arith.constant 0 : index
    %23 = vector.load %arg4[%c0_14, %c0_15, %c0_16] : memref<2x8x10xf32, #tpu.memory_space<vmem>>, vector<1x8x10xf32>
    %24 = vector.shape_cast %23 : vector<1x8x10xf32> to vector<8x10xf32>
    %25 = vector.shape_cast %22 : vector<8x10xf32> to vector<1x8x10xf32>
    tpu.vector_store %arg4[%c0_14, %c0_15, %c0_16], %25 {strides = array<i32>} : memref<2x8x10xf32, #tpu.memory_space<vmem>>, vector<1x8x10xf32>,
    %c0_17 = arith.constant 0 : index
    %c0_18 = arith.constant 0 : index
    %c1_19 = arith.constant 1 : index
    %c0_20 = arith.constant 0 : index
    %26 = vector.load %arg1[%c0_17, %c0_18, %c1_19, %c0_20] : memref<2x8x2x16xf32, #tpu.memory_space<vmem>>, vector<1x8x1x16xf32>
    %27 = vector.shape_cast %26 : vector<1x8x1x16xf32> to vector<8x16xf32>
    %cst_21 = arith.constant dense<0.000000e+00> : vector<8x10xf32>
    %28 = tpu.matmul %27, %0, %cst_21 {dimension_numbers = #tpu.dot_dimension_numbers<[1], [0], [0], [1], [0, 0, 1, 1], [], []>, precision = #tpu.contract_precision<fp32>} : vector<8x16xf32>, vector<16x10xf32>, vector<8x10xf32> -> vector<8x10xf32>
    %c1_22 = arith.constant 1 : index
    %c0_23 = arith.constant 0 : index
    %c1_24 = arith.constant 1 : index
    %c0_25 = arith.constant 0 : index
    %29 = vector.load %arg1[%c1_22, %c0_23, %c1_24, %c0_25] : memref<2x8x2x16xf32, #tpu.memory_space<vmem>>, vector<1x8x1x16xf32>
    %30 = vector.shape_cast %29 : vector<1x8x1x16xf32> to vector<8x16xf32>
    %cst_26 = arith.constant dense<0.000000e+00> : vector<8x10xf32>
    %31 = tpu.matmul %30, %1, %cst_26 {dimension_numbers = #tpu.dot_dimension_numbers<[1], [0], [0], [1], [0, 0, 1, 1], [], []>, precision = #tpu.contract_precision<fp32>} : vector<8x16xf32>, vector<16x10xf32>, vector<8x10xf32> -> vector<8x10xf32>
    %32 = arith.addf %28, %31 : vector<8x10xf32>
    %33 = vector.broadcast %2 : vector<1x10xf32> to vector<8x10xf32>
    %34 = arith.addf %32, %33 : vector<8x10xf32>
    %cst_27 = arith.constant dense<0xFF800000> : vector<10xf32>
    %35 = vector.multi_reduction <maximumf>, %34, %cst_27 [0] : vector<8x10xf32> to vector<10xf32>
    %36 = vector.shape_cast %35 : vector<10xf32> to vector<1x10xf32>
    %37 = vector.broadcast %36 : vector<1x10xf32> to vector<8x10xf32>
    %38 = arith.subf %34, %37 : vector<8x10xf32>
    %39 = math.exp %38 : vector<8x10xf32>
    %cst_28 = arith.constant dense<0.000000e+00> : vector<10xf32>
    %40 = vector.multi_reduction <add>, %39, %cst_28 [0] : vector<8x10xf32> to vector<10xf32>
    %41 = vector.shape_cast %40 : vector<10xf32> to vector<1x10xf32>
    %42 = math.log %41 : vector<1x10xf32>
    %43 = arith.addf %36, %42 : vector<1x10xf32>
    %44 = vector.broadcast %43 : vector<1x10xf32> to vector<8x10xf32>
    %45 = arith.subf %34, %44 : vector<8x10xf32>
    %c1_29 = arith.constant 1 : index
    %c0_30 = arith.constant 0 : index
    %c0_31 = arith.constant 0 : index
    %46 = vector.load %arg4[%c1_29, %c0_30, %c0_31] : memref<2x8x10xf32, #tpu.memory_space<vmem>>, vector<1x8x10xf32>
    %47 = vector.shape_cast %46 : vector<1x8x10xf32> to vector<8x10xf32>
    %48 = vector.shape_cast %45 : vector<8x10xf32> to vector<1x8x10xf32>
    tpu.vector_store %arg4[%c1_29, %c0_30, %c0_31], %48 {strides = array<i32>} : memref<2x8x10xf32, #tpu.memory_space<vmem>>, vector<1x8x10xf32>,
    return
  }
  func.func @transform_0(%arg0: i32) -> (i32, i32, i32, i32) {
    %c0_i32 = arith.constant 0 : i32
    %c0_i32_0 = arith.constant 0 : i32
    %c0_i32_1 = arith.constant 0 : i32
    %c0_i32_2 = arith.constant 0 : i32
    %c0_i32_3 = arith.constant 0 : i32
    return %c0_i32, %c0_i32_0, %c0_i32_1, %c0_i32_2 : i32, i32, i32, i32
  }
  func.func @transform_1(%arg0: i32) -> (i32, i32) {
    %c0_i32 = arith.constant 0 : i32
    %c0_i32_0 = arith.constant 0 : i32
    %c0_i32_1 = arith.constant 0 : i32
    return %c0_i32, %c0_i32_0 : i32, i32
  }
  func.func @transform_2(%arg0: i32) -> (i32, i32) {
    %c0_i32 = arith.constant 0 : i32
    %c0_i32_0 = arith.constant 0 : i32
    %c0_i32_1 = arith.constant 0 : i32
    return %c0_i32, %c0_i32_0 : i32, i32
  }
  func.func @transform_3(%arg0: i32) -> (i32, i32, i32) {
    %c0_i32 = arith.constant 0 : i32
    %c0_i32_0 = arith.constant 0 : i32
    %c0_i32_1 = arith.constant 0 : i32
    %c0_i32_2 = arith.constant 0 : i32
    return %c0_i32, %c0_i32_0, %c0_i32_1 : i32, i32, i32
  }
}

module attributes {stable_mosaic.version = 11 : i64} {
  func.func @_bidir_gru_layer_kernel(%arg0: i32, %arg1: memref<2x8x8xf32, #tpu.memory_space<vmem>>, %arg2: memref<1x8x48xf32, #tpu.memory_space<vmem>>, %arg3: memref<1x16x48xf32, #tpu.memory_space<vmem>>, %arg4: memref<1x1x48xf32, #tpu.memory_space<vmem>>, %arg5: memref<1x1x16xf32, #tpu.memory_space<vmem>>, %arg6: memref<1x2x16xf32, #tpu.memory_space<vmem>>, %arg7: memref<2x1xi32, #tpu.memory_space<vmem>>, %arg8: memref<1x8x2x16xf32, #tpu.memory_space<vmem>>, %arg9: memref<8x2x48xf32, #tpu.memory_space<vmem>>) attributes {dimension_semantics = [#tpu.dimension_semantics<parallel>], iteration_bounds = array<i64: 2>, scalar_prefetch = 0 : i64, scratch_operands = 1 : i64, tpu.core_type = #tpu.core_type<tc>, window_params = [{pipeline_mode = #tpu.pipeline_mode<synchronous>, transform_indices = @transform_0, window_bounds = array<i64: 2, 8, 8>}, {transform_indices = @transform_1, window_bounds = array<i64: 1, 8, 48>}, {transform_indices = @transform_2, window_bounds = array<i64: 1, 16, 48>}, {transform_indices = @transform_3, window_bounds = array<i64: 1, 1, 48>}, {transform_indices = @transform_4, window_bounds = array<i64: 1, 1, 16>}, {transform_indices = @transform_5, window_bounds = array<i64: 1, 2, 16>}, {pipeline_mode = #tpu.pipeline_mode<synchronous>, transform_indices = @transform_6, window_bounds = array<i64: 2, 1>}, {transform_indices = @transform_7, window_bounds = array<i64: 1, 8, 2, 16>}]} {
    %c0 = arith.constant 0 : index
    %c0_0 = arith.constant 0 : index
    %c0_1 = arith.constant 0 : index
    %0 = vector.load %arg4[%c0, %c0_0, %c0_1] : memref<1x1x48xf32, #tpu.memory_space<vmem>>, vector<1x1x48xf32>
    %1 = vector.shape_cast %0 : vector<1x1x48xf32> to vector<1x48xf32>
    %c0_2 = arith.constant 0 : index
    %c0_3 = arith.constant 0 : index
    %c0_4 = arith.constant 0 : index
    %2 = vector.load %arg1[%c0_2, %c0_3, %c0_4] : memref<2x8x8xf32, #tpu.memory_space<vmem>>, vector<1x8x8xf32>
    %3 = vector.shape_cast %2 : vector<1x8x8xf32> to vector<8x8xf32>
    %c0_5 = arith.constant 0 : index
    %c0_6 = arith.constant 0 : index
    %c0_7 = arith.constant 0 : index
    %4 = vector.load %arg2[%c0_5, %c0_6, %c0_7] : memref<1x8x48xf32, #tpu.memory_space<vmem>>, vector<1x8x48xf32>
    %5 = vector.shape_cast %4 : vector<1x8x48xf32> to vector<8x48xf32>
    %cst = arith.constant dense<0.000000e+00> : vector<8x48xf32>
    %6 = tpu.matmul %3, %5, %cst {dimension_numbers = #tpu.dot_dimension_numbers<[1], [0], [0], [1], [0, 0, 1, 1], [], []>, precision = #tpu.contract_precision<fp32>} : vector<8x8xf32>, vector<8x48xf32>, vector<8x48xf32> -> vector<8x48xf32>
    %7 = vector.broadcast %1 : vector<1x48xf32> to vector<8x48xf32>
    %8 = arith.addf %6, %7 : vector<8x48xf32>
    %c0_8 = arith.constant 0 : index
    %c0_9 = arith.constant 0 : index
    %c0_10 = arith.constant 0 : index
    %9 = vector.load %arg9[%c0_8, %c0_9, %c0_10] : memref<8x2x48xf32, #tpu.memory_space<vmem>>, vector<8x1x48xf32>
    %10 = vector.shape_cast %9 : vector<8x1x48xf32> to vector<8x48xf32>
    %11 = vector.shape_cast %8 : vector<8x48xf32> to vector<8x1x48xf32>
    tpu.vector_store %arg9[%c0_8, %c0_9, %c0_10], %11 {strides = array<i32>} : memref<8x2x48xf32, #tpu.memory_space<vmem>>, vector<8x1x48xf32>,
    %c1 = arith.constant 1 : index
    %c0_11 = arith.constant 0 : index
    %c0_12 = arith.constant 0 : index
    %12 = vector.load %arg1[%c1, %c0_11, %c0_12] : memref<2x8x8xf32, #tpu.memory_space<vmem>>, vector<1x8x8xf32>
    %13 = vector.shape_cast %12 : vector<1x8x8xf32> to vector<8x8xf32>
    %c0_13 = arith.constant 0 : index
    %c0_14 = arith.constant 0 : index
    %c0_15 = arith.constant 0 : index
    %14 = vector.load %arg2[%c0_13, %c0_14, %c0_15] : memref<1x8x48xf32, #tpu.memory_space<vmem>>, vector<1x8x48xf32>
    %15 = vector.shape_cast %14 : vector<1x8x48xf32> to vector<8x48xf32>
    %cst_16 = arith.constant dense<0.000000e+00> : vector<8x48xf32>
    %16 = tpu.matmul %13, %15, %cst_16 {dimension_numbers = #tpu.dot_dimension_numbers<[1], [0], [0], [1], [0, 0, 1, 1], [], []>, precision = #tpu.contract_precision<fp32>} : vector<8x8xf32>, vector<8x48xf32>, vector<8x48xf32> -> vector<8x48xf32>
    %17 = vector.broadcast %1 : vector<1x48xf32> to vector<8x48xf32>
    %18 = arith.addf %16, %17 : vector<8x48xf32>
    %c0_17 = arith.constant 0 : index
    %c1_18 = arith.constant 1 : index
    %c0_19 = arith.constant 0 : index
    %19 = vector.load %arg9[%c0_17, %c1_18, %c0_19] : memref<8x2x48xf32, #tpu.memory_space<vmem>>, vector<8x1x48xf32>
    %20 = vector.shape_cast %19 : vector<8x1x48xf32> to vector<8x48xf32>
    %21 = vector.shape_cast %18 : vector<8x48xf32> to vector<8x1x48xf32>
    tpu.vector_store %arg9[%c0_17, %c1_18, %c0_19], %21 {strides = array<i32>} : memref<8x2x48xf32, #tpu.memory_space<vmem>>, vector<8x1x48xf32>,
    %c0_20 = arith.constant 0 : index
    %c0_21 = arith.constant 0 : index
    %c0_22 = arith.constant 0 : index
    %22 = vector.load %arg3[%c0_20, %c0_21, %c0_22] : memref<1x16x48xf32, #tpu.memory_space<vmem>>, vector<1x16x48xf32>
    %23 = vector.shape_cast %22 : vector<1x16x48xf32> to vector<16x48xf32>
    %c0_23 = arith.constant 0 : index
    %c0_24 = arith.constant 0 : index
    %c0_25 = arith.constant 0 : index
    %24 = vector.load %arg5[%c0_23, %c0_24, %c0_25] : memref<1x1x16xf32, #tpu.memory_space<vmem>>, vector<1x1x16xf32>
    %25 = vector.shape_cast %24 : vector<1x1x16xf32> to vector<1x16xf32>
    %c0_26 = arith.constant 0 : index
    %c0_27 = arith.constant 0 : index
    %26 = vector.load %arg7[%c0_26, %c0_27] : memref<2x1xi32, #tpu.memory_space<vmem>>, vector<2x1xi32>
    %c1_i32 = arith.constant 1 : i32
    %27 = arith.cmpi eq, %arg0, %c1_i32 : i32
    %c0_28 = arith.constant 0 : index
    %c0_29 = arith.constant 0 : index
    %c0_30 = arith.constant 0 : index
    %28 = vector.load %arg6[%c0_28, %c0_29, %c0_30] : memref<1x2x16xf32, #tpu.memory_space<vmem>>, vector<1x2x16xf32>
    %29 = vector.shape_cast %28 : vector<1x2x16xf32> to vector<2x16xf32>
    %c0_i32 = arith.constant 0 : i32
    %c7_i32 = arith.constant 7 : i32
    %30 = arith.subi %c7_i32, %c0_i32 : i32
    %31 = arith.select %27, %30, %c0_i32 : i32
    %32 = arith.index_cast %31 : i32 to index
    %c0_31 = arith.constant 0 : index
    %c0_32 = arith.constant 0 : index
    %33 = vector.load %arg9[%32, %c0_31, %c0_32] : memref<8x2x48xf32, #tpu.memory_space<vmem>>, vector<1x2x48xf32>
    %34 = vector.shape_cast %33 : vector<1x2x48xf32> to vector<2x48xf32>
    %cst_33 = arith.constant dense<0.000000e+00> : vector<2x48xf32>
    %35 = tpu.matmul %29, %23, %cst_33 {dimension_numbers = #tpu.dot_dimension_numbers<[1], [0], [0], [1], [0, 0, 1, 1], [], []>, precision = #tpu.contract_precision<fp32>} : vector<2x16xf32>, vector<16x48xf32>, vector<2x48xf32> -> vector<2x48xf32>
    %36 = vector.extract_strided_slice %34 {offsets = [0, 0], sizes = [2, 16], strides = [1, 1]} : vector<2x48xf32> to vector<2x16xf32>
    %37 = vector.extract_strided_slice %35 {offsets = [0, 0], sizes = [2, 16], strides = [1, 1]} : vector<2x48xf32> to vector<2x16xf32>
    %38 = arith.addf %36, %37 : vector<2x16xf32>
    %39 = arith.negf %38 : vector<2x16xf32>
    %40 = math.exp %39 : vector<2x16xf32>
    %cst_34 = arith.constant 1.000000e+00 : f32
    %41 = vector.broadcast %cst_34 : f32 to vector<2x16xf32>
    %42 = arith.addf %41, %40 : vector<2x16xf32>
    %43 = arith.divf %41, %42 : vector<2x16xf32>
    %44 = vector.extract_strided_slice %34 {offsets = [0, 16], sizes = [2, 16], strides = [1, 1]} : vector<2x48xf32> to vector<2x16xf32>
    %45 = vector.extract_strided_slice %35 {offsets = [0, 16], sizes = [2, 16], strides = [1, 1]} : vector<2x48xf32> to vector<2x16xf32>
    %46 = arith.addf %44, %45 : vector<2x16xf32>
    %47 = arith.negf %46 : vector<2x16xf32>
    %48 = math.exp %47 : vector<2x16xf32>
    %cst_35 = arith.constant 1.000000e+00 : f32
    %49 = vector.broadcast %cst_35 : f32 to vector<2x16xf32>
    %50 = arith.addf %49, %48 : vector<2x16xf32>
    %51 = arith.divf %49, %50 : vector<2x16xf32>
    %52 = vector.extract_strided_slice %34 {offsets = [0, 32], sizes = [2, 16], strides = [1, 1]} : vector<2x48xf32> to vector<2x16xf32>
    %53 = vector.extract_strided_slice %35 {offsets = [0, 32], sizes = [2, 16], strides = [1, 1]} : vector<2x48xf32> to vector<2x16xf32>
    %54 = vector.broadcast %25 : vector<1x16xf32> to vector<2x16xf32>
    %55 = arith.addf %53, %54 : vector<2x16xf32>
    %56 = arith.mulf %43, %55 : vector<2x16xf32>
    %57 = arith.addf %52, %56 : vector<2x16xf32>
    %58 = math.tanh %57 : vector<2x16xf32>
    %cst_36 = arith.constant 1.000000e+00 : f32
    %59 = vector.broadcast %cst_36 : f32 to vector<2x16xf32>
    %60 = arith.subf %59, %51 : vector<2x16xf32>
    %61 = arith.mulf %60, %58 : vector<2x16xf32>
    %62 = arith.mulf %51, %29 : vector<2x16xf32>
    %63 = arith.addf %61, %62 : vector<2x16xf32>
    %64 = vector.broadcast %31 : i32 to vector<2x1xi32>
    %65 = arith.cmpi slt, %64, %26 : vector<2x1xi32>
    %66 = vector.shape_cast %65 : vector<2x1xi1> to vector<2x1xi1>
    %67 = vector.broadcast %66 : vector<2x1xi1> to vector<2x16xi1>
    %68 = arith.select %67, %63, %29 : vector<2x16xi1>, vector<2x16xf32>
    %cst_37 = arith.constant 0.000000e+00 : f32
    %69 = vector.shape_cast %65 : vector<2x1xi1> to vector<2x1xi1>
    %70 = vector.broadcast %69 : vector<2x1xi1> to vector<2x16xi1>
    %71 = vector.broadcast %cst_37 : f32 to vector<2x16xf32>
    %72 = arith.select %70, %68, %71 : vector<2x16xi1>, vector<2x16xf32>
    %c0_38 = arith.constant 0 : index
    %73 = arith.index_cast %31 : i32 to index
    %c0_39 = arith.constant 0 : index
    %c0_40 = arith.constant 0 : index
    %74 = vector.load %arg8[%c0_38, %73, %c0_39, %c0_40] : memref<1x8x2x16xf32, #tpu.memory_space<vmem>>, vector<1x1x2x16xf32>
    %75 = vector.shape_cast %74 : vector<1x1x2x16xf32> to vector<2x16xf32>
    %76 = vector.shape_cast %72 : vector<2x16xf32> to vector<1x1x2x16xf32>
    tpu.vector_store %arg8[%c0_38, %73, %c0_39, %c0_40], %76 {strides = array<i32>} : memref<1x8x2x16xf32, #tpu.memory_space<vmem>>, vector<1x1x2x16xf32>,
    %c1_i32_41 = arith.constant 1 : i32
    %c7_i32_42 = arith.constant 7 : i32
    %77 = arith.subi %c7_i32_42, %c1_i32_41 : i32
    %78 = arith.select %27, %77, %c1_i32_41 : i32
    %79 = arith.index_cast %78 : i32 to index
    %c0_43 = arith.constant 0 : index
    %c0_44 = arith.constant 0 : index
    %80 = vector.load %arg9[%79, %c0_43, %c0_44] : memref<8x2x48xf32, #tpu.memory_space<vmem>>, vector<1x2x48xf32>
    %81 = vector.shape_cast %80 : vector<1x2x48xf32> to vector<2x48xf32>
    %cst_45 = arith.constant dense<0.000000e+00> : vector<2x48xf32>
    %82 = tpu.matmul %68, %23, %cst_45 {dimension_numbers = #tpu.dot_dimension_numbers<[1], [0], [0], [1], [0, 0, 1, 1], [], []>, precision = #tpu.contract_precision<fp32>} : vector<2x16xf32>, vector<16x48xf32>, vector<2x48xf32> -> vector<2x48xf32>
    %83 = vector.extract_strided_slice %81 {offsets = [0, 0], sizes = [2, 16], strides = [1, 1]} : vector<2x48xf32> to vector<2x16xf32>
    %84 = vector.extract_strided_slice %82 {offsets = [0, 0], sizes = [2, 16], strides = [1, 1]} : vector<2x48xf32> to vector<2x16xf32>
    %85 = arith.addf %83, %84 : vector<2x16xf32>
    %86 = arith.negf %85 : vector<2x16xf32>
    %87 = math.exp %86 : vector<2x16xf32>
    %cst_46 = arith.constant 1.000000e+00 : f32
    %88 = vector.broadcast %cst_46 : f32 to vector<2x16xf32>
    %89 = arith.addf %88, %87 : vector<2x16xf32>
    %90 = arith.divf %88, %89 : vector<2x16xf32>
    %91 = vector.extract_strided_slice %81 {offsets = [0, 16], sizes = [2, 16], strides = [1, 1]} : vector<2x48xf32> to vector<2x16xf32>
    %92 = vector.extract_strided_slice %82 {offsets = [0, 16], sizes = [2, 16], strides = [1, 1]} : vector<2x48xf32> to vector<2x16xf32>
    %93 = arith.addf %91, %92 : vector<2x16xf32>
    %94 = arith.negf %93 : vector<2x16xf32>
    %95 = math.exp %94 : vector<2x16xf32>
    %cst_47 = arith.constant 1.000000e+00 : f32
    %96 = vector.broadcast %cst_47 : f32 to vector<2x16xf32>
    %97 = arith.addf %96, %95 : vector<2x16xf32>
    %98 = arith.divf %96, %97 : vector<2x16xf32>
    %99 = vector.extract_strided_slice %81 {offsets = [0, 32], sizes = [2, 16], strides = [1, 1]} : vector<2x48xf32> to vector<2x16xf32>
    %100 = vector.extract_strided_slice %82 {offsets = [0, 32], sizes = [2, 16], strides = [1, 1]} : vector<2x48xf32> to vector<2x16xf32>
    %101 = vector.broadcast %25 : vector<1x16xf32> to vector<2x16xf32>
    %102 = arith.addf %100, %101 : vector<2x16xf32>
    %103 = arith.mulf %90, %102 : vector<2x16xf32>
    %104 = arith.addf %99, %103 : vector<2x16xf32>
    %105 = math.tanh %104 : vector<2x16xf32>
    %cst_48 = arith.constant 1.000000e+00 : f32
    %106 = vector.broadcast %cst_48 : f32 to vector<2x16xf32>
    %107 = arith.subf %106, %98 : vector<2x16xf32>
    %108 = arith.mulf %107, %105 : vector<2x16xf32>
    %109 = arith.mulf %98, %68 : vector<2x16xf32>
    %110 = arith.addf %108, %109 : vector<2x16xf32>
    %111 = vector.broadcast %78 : i32 to vector<2x1xi32>
    %112 = arith.cmpi slt, %111, %26 : vector<2x1xi32>
    %113 = vector.shape_cast %112 : vector<2x1xi1> to vector<2x1xi1>
    %114 = vector.broadcast %113 : vector<2x1xi1> to vector<2x16xi1>
    %115 = arith.select %114, %110, %68 : vector<2x16xi1>, vector<2x16xf32>
    %cst_49 = arith.constant 0.000000e+00 : f32
    %116 = vector.shape_cast %112 : vector<2x1xi1> to vector<2x1xi1>
    %117 = vector.broadcast %116 : vector<2x1xi1> to vector<2x16xi1>
    %118 = vector.broadcast %cst_49 : f32 to vector<2x16xf32>
    %119 = arith.select %117, %115, %118 : vector<2x16xi1>, vector<2x16xf32>
    %c0_50 = arith.constant 0 : index
    %120 = arith.index_cast %78 : i32 to index
    %c0_51 = arith.constant 0 : index
    %c0_52 = arith.constant 0 : index
    %121 = vector.load %arg8[%c0_50, %120, %c0_51, %c0_52] : memref<1x8x2x16xf32, #tpu.memory_space<vmem>>, vector<1x1x2x16xf32>
    %122 = vector.shape_cast %121 : vector<1x1x2x16xf32> to vector<2x16xf32>
    %123 = vector.shape_cast %119 : vector<2x16xf32> to vector<1x1x2x16xf32>
    tpu.vector_store %arg8[%c0_50, %120, %c0_51, %c0_52], %123 {strides = array<i32>} : memref<1x8x2x16xf32, #tpu.memory_space<vmem>>, vector<1x1x2x16xf32>,
    %c2_i32 = arith.constant 2 : i32
    %c7_i32_53 = arith.constant 7 : i32
    %124 = arith.subi %c7_i32_53, %c2_i32 : i32
    %125 = arith.select %27, %124, %c2_i32 : i32
    %126 = arith.index_cast %125 : i32 to index
    %c0_54 = arith.constant 0 : index
    %c0_55 = arith.constant 0 : index
    %127 = vector.load %arg9[%126, %c0_54, %c0_55] : memref<8x2x48xf32, #tpu.memory_space<vmem>>, vector<1x2x48xf32>
    %128 = vector.shape_cast %127 : vector<1x2x48xf32> to vector<2x48xf32>
    %cst_56 = arith.constant dense<0.000000e+00> : vector<2x48xf32>
    %129 = tpu.matmul %115, %23, %cst_56 {dimension_numbers = #tpu.dot_dimension_numbers<[1], [0], [0], [1], [0, 0, 1, 1], [], []>, precision = #tpu.contract_precision<fp32>} : vector<2x16xf32>, vector<16x48xf32>, vector<2x48xf32> -> vector<2x48xf32>
    %130 = vector.extract_strided_slice %128 {offsets = [0, 0], sizes = [2, 16], strides = [1, 1]} : vector<2x48xf32> to vector<2x16xf32>
    %131 = vector.extract_strided_slice %129 {offsets = [0, 0], sizes = [2, 16], strides = [1, 1]} : vector<2x48xf32> to vector<2x16xf32>
    %132 = arith.addf %130, %131 : vector<2x16xf32>
    %133 = arith.negf %132 : vector<2x16xf32>
    %134 = math.exp %133 : vector<2x16xf32>
    %cst_57 = arith.constant 1.000000e+00 : f32
    %135 = vector.broadcast %cst_57 : f32 to vector<2x16xf32>
    %136 = arith.addf %135, %134 : vector<2x16xf32>
    %137 = arith.divf %135, %136 : vector<2x16xf32>
    %138 = vector.extract_strided_slice %128 {offsets = [0, 16], sizes = [2, 16], strides = [1, 1]} : vector<2x48xf32> to vector<2x16xf32>
    %139 = vector.extract_strided_slice %129 {offsets = [0, 16], sizes = [2, 16], strides = [1, 1]} : vector<2x48xf32> to vector<2x16xf32>
    %140 = arith.addf %138, %139 : vector<2x16xf32>
    %141 = arith.negf %140 : vector<2x16xf32>
    %142 = math.exp %141 : vector<2x16xf32>
    %cst_58 = arith.constant 1.000000e+00 : f32
    %143 = vector.broadcast %cst_58 : f32 to vector<2x16xf32>
    %144 = arith.addf %143, %142 : vector<2x16xf32>
    %145 = arith.divf %143, %144 : vector<2x16xf32>
    %146 = vector.extract_strided_slice %128 {offsets = [0, 32], sizes = [2, 16], strides = [1, 1]} : vector<2x48xf32> to vector<2x16xf32>
    %147 = vector.extract_strided_slice %129 {offsets = [0, 32], sizes = [2, 16], strides = [1, 1]} : vector<2x48xf32> to vector<2x16xf32>
    %148 = vector.broadcast %25 : vector<1x16xf32> to vector<2x16xf32>
    %149 = arith.addf %147, %148 : vector<2x16xf32>
    %150 = arith.mulf %137, %149 : vector<2x16xf32>
    %151 = arith.addf %146, %150 : vector<2x16xf32>
    %152 = math.tanh %151 : vector<2x16xf32>
    %cst_59 = arith.constant 1.000000e+00 : f32
    %153 = vector.broadcast %cst_59 : f32 to vector<2x16xf32>
    %154 = arith.subf %153, %145 : vector<2x16xf32>
    %155 = arith.mulf %154, %152 : vector<2x16xf32>
    %156 = arith.mulf %145, %115 : vector<2x16xf32>
    %157 = arith.addf %155, %156 : vector<2x16xf32>
    %158 = vector.broadcast %125 : i32 to vector<2x1xi32>
    %159 = arith.cmpi slt, %158, %26 : vector<2x1xi32>
    %160 = vector.shape_cast %159 : vector<2x1xi1> to vector<2x1xi1>
    %161 = vector.broadcast %160 : vector<2x1xi1> to vector<2x16xi1>
    %162 = arith.select %161, %157, %115 : vector<2x16xi1>, vector<2x16xf32>
    %cst_60 = arith.constant 0.000000e+00 : f32
    %163 = vector.shape_cast %159 : vector<2x1xi1> to vector<2x1xi1>
    %164 = vector.broadcast %163 : vector<2x1xi1> to vector<2x16xi1>
    %165 = vector.broadcast %cst_60 : f32 to vector<2x16xf32>
    %166 = arith.select %164, %162, %165 : vector<2x16xi1>, vector<2x16xf32>
    %c0_61 = arith.constant 0 : index
    %167 = arith.index_cast %125 : i32 to index
    %c0_62 = arith.constant 0 : index
    %c0_63 = arith.constant 0 : index
    %168 = vector.load %arg8[%c0_61, %167, %c0_62, %c0_63] : memref<1x8x2x16xf32, #tpu.memory_space<vmem>>, vector<1x1x2x16xf32>
    %169 = vector.shape_cast %168 : vector<1x1x2x16xf32> to vector<2x16xf32>
    %170 = vector.shape_cast %166 : vector<2x16xf32> to vector<1x1x2x16xf32>
    tpu.vector_store %arg8[%c0_61, %167, %c0_62, %c0_63], %170 {strides = array<i32>} : memref<1x8x2x16xf32, #tpu.memory_space<vmem>>, vector<1x1x2x16xf32>,
    %c3_i32 = arith.constant 3 : i32
    %c7_i32_64 = arith.constant 7 : i32
    %171 = arith.subi %c7_i32_64, %c3_i32 : i32
    %172 = arith.select %27, %171, %c3_i32 : i32
    %173 = arith.index_cast %172 : i32 to index
    %c0_65 = arith.constant 0 : index
    %c0_66 = arith.constant 0 : index
    %174 = vector.load %arg9[%173, %c0_65, %c0_66] : memref<8x2x48xf32, #tpu.memory_space<vmem>>, vector<1x2x48xf32>
    %175 = vector.shape_cast %174 : vector<1x2x48xf32> to vector<2x48xf32>
    %cst_67 = arith.constant dense<0.000000e+00> : vector<2x48xf32>
    %176 = tpu.matmul %162, %23, %cst_67 {dimension_numbers = #tpu.dot_dimension_numbers<[1], [0], [0], [1], [0, 0, 1, 1], [], []>, precision = #tpu.contract_precision<fp32>} : vector<2x16xf32>, vector<16x48xf32>, vector<2x48xf32> -> vector<2x48xf32>
    %177 = vector.extract_strided_slice %175 {offsets = [0, 0], sizes = [2, 16], strides = [1, 1]} : vector<2x48xf32> to vector<2x16xf32>
    %178 = vector.extract_strided_slice %176 {offsets = [0, 0], sizes = [2, 16], strides = [1, 1]} : vector<2x48xf32> to vector<2x16xf32>
    %179 = arith.addf %177, %178 : vector<2x16xf32>
    %180 = arith.negf %179 : vector<2x16xf32>
    %181 = math.exp %180 : vector<2x16xf32>
    %cst_68 = arith.constant 1.000000e+00 : f32
    %182 = vector.broadcast %cst_68 : f32 to vector<2x16xf32>
    %183 = arith.addf %182, %181 : vector<2x16xf32>
    %184 = arith.divf %182, %183 : vector<2x16xf32>
    %185 = vector.extract_strided_slice %175 {offsets = [0, 16], sizes = [2, 16], strides = [1, 1]} : vector<2x48xf32> to vector<2x16xf32>
    %186 = vector.extract_strided_slice %176 {offsets = [0, 16], sizes = [2, 16], strides = [1, 1]} : vector<2x48xf32> to vector<2x16xf32>
    %187 = arith.addf %185, %186 : vector<2x16xf32>
    %188 = arith.negf %187 : vector<2x16xf32>
    %189 = math.exp %188 : vector<2x16xf32>
    %cst_69 = arith.constant 1.000000e+00 : f32
    %190 = vector.broadcast %cst_69 : f32 to vector<2x16xf32>
    %191 = arith.addf %190, %189 : vector<2x16xf32>
    %192 = arith.divf %190, %191 : vector<2x16xf32>
    %193 = vector.extract_strided_slice %175 {offsets = [0, 32], sizes = [2, 16], strides = [1, 1]} : vector<2x48xf32> to vector<2x16xf32>
    %194 = vector.extract_strided_slice %176 {offsets = [0, 32], sizes = [2, 16], strides = [1, 1]} : vector<2x48xf32> to vector<2x16xf32>
    %195 = vector.broadcast %25 : vector<1x16xf32> to vector<2x16xf32>
    %196 = arith.addf %194, %195 : vector<2x16xf32>
    %197 = arith.mulf %184, %196 : vector<2x16xf32>
    %198 = arith.addf %193, %197 : vector<2x16xf32>
    %199 = math.tanh %198 : vector<2x16xf32>
    %cst_70 = arith.constant 1.000000e+00 : f32
    %200 = vector.broadcast %cst_70 : f32 to vector<2x16xf32>
    %201 = arith.subf %200, %192 : vector<2x16xf32>
    %202 = arith.mulf %201, %199 : vector<2x16xf32>
    %203 = arith.mulf %192, %162 : vector<2x16xf32>
    %204 = arith.addf %202, %203 : vector<2x16xf32>
    %205 = vector.broadcast %172 : i32 to vector<2x1xi32>
    %206 = arith.cmpi slt, %205, %26 : vector<2x1xi32>
    %207 = vector.shape_cast %206 : vector<2x1xi1> to vector<2x1xi1>
    %208 = vector.broadcast %207 : vector<2x1xi1> to vector<2x16xi1>
    %209 = arith.select %208, %204, %162 : vector<2x16xi1>, vector<2x16xf32>
    %cst_71 = arith.constant 0.000000e+00 : f32
    %210 = vector.shape_cast %206 : vector<2x1xi1> to vector<2x1xi1>
    %211 = vector.broadcast %210 : vector<2x1xi1> to vector<2x16xi1>
    %212 = vector.broadcast %cst_71 : f32 to vector<2x16xf32>
    %213 = arith.select %211, %209, %212 : vector<2x16xi1>, vector<2x16xf32>
    %c0_72 = arith.constant 0 : index
    %214 = arith.index_cast %172 : i32 to index
    %c0_73 = arith.constant 0 : index
    %c0_74 = arith.constant 0 : index
    %215 = vector.load %arg8[%c0_72, %214, %c0_73, %c0_74] : memref<1x8x2x16xf32, #tpu.memory_space<vmem>>, vector<1x1x2x16xf32>
    %216 = vector.shape_cast %215 : vector<1x1x2x16xf32> to vector<2x16xf32>
    %217 = vector.shape_cast %213 : vector<2x16xf32> to vector<1x1x2x16xf32>
    tpu.vector_store %arg8[%c0_72, %214, %c0_73, %c0_74], %217 {strides = array<i32>} : memref<1x8x2x16xf32, #tpu.memory_space<vmem>>, vector<1x1x2x16xf32>,
    %c4_i32 = arith.constant 4 : i32
    %c7_i32_75 = arith.constant 7 : i32
    %218 = arith.subi %c7_i32_75, %c4_i32 : i32
    %219 = arith.select %27, %218, %c4_i32 : i32
    %220 = arith.index_cast %219 : i32 to index
    %c0_76 = arith.constant 0 : index
    %c0_77 = arith.constant 0 : index
    %221 = vector.load %arg9[%220, %c0_76, %c0_77] : memref<8x2x48xf32, #tpu.memory_space<vmem>>, vector<1x2x48xf32>
    %222 = vector.shape_cast %221 : vector<1x2x48xf32> to vector<2x48xf32>
    %cst_78 = arith.constant dense<0.000000e+00> : vector<2x48xf32>
    %223 = tpu.matmul %209, %23, %cst_78 {dimension_numbers = #tpu.dot_dimension_numbers<[1], [0], [0], [1], [0, 0, 1, 1], [], []>, precision = #tpu.contract_precision<fp32>} : vector<2x16xf32>, vector<16x48xf32>, vector<2x48xf32> -> vector<2x48xf32>
    %224 = vector.extract_strided_slice %222 {offsets = [0, 0], sizes = [2, 16], strides = [1, 1]} : vector<2x48xf32> to vector<2x16xf32>
    %225 = vector.extract_strided_slice %223 {offsets = [0, 0], sizes = [2, 16], strides = [1, 1]} : vector<2x48xf32> to vector<2x16xf32>
    %226 = arith.addf %224, %225 : vector<2x16xf32>
    %227 = arith.negf %226 : vector<2x16xf32>
    %228 = math.exp %227 : vector<2x16xf32>
    %cst_79 = arith.constant 1.000000e+00 : f32
    %229 = vector.broadcast %cst_79 : f32 to vector<2x16xf32>
    %230 = arith.addf %229, %228 : vector<2x16xf32>
    %231 = arith.divf %229, %230 : vector<2x16xf32>
    %232 = vector.extract_strided_slice %222 {offsets = [0, 16], sizes = [2, 16], strides = [1, 1]} : vector<2x48xf32> to vector<2x16xf32>
    %233 = vector.extract_strided_slice %223 {offsets = [0, 16], sizes = [2, 16], strides = [1, 1]} : vector<2x48xf32> to vector<2x16xf32>
    %234 = arith.addf %232, %233 : vector<2x16xf32>
    %235 = arith.negf %234 : vector<2x16xf32>
    %236 = math.exp %235 : vector<2x16xf32>
    %cst_80 = arith.constant 1.000000e+00 : f32
    %237 = vector.broadcast %cst_80 : f32 to vector<2x16xf32>
    %238 = arith.addf %237, %236 : vector<2x16xf32>
    %239 = arith.divf %237, %238 : vector<2x16xf32>
    %240 = vector.extract_strided_slice %222 {offsets = [0, 32], sizes = [2, 16], strides = [1, 1]} : vector<2x48xf32> to vector<2x16xf32>
    %241 = vector.extract_strided_slice %223 {offsets = [0, 32], sizes = [2, 16], strides = [1, 1]} : vector<2x48xf32> to vector<2x16xf32>
    %242 = vector.broadcast %25 : vector<1x16xf32> to vector<2x16xf32>
    %243 = arith.addf %241, %242 : vector<2x16xf32>
    %244 = arith.mulf %231, %243 : vector<2x16xf32>
    %245 = arith.addf %240, %244 : vector<2x16xf32>
    %246 = math.tanh %245 : vector<2x16xf32>
    %cst_81 = arith.constant 1.000000e+00 : f32
    %247 = vector.broadcast %cst_81 : f32 to vector<2x16xf32>
    %248 = arith.subf %247, %239 : vector<2x16xf32>
    %249 = arith.mulf %248, %246 : vector<2x16xf32>
    %250 = arith.mulf %239, %209 : vector<2x16xf32>
    %251 = arith.addf %249, %250 : vector<2x16xf32>
    %252 = vector.broadcast %219 : i32 to vector<2x1xi32>
    %253 = arith.cmpi slt, %252, %26 : vector<2x1xi32>
    %254 = vector.shape_cast %253 : vector<2x1xi1> to vector<2x1xi1>
    %255 = vector.broadcast %254 : vector<2x1xi1> to vector<2x16xi1>
    %256 = arith.select %255, %251, %209 : vector<2x16xi1>, vector<2x16xf32>
    %cst_82 = arith.constant 0.000000e+00 : f32
    %257 = vector.shape_cast %253 : vector<2x1xi1> to vector<2x1xi1>
    %258 = vector.broadcast %257 : vector<2x1xi1> to vector<2x16xi1>
    %259 = vector.broadcast %cst_82 : f32 to vector<2x16xf32>
    %260 = arith.select %258, %256, %259 : vector<2x16xi1>, vector<2x16xf32>
    %c0_83 = arith.constant 0 : index
    %261 = arith.index_cast %219 : i32 to index
    %c0_84 = arith.constant 0 : index
    %c0_85 = arith.constant 0 : index
    %262 = vector.load %arg8[%c0_83, %261, %c0_84, %c0_85] : memref<1x8x2x16xf32, #tpu.memory_space<vmem>>, vector<1x1x2x16xf32>
    %263 = vector.shape_cast %262 : vector<1x1x2x16xf32> to vector<2x16xf32>
    %264 = vector.shape_cast %260 : vector<2x16xf32> to vector<1x1x2x16xf32>
    tpu.vector_store %arg8[%c0_83, %261, %c0_84, %c0_85], %264 {strides = array<i32>} : memref<1x8x2x16xf32, #tpu.memory_space<vmem>>, vector<1x1x2x16xf32>,
    %c5_i32 = arith.constant 5 : i32
    %c7_i32_86 = arith.constant 7 : i32
    %265 = arith.subi %c7_i32_86, %c5_i32 : i32
    %266 = arith.select %27, %265, %c5_i32 : i32
    %267 = arith.index_cast %266 : i32 to index
    %c0_87 = arith.constant 0 : index
    %c0_88 = arith.constant 0 : index
    %268 = vector.load %arg9[%267, %c0_87, %c0_88] : memref<8x2x48xf32, #tpu.memory_space<vmem>>, vector<1x2x48xf32>
    %269 = vector.shape_cast %268 : vector<1x2x48xf32> to vector<2x48xf32>
    %cst_89 = arith.constant dense<0.000000e+00> : vector<2x48xf32>
    %270 = tpu.matmul %256, %23, %cst_89 {dimension_numbers = #tpu.dot_dimension_numbers<[1], [0], [0], [1], [0, 0, 1, 1], [], []>, precision = #tpu.contract_precision<fp32>} : vector<2x16xf32>, vector<16x48xf32>, vector<2x48xf32> -> vector<2x48xf32>
    %271 = vector.extract_strided_slice %269 {offsets = [0, 0], sizes = [2, 16], strides = [1, 1]} : vector<2x48xf32> to vector<2x16xf32>
    %272 = vector.extract_strided_slice %270 {offsets = [0, 0], sizes = [2, 16], strides = [1, 1]} : vector<2x48xf32> to vector<2x16xf32>
    %273 = arith.addf %271, %272 : vector<2x16xf32>
    %274 = arith.negf %273 : vector<2x16xf32>
    %275 = math.exp %274 : vector<2x16xf32>
    %cst_90 = arith.constant 1.000000e+00 : f32
    %276 = vector.broadcast %cst_90 : f32 to vector<2x16xf32>
    %277 = arith.addf %276, %275 : vector<2x16xf32>
    %278 = arith.divf %276, %277 : vector<2x16xf32>
    %279 = vector.extract_strided_slice %269 {offsets = [0, 16], sizes = [2, 16], strides = [1, 1]} : vector<2x48xf32> to vector<2x16xf32>
    %280 = vector.extract_strided_slice %270 {offsets = [0, 16], sizes = [2, 16], strides = [1, 1]} : vector<2x48xf32> to vector<2x16xf32>
    %281 = arith.addf %279, %280 : vector<2x16xf32>
    %282 = arith.negf %281 : vector<2x16xf32>
    %283 = math.exp %282 : vector<2x16xf32>
    %cst_91 = arith.constant 1.000000e+00 : f32
    %284 = vector.broadcast %cst_91 : f32 to vector<2x16xf32>
    %285 = arith.addf %284, %283 : vector<2x16xf32>
    %286 = arith.divf %284, %285 : vector<2x16xf32>
    %287 = vector.extract_strided_slice %269 {offsets = [0, 32], sizes = [2, 16], strides = [1, 1]} : vector<2x48xf32> to vector<2x16xf32>
    %288 = vector.extract_strided_slice %270 {offsets = [0, 32], sizes = [2, 16], strides = [1, 1]} : vector<2x48xf32> to vector<2x16xf32>
    %289 = vector.broadcast %25 : vector<1x16xf32> to vector<2x16xf32>
    %290 = arith.addf %288, %289 : vector<2x16xf32>
    %291 = arith.mulf %278, %290 : vector<2x16xf32>
    %292 = arith.addf %287, %291 : vector<2x16xf32>
    %293 = math.tanh %292 : vector<2x16xf32>
    %cst_92 = arith.constant 1.000000e+00 : f32
    %294 = vector.broadcast %cst_92 : f32 to vector<2x16xf32>
    %295 = arith.subf %294, %286 : vector<2x16xf32>
    %296 = arith.mulf %295, %293 : vector<2x16xf32>
    %297 = arith.mulf %286, %256 : vector<2x16xf32>
    %298 = arith.addf %296, %297 : vector<2x16xf32>
    %299 = vector.broadcast %266 : i32 to vector<2x1xi32>
    %300 = arith.cmpi slt, %299, %26 : vector<2x1xi32>
    %301 = vector.shape_cast %300 : vector<2x1xi1> to vector<2x1xi1>
    %302 = vector.broadcast %301 : vector<2x1xi1> to vector<2x16xi1>
    %303 = arith.select %302, %298, %256 : vector<2x16xi1>, vector<2x16xf32>
    %cst_93 = arith.constant 0.000000e+00 : f32
    %304 = vector.shape_cast %300 : vector<2x1xi1> to vector<2x1xi1>
    %305 = vector.broadcast %304 : vector<2x1xi1> to vector<2x16xi1>
    %306 = vector.broadcast %cst_93 : f32 to vector<2x16xf32>
    %307 = arith.select %305, %303, %306 : vector<2x16xi1>, vector<2x16xf32>
    %c0_94 = arith.constant 0 : index
    %308 = arith.index_cast %266 : i32 to index
    %c0_95 = arith.constant 0 : index
    %c0_96 = arith.constant 0 : index
    %309 = vector.load %arg8[%c0_94, %308, %c0_95, %c0_96] : memref<1x8x2x16xf32, #tpu.memory_space<vmem>>, vector<1x1x2x16xf32>
    %310 = vector.shape_cast %309 : vector<1x1x2x16xf32> to vector<2x16xf32>
    %311 = vector.shape_cast %307 : vector<2x16xf32> to vector<1x1x2x16xf32>
    tpu.vector_store %arg8[%c0_94, %308, %c0_95, %c0_96], %311 {strides = array<i32>} : memref<1x8x2x16xf32, #tpu.memory_space<vmem>>, vector<1x1x2x16xf32>,
    %c6_i32 = arith.constant 6 : i32
    %c7_i32_97 = arith.constant 7 : i32
    %312 = arith.subi %c7_i32_97, %c6_i32 : i32
    %313 = arith.select %27, %312, %c6_i32 : i32
    %314 = arith.index_cast %313 : i32 to index
    %c0_98 = arith.constant 0 : index
    %c0_99 = arith.constant 0 : index
    %315 = vector.load %arg9[%314, %c0_98, %c0_99] : memref<8x2x48xf32, #tpu.memory_space<vmem>>, vector<1x2x48xf32>
    %316 = vector.shape_cast %315 : vector<1x2x48xf32> to vector<2x48xf32>
    %cst_100 = arith.constant dense<0.000000e+00> : vector<2x48xf32>
    %317 = tpu.matmul %303, %23, %cst_100 {dimension_numbers = #tpu.dot_dimension_numbers<[1], [0], [0], [1], [0, 0, 1, 1], [], []>, precision = #tpu.contract_precision<fp32>} : vector<2x16xf32>, vector<16x48xf32>, vector<2x48xf32> -> vector<2x48xf32>
    %318 = vector.extract_strided_slice %316 {offsets = [0, 0], sizes = [2, 16], strides = [1, 1]} : vector<2x48xf32> to vector<2x16xf32>
    %319 = vector.extract_strided_slice %317 {offsets = [0, 0], sizes = [2, 16], strides = [1, 1]} : vector<2x48xf32> to vector<2x16xf32>
    %320 = arith.addf %318, %319 : vector<2x16xf32>
    %321 = arith.negf %320 : vector<2x16xf32>
    %322 = math.exp %321 : vector<2x16xf32>
    %cst_101 = arith.constant 1.000000e+00 : f32
    %323 = vector.broadcast %cst_101 : f32 to vector<2x16xf32>
    %324 = arith.addf %323, %322 : vector<2x16xf32>
    %325 = arith.divf %323, %324 : vector<2x16xf32>
    %326 = vector.extract_strided_slice %316 {offsets = [0, 16], sizes = [2, 16], strides = [1, 1]} : vector<2x48xf32> to vector<2x16xf32>
    %327 = vector.extract_strided_slice %317 {offsets = [0, 16], sizes = [2, 16], strides = [1, 1]} : vector<2x48xf32> to vector<2x16xf32>
    %328 = arith.addf %326, %327 : vector<2x16xf32>
    %329 = arith.negf %328 : vector<2x16xf32>
    %330 = math.exp %329 : vector<2x16xf32>
    %cst_102 = arith.constant 1.000000e+00 : f32
    %331 = vector.broadcast %cst_102 : f32 to vector<2x16xf32>
    %332 = arith.addf %331, %330 : vector<2x16xf32>
    %333 = arith.divf %331, %332 : vector<2x16xf32>
    %334 = vector.extract_strided_slice %316 {offsets = [0, 32], sizes = [2, 16], strides = [1, 1]} : vector<2x48xf32> to vector<2x16xf32>
    %335 = vector.extract_strided_slice %317 {offsets = [0, 32], sizes = [2, 16], strides = [1, 1]} : vector<2x48xf32> to vector<2x16xf32>
    %336 = vector.broadcast %25 : vector<1x16xf32> to vector<2x16xf32>
    %337 = arith.addf %335, %336 : vector<2x16xf32>
    %338 = arith.mulf %325, %337 : vector<2x16xf32>
    %339 = arith.addf %334, %338 : vector<2x16xf32>
    %340 = math.tanh %339 : vector<2x16xf32>
    %cst_103 = arith.constant 1.000000e+00 : f32
    %341 = vector.broadcast %cst_103 : f32 to vector<2x16xf32>
    %342 = arith.subf %341, %333 : vector<2x16xf32>
    %343 = arith.mulf %342, %340 : vector<2x16xf32>
    %344 = arith.mulf %333, %303 : vector<2x16xf32>
    %345 = arith.addf %343, %344 : vector<2x16xf32>
    %346 = vector.broadcast %313 : i32 to vector<2x1xi32>
    %347 = arith.cmpi slt, %346, %26 : vector<2x1xi32>
    %348 = vector.shape_cast %347 : vector<2x1xi1> to vector<2x1xi1>
    %349 = vector.broadcast %348 : vector<2x1xi1> to vector<2x16xi1>
    %350 = arith.select %349, %345, %303 : vector<2x16xi1>, vector<2x16xf32>
    %cst_104 = arith.constant 0.000000e+00 : f32
    %351 = vector.shape_cast %347 : vector<2x1xi1> to vector<2x1xi1>
    %352 = vector.broadcast %351 : vector<2x1xi1> to vector<2x16xi1>
    %353 = vector.broadcast %cst_104 : f32 to vector<2x16xf32>
    %354 = arith.select %352, %350, %353 : vector<2x16xi1>, vector<2x16xf32>
    %c0_105 = arith.constant 0 : index
    %355 = arith.index_cast %313 : i32 to index
    %c0_106 = arith.constant 0 : index
    %c0_107 = arith.constant 0 : index
    %356 = vector.load %arg8[%c0_105, %355, %c0_106, %c0_107] : memref<1x8x2x16xf32, #tpu.memory_space<vmem>>, vector<1x1x2x16xf32>
    %357 = vector.shape_cast %356 : vector<1x1x2x16xf32> to vector<2x16xf32>
    %358 = vector.shape_cast %354 : vector<2x16xf32> to vector<1x1x2x16xf32>
    tpu.vector_store %arg8[%c0_105, %355, %c0_106, %c0_107], %358 {strides = array<i32>} : memref<1x8x2x16xf32, #tpu.memory_space<vmem>>, vector<1x1x2x16xf32>,
    %c7_i32_108 = arith.constant 7 : i32
    %c7_i32_109 = arith.constant 7 : i32
    %359 = arith.subi %c7_i32_109, %c7_i32_108 : i32
    %360 = arith.select %27, %359, %c7_i32_108 : i32
    %361 = arith.index_cast %360 : i32 to index
    %c0_110 = arith.constant 0 : index
    %c0_111 = arith.constant 0 : index
    %362 = vector.load %arg9[%361, %c0_110, %c0_111] : memref<8x2x48xf32, #tpu.memory_space<vmem>>, vector<1x2x48xf32>
    %363 = vector.shape_cast %362 : vector<1x2x48xf32> to vector<2x48xf32>
    %cst_112 = arith.constant dense<0.000000e+00> : vector<2x48xf32>
    %364 = tpu.matmul %350, %23, %cst_112 {dimension_numbers = #tpu.dot_dimension_numbers<[1], [0], [0], [1], [0, 0, 1, 1], [], []>, precision = #tpu.contract_precision<fp32>} : vector<2x16xf32>, vector<16x48xf32>, vector<2x48xf32> -> vector<2x48xf32>
    %365 = vector.extract_strided_slice %363 {offsets = [0, 0], sizes = [2, 16], strides = [1, 1]} : vector<2x48xf32> to vector<2x16xf32>
    %366 = vector.extract_strided_slice %364 {offsets = [0, 0], sizes = [2, 16], strides = [1, 1]} : vector<2x48xf32> to vector<2x16xf32>
    %367 = arith.addf %365, %366 : vector<2x16xf32>
    %368 = arith.negf %367 : vector<2x16xf32>
    %369 = math.exp %368 : vector<2x16xf32>
    %cst_113 = arith.constant 1.000000e+00 : f32
    %370 = vector.broadcast %cst_113 : f32 to vector<2x16xf32>
    %371 = arith.addf %370, %369 : vector<2x16xf32>
    %372 = arith.divf %370, %371 : vector<2x16xf32>
    %373 = vector.extract_strided_slice %363 {offsets = [0, 16], sizes = [2, 16], strides = [1, 1]} : vector<2x48xf32> to vector<2x16xf32>
    %374 = vector.extract_strided_slice %364 {offsets = [0, 16], sizes = [2, 16], strides = [1, 1]} : vector<2x48xf32> to vector<2x16xf32>
    %375 = arith.addf %373, %374 : vector<2x16xf32>
    %376 = arith.negf %375 : vector<2x16xf32>
    %377 = math.exp %376 : vector<2x16xf32>
    %cst_114 = arith.constant 1.000000e+00 : f32
    %378 = vector.broadcast %cst_114 : f32 to vector<2x16xf32>
    %379 = arith.addf %378, %377 : vector<2x16xf32>
    %380 = arith.divf %378, %379 : vector<2x16xf32>
    %381 = vector.extract_strided_slice %363 {offsets = [0, 32], sizes = [2, 16], strides = [1, 1]} : vector<2x48xf32> to vector<2x16xf32>
    %382 = vector.extract_strided_slice %364 {offsets = [0, 32], sizes = [2, 16], strides = [1, 1]} : vector<2x48xf32> to vector<2x16xf32>
    %383 = vector.broadcast %25 : vector<1x16xf32> to vector<2x16xf32>
    %384 = arith.addf %382, %383 : vector<2x16xf32>
    %385 = arith.mulf %372, %384 : vector<2x16xf32>
    %386 = arith.addf %381, %385 : vector<2x16xf32>
    %387 = math.tanh %386 : vector<2x16xf32>
    %cst_115 = arith.constant 1.000000e+00 : f32
    %388 = vector.broadcast %cst_115 : f32 to vector<2x16xf32>
    %389 = arith.subf %388, %380 : vector<2x16xf32>
    %390 = arith.mulf %389, %387 : vector<2x16xf32>
    %391 = arith.mulf %380, %350 : vector<2x16xf32>
    %392 = arith.addf %390, %391 : vector<2x16xf32>
    %393 = vector.broadcast %360 : i32 to vector<2x1xi32>
    %394 = arith.cmpi slt, %393, %26 : vector<2x1xi32>
    %395 = vector.shape_cast %394 : vector<2x1xi1> to vector<2x1xi1>
    %396 = vector.broadcast %395 : vector<2x1xi1> to vector<2x16xi1>
    %397 = arith.select %396, %392, %350 : vector<2x16xi1>, vector<2x16xf32>
    %cst_116 = arith.constant 0.000000e+00 : f32
    %398 = vector.shape_cast %394 : vector<2x1xi1> to vector<2x1xi1>
    %399 = vector.broadcast %398 : vector<2x1xi1> to vector<2x16xi1>
    %400 = vector.broadcast %cst_116 : f32 to vector<2x16xf32>
    %401 = arith.select %399, %397, %400 : vector<2x16xi1>, vector<2x16xf32>
    %c0_117 = arith.constant 0 : index
    %402 = arith.index_cast %360 : i32 to index
    %c0_118 = arith.constant 0 : index
    %c0_119 = arith.constant 0 : index
    %403 = vector.load %arg8[%c0_117, %402, %c0_118, %c0_119] : memref<1x8x2x16xf32, #tpu.memory_space<vmem>>, vector<1x1x2x16xf32>
    %404 = vector.shape_cast %403 : vector<1x1x2x16xf32> to vector<2x16xf32>
    %405 = vector.shape_cast %401 : vector<2x16xf32> to vector<1x1x2x16xf32>
    tpu.vector_store %arg8[%c0_117, %402, %c0_118, %c0_119], %405 {strides = array<i32>} : memref<1x8x2x16xf32, #tpu.memory_space<vmem>>, vector<1x1x2x16xf32>,
    %c8_i32 = arith.constant 8 : i32
    return
  }
  func.func @transform_0(%arg0: i32) -> (i32, i32, i32) {
    %c0_i32 = arith.constant 0 : i32
    %c0_i32_0 = arith.constant 0 : i32
    %c0_i32_1 = arith.constant 0 : i32
    %c0_i32_2 = arith.constant 0 : i32
    return %c0_i32, %c0_i32_0, %c0_i32_1 : i32, i32, i32
  }
  func.func @transform_1(%arg0: i32) -> (i32, i32, i32) {
    %c0_i32 = arith.constant 0 : i32
    %c0_i32_0 = arith.constant 0 : i32
    %c0_i32_1 = arith.constant 0 : i32
    return %arg0, %c0_i32, %c0_i32_0 : i32, i32, i32
  }
  func.func @transform_2(%arg0: i32) -> (i32, i32, i32) {
    %c0_i32 = arith.constant 0 : i32
    %c0_i32_0 = arith.constant 0 : i32
    %c0_i32_1 = arith.constant 0 : i32
    return %arg0, %c0_i32, %c0_i32_0 : i32, i32, i32
  }
  func.func @transform_3(%arg0: i32) -> (i32, i32, i32) {
    %c0_i32 = arith.constant 0 : i32
    %c0_i32_0 = arith.constant 0 : i32
    %c0_i32_1 = arith.constant 0 : i32
    return %arg0, %c0_i32, %c0_i32_0 : i32, i32, i32
  }
  func.func @transform_4(%arg0: i32) -> (i32, i32, i32) {
    %c0_i32 = arith.constant 0 : i32
    %c0_i32_0 = arith.constant 0 : i32
    %c0_i32_1 = arith.constant 0 : i32
    return %arg0, %c0_i32, %c0_i32_0 : i32, i32, i32
  }
  func.func @transform_5(%arg0: i32) -> (i32, i32, i32) {
    %c0_i32 = arith.constant 0 : i32
    %c0_i32_0 = arith.constant 0 : i32
    %c0_i32_1 = arith.constant 0 : i32
    return %arg0, %c0_i32, %c0_i32_0 : i32, i32, i32
  }
  func.func @transform_6(%arg0: i32) -> (i32, i32) {
    %c0_i32 = arith.constant 0 : i32
    %c0_i32_0 = arith.constant 0 : i32
    %c0_i32_1 = arith.constant 0 : i32
    return %c0_i32, %c0_i32_0 : i32, i32
  }
  func.func @transform_7(%arg0: i32) -> (i32, i32, i32, i32) {
    %c0_i32 = arith.constant 0 : i32
    %c0_i32_0 = arith.constant 0 : i32
    %c0_i32_1 = arith.constant 0 : i32
    %c0_i32_2 = arith.constant 0 : i32
    return %arg0, %c0_i32, %c0_i32_0, %c0_i32_1 : i32, i32, i32, i32
  }
}

</mosaic_0001>

<bundles_post_ra>
// kernel: pos_tagger_forward.7
= control target key start
LH: loop header
LB: loop body
LE: loop exit
PB: predicated region body
PF: predicated region fallthrough
CT: control target
= control target key end

     0   :  { %v2430_v2 = vmov 0.0|0.0   ;;  %vm2431_vm0 = vmmov 0   ;;  %v2432_v6 = vmov 0.0   ;;  %vm46_vm1 = vcmask 1041409   ;;  %s2810_s0 = inlined_call_operand.vmem [shape: f32[2,8,2,16], index: 0, kind: input, shape index: {}]   ;;  %s2811_s1 = inlined_call_operand.vmem [shape: f32[32,10], index: 1, kind: input, shape index: {}]   ;;  %s2812_s2 = inlined_call_operand.vmem [shape: f32[1,10], index: 2, kind: input, shape index: {}]   ;;  %s2813_s3 = inlined_call_operand.hbm [shape: f32[2,8,10], index: 3, kind: output, shape index: {}]  }
   0x1   :  { %v17_v0 = vld [vmem:[%s2811_s1 + $0x10] sm:$0xff]  ;;  %v18_v1 = vld [vmem:[%s2811_s1 + $0x18] sm:$0xff]  ;;  %2320 = vmatprep.subr.bf16.mxu0 %v2430_v2  ;;  %2323 = vmatprep.subr.bf16.mxu1 %v2430_v2  ;;  %vm49_vm2 = vcmask 1042434   ;;  %vm52_vm3 = vcmask 1043459   ;;  %vm55_vm4 = vcmask 1044484   ;;  %vm58_vm5 = vcmask 1045509  }
   0x2   :  { %v70_v3 = vand.u32 4294901760, %v17_v0  ;;  %v73_v4 = vand.u32 4294901760, %v18_v1  ;;  %v2064_v5 = vld [vmem:[%s2810_s0 + $0x12] sm:$0x1]  ;;  %2156 = vmatprep.mubr.msk.f32.mxu0 %vm2431_vm0, %v2432_v6  ;;  %2163 = vmatprep.mubr.msk.f32.mxu1 %vm2431_vm0, %v2432_v6  ;;  %v2065_v7 = vld [vmem:[%s2810_s0 + $0x14] sm:$0x1] }
   0x3   :  { %v2066_v8 = vld [vmem:[%s2810_s0 + $0x16] sm:$0x1]  ;;  %v2067_v9 = vld [vmem:[%s2810_s0 + $0x18] sm:$0x1]  ;;  %v2063_v13 = vld [vmem:[%s2810_s0 + $0x10] sm:$0x1] }
   0x4   :  { %v2480_v10 = vpack.c.bf16 %v73_v4, %v70_v3  ;;  %v2482_v11 = vsub.f32 %v17_v0, %v70_v3  ;;  %v2484_v12 = vsub.f32 %v18_v1, %v73_v4  ;;  %v2068_v14 = vld [vmem:[%s2810_s0 + $0x1a] sm:$0x1]  ;;  %v2069_v15 = vld [vmem:[%s2810_s0 + $0x1c] sm:$0x1]  ;;  %v45_v16 = vrot.slane %v2064_v5, 7  ;;  %v2513_v29 = vld [vmem:[%s2811_s1] sm:$0xff] }
   0x5   :  { %v48_v17 = vrot.slane %v2065_v7, 6  ;;  %v51_v18 = vrot.slane %v2066_v8, 5  ;;  %v2070_v21 = vld [vmem:[%s2810_s0 + $0x1e] sm:$0x1]  ;;  %v54_v22 = vrot.slane %v2067_v9, 4  ;;  %v57_v24 = vrot.slane %v2068_v14, 3 }
   0x6   :  { %2322 = vmatpush3.bf16.msra.mxu0 %v2480_v10  ;;  %v149_v19 = vand.u32 4294901760, %v2482_v11  ;;  %v156_v20 = vand.u32 4294901760, %v2484_v12  ;;  %v47_v23 = vsel %vm46_vm1, %v45_v16, %v2063_v13  ;;  %v60_v28 = vrot.slane %v2069_v15, 2  ;;  %v2518_v30 = vld [vmem:[%s2811_s1 + $0x8] sm:$0xff]  ;;  %v21_v33 = vld [vmem:[%s2810_s0 + $0x2] sm:$0x1] }
   0x7   :  { %2326 = vmatprep.subr.bf16.mxu0 %v2430_v2  ;;  %v50_v27 = vsel %vm49_vm2, %v48_v17, %v47_v23  ;;  %vm61_vm6 = vcmask 1046534   ;;  %v63_v32 = vrot.slane %v2070_v21, 1  ;;  %v22_v34 = vld [vmem:[%s2810_s0 + $0x4] sm:$0x1]  ;;  %vm64_vm7 = vcmask 1047559  }
   0x8   :  { %v150_v25 = vsub.f32 %v2482_v11, %v149_v19  ;;  %v157_v26 = vsub.f32 %v2484_v12, %v156_v20  ;;  %v53_v31 = vsel %vm52_vm3, %v51_v18, %v50_v27  ;;  %v23_v38 = vld [vmem:[%s2810_s0 + $0x6] sm:$0x1]  ;;  %vm66_vm8 = vcmask 130048   ;;  %v20_v41 = vld [vmem:[%s2810_s0] sm:$0x1] }
   0x9   :  { %v56_v37 = vsel %vm55_vm4, %v54_v22, %v53_v31  ;;  %v553_v40 = vand.u32 4294901760, %v2513_v29  ;;  %v556_v44 = vand.u32 4294901760, %v2518_v30  ;;  %v24_v45 = vld [vmem:[%s2810_s0 + $0x8] sm:$0x1]  ;;  %v536_v46 = vrot.slane %v21_v33, 7 }
   0xa   :  { %v151_v35 = vand.u32 4294901760, %v150_v25  ;;  %v158_v36 = vand.u32 4294901760, %v157_v26  ;;  %v59_v39 = vsel %vm58_vm5, %v57_v24, %v56_v37  ;;  %v25_v49 = vld [vmem:[%s2810_s0 + $0xa] sm:$0x1]  ;;  %v26_v50 = vld [vmem:[%s2810_s0 + $0xc] sm:$0x1]  ;;  %v2609_v22 = vpack.c.bf16 %v2484_v12, %v2482_v11 }
   0xb   :  { %v62_v43 = vsel %vm61_vm6, %v60_v28, %v59_v39  ;;  %v2547_v48 = vsub.f32 %v2513_v29, %v553_v40  ;;  %v538_v51 = vrot.slane %v22_v34, 6  ;;  %v540_v52 = vrot.slane %v23_v38, 5  ;;  %v27_v55 = vld [vmem:[%s2810_s0 + $0xe] sm:$0x1]  ;;  %v2073_v61 = vld [vmem:[%s2810_s0 + $0x13] sm:$0x1] }
   0xc   :  { %v2536_v42 = vpack.c.bf16 %v158_v36, %v151_v35  ;;  %v65_v47 = vsel %vm64_vm7, %v63_v32, %v62_v43  ;;  %v2560_v54 = vsub.f32 %v2518_v30, %v556_v44  ;;  %v537_v56 = vsel %vm46_vm1, %v536_v46, %v20_v41  ;;  %v2072_v3 = vld [vmem:[%s2810_s0 + $0x11] sm:$0x1]  ;;  %v2074_v9 = vld [vmem:[%s2810_s0 + $0x15] sm:$0x1]  ;;  %v2075_v13 = vld [vmem:[%s2810_s0 + $0x17] sm:$0x1] }
   0xd   :  { %v67_v53 = vsel %vm66_vm8, %v65_v47, 0  ;;  %v632_v58 = vand.u32 4294901760, %v2547_v48  ;;  %v539_v59 = vsel %vm49_vm2, %v538_v51, %v537_v56  ;;  %v542_v60 = vrot.slane %v24_v45, 4  ;;  %v2076_v16 = vld [vmem:[%s2810_s0 + $0x19] sm:$0x1] }
   0xe   :  { %2325 = vmatpush3.bf16.msra.mxu1 %v2536_v42  ;;  %v2566_v57 = vand.u32 4294901760, %v67_v53  ;;  %v639_v62 = vand.u32 4294901760, %v2560_v54  ;;  %v541_v63 = vsel %vm52_vm3, %v540_v52, %v539_v59  ;;  %v544_v0 = vrot.slane %v25_v49, 3  ;;  %v2077_v17 = vld [vmem:[%s2810_s0 + $0x1b] sm:$0x1] }
   0xf   :  { %2329 = vmatprep.subr.bf16.mxu1 %v2430_v2  ;;  %v546_v1 = vrot.slane %v26_v50, 2  ;;  %v633_v5 = vsub.f32 %v2547_v48, %v632_v58  ;;  %v543_v7 = vsel %vm55_vm4, %v542_v60, %v541_v63  ;;  %v548_v8 = vrot.slane %v27_v55, 1  ;;  %v2078_v25 = vld [vmem:[%s2810_s0 + $0x1d] sm:$0x1]  ;;  %v2079_v26 = vld [vmem:[%s2810_s0 + $0x1f] sm:$0x1] }
  0x10   :  { %v2580_v4 = vsub.f32 %v67_v53, %v2566_v57  ;;  %v640_v14 = vsub.f32 %v2560_v54, %v639_v62  ;;  %v545_v15 = vsel %vm58_vm5, %v544_v0, %v543_v7  ;;  %v1065_v18 = vrot.slane %v2073_v61, 7  ;;  %v1042_v33 = vld [vmem:[%s2810_s0 + $0x3] sm:$0x1]  ;;  %v1043_v34 = vld [vmem:[%s2810_s0 + $0x5] sm:$0x1] }
  0x11   :  { %2164 = vmatmul.mubr.f32.vlgmr.msra.gmra.mrb[0].mxu1 %v2566_v57  ;;  %v634_v23 = vand.u32 4294901760, %v633_v5  ;;  %v547_v24 = vsel %vm61_vm6, %v546_v1, %v545_v15  ;;  %v1067_v32 = vrot.slane %v2074_v9, 6  ;;  %v1069_v37 = vrot.slane %v2075_v13, 5  ;;  %v1041_v39 = vld [vmem:[%s2810_s0 + $0x1] sm:$0x1] }
  0x12   :  { %2331 = vmatpush3.bf16.msra.mxu1 %v2480_v10  ;;  %2177 = vmatprep.mubr.msk.f32.mxu1 %vm2431_vm0, %v2432_v6  ;;  %v138_v21 = vand.u32 4294901760, %v2580_v4  ;;  %v641_v27 = vand.u32 4294901760, %v640_v14  ;;  %v549_v28 = vsel %vm64_vm7, %v548_v8, %v547_v24  ;;  %v1066_v31 = vsel %vm46_vm1, %v1065_v18, %v2072_v3 }
  0x13   :  { %2335 = vmatprep.subr.bf16.mxu1 %v2430_v2  ;;  %v550_v36 = vsel %vm66_vm8, %v549_v28, 0  ;;  %v1071_v38 = vrot.slane %v2076_v16, 4 }
  0x14   :  { %v139_v35 = vsub.f32 %v2580_v4, %v138_v21 }
  0x15   :  { %2178 = vmatmul.mubr.f32.vlgmr.msra.gmra.mrb[2].mxu1 %v138_v21 }
  0x16   :  { %8 = vsyncpa [#allocation3], 0  ;;  %2337 = vmatpush3.bf16.msra.mxu1 %v2480_v10  ;;  %2191 = vmatprep.mubr.msk.f32.mxu1 %vm2431_vm0, %v2432_v6  ;;  %v2635_v41 = vpack.c.bf16 %v641_v27, %v634_v23  ;;  %v2637_v43 = vand.u32 4294901760, %v550_v36  ;;  %v1068_v45 = vsel %vm49_vm2, %v1067_v32, %v1066_v31  ;;  %v1073_v46 = vrot.slane %v2077_v17, 3  ;;  %v1044_v47 = vld [vmem:[%s2810_s0 + $0x7] sm:$0x1] }
  0x17   :  { %v1045_v49 = vld [vmem:[%s2810_s0 + $0x9] sm:$0x1]  ;;  %v140_v50 = vand.u32 4294901760, %v139_v35  ;;  %2341 = vmatprep.subr.bf16.mxu1 %v2430_v2  ;;  %v1070_v51 = vsel %vm52_vm3, %v1069_v37, %v1068_v45  ;;  %v1075_v52 = vrot.slane %v2078_v25, 2  ;;  %v1077_v53 = vrot.slane %v2079_v26, 1 }
  0x18   :  { %v1046_v55 = vld [vmem:[%s2810_s0 + $0xb] sm:$0x1]  ;;  %v2652_v56 = vsub.f32 %v550_v36, %v2637_v43  ;;  %v1072_v59 = vsel %vm55_vm4, %v1071_v38, %v1070_v51  ;;  %v1548_v60 = vrot.slane %v1042_v33, 7  ;;  %v1550_v61 = vrot.slane %v1043_v34, 6  ;;  %v1047_v1 = vld [vmem:[%s2810_s0 + $0xd] sm:$0x1] }
  0x19   :  { %2157 = vmatmul.mubr.f32.vlgmr.msra.gmra.mrb[0].mxu0 %v140_v50  ;;  %v2659_v63 = vpack.c.bf16 %v156_v20, %v149_v19  ;;  %2192 = vmatmul.mubr.f32.vlgmr.msra.gmra.mrb[4].mxu1 %v2566_v57  ;;  %v1074_v0 = vsel %vm58_vm5, %v1073_v46, %v1072_v59  ;;  %v1552_v3 = vrot.slane %v1044_v47, 5  ;;  %v1554_v5 = vrot.slane %v1045_v49, 4  ;;  %v1048_v13 = vld [vmem:[%s2810_s0 + $0xf] sm:$0x1] }
  0x1a   :  { %2328 = vmatpush3.bf16.msra.mxu0 %v2609_v22  ;;  %2170 = vmatprep.mubr.msk.f32.mxu0 %vm2431_vm0, %v2432_v6  ;;  %v621_v11 = vand.u32 4294901760, %v2652_v56  ;;  %v1076_v12 = vsel %vm61_vm6, %v1075_v52, %v1074_v0  ;;  %v1549_v19 = vsel %vm46_vm1, %v1548_v60, %v1041_v39  ;;  %v1556_v20 = vrot.slane %v1046_v55, 3 }
  0x1b   :  { %2332 = vmatprep.subr.bf16.mxu0 %v2430_v2  ;;  %2343 = vmatpush3.bf16.msra.mxu1 %v2635_v41  ;;  %v1078_v7 = vsel %vm64_vm7, %v1077_v53, %v1076_v12  ;;  %v1551_v8 = vsel %vm49_vm2, %v1550_v61, %v1549_v19  ;;  %v1558_v15 = vrot.slane %v1047_v1, 2  ;;  %v2696_v21 = vpack.c.bf16 %v556_v44, %v553_v40 }
  0x1c   :  { %2205 = vmatprep.mubr.msk.f32.mxu1 %vm2431_vm0, %v2432_v6  ;;  %2347 = vmatprep.subr.bf16.mxu1 %v2430_v2  ;;  %v1079_v9 = vsel %vm66_vm8, %v1078_v7, 0  ;;  %v1553_v14 = vsel %vm52_vm3, %v1552_v3, %v1551_v8  ;;  %v622_v16 = vsub.f32 %v2652_v56, %v621_v11  ;;  %v2713_v40 = vpack.c.bf16 %v2560_v54, %v2547_v48 }
  0x1d   :  { %2171 = vmatmul.mubr.f32.vlgmr.msra.gmra.mrb[2].mxu0 %v2580_v4  ;;  %v2686_v17 = vand.u32 4294901760, %v1079_v9  ;;  %v1555_v18 = vsel %vm55_vm4, %v1554_v5, %v1553_v14  ;;  %v1560_v4 = vrot.slane %v1048_v13, 1  ;;  %v2351_v25 = vpack.c.bf16 %v639_v62, %v632_v58 }
  0x1e   :  { %2334 = vmatpush3.bf16.msra.mxu0 %v2659_v63  ;;  %2184 = vmatprep.mubr.msk.f32.mxu0 %vm2431_vm0, %v2432_v6  ;;  %v1557_v23 = vsel %vm58_vm5, %v1556_v20, %v1555_v18  ;;  %v623_v29 = vand.u32 4294901760, %v622_v16  ;;  %v2071_v20 = vld [vmem:[%s2812_s2] ss:$0 sm:$0xff]  ;;  %vm1018_vm9 = vcmask 80896   ;;  %s2433_s2 = smov [#allocation2]  }
  0x1f   :  { %2338 = vmatprep.subr.bf16.mxu0 %v2430_v2  ;;  %2206 = vmatmul.mubr.f32.vlgmr.msra.gmra.mrb[6].mxu1 %v2637_v43  ;;  %v1559_v24 = vsel %vm61_vm6, %v1558_v15, %v1557_v23  ;;  %v1149_v30 = vsub.f32 %v1079_v9, %v2686_v17  ;;  %s2052_s29 = sshll.u32 %s2433_s2, 4  ;;  %s2053_s29 = int_to_ptr.vmem [resolvable:$true] %s2052_s29 }
  0x20   :  { %2349 = vmatpush3.bf16.msra.mxu1 %v2696_v21  ;;  %2219 = vmatprep.mubr.msk.f32.mxu1 %vm2431_vm0, %v2432_v6  ;;  %v1561_v44 = vsel %vm64_vm7, %v1560_v4, %v1559_v24  ;;  %s2406_s30 = scalar_lea.vmem %s2053_s29, 256  ;;  %p2411_p1 = scmp.lt.s32.totalorder %s2053_s29, %s2053_s29 }
  0x21   :  { %2185 = vmatmul.mubr.f32.vlgmr.msra.gmra.mrb[4].mxu0 %v2566_v57  ;;  %2353 = vmatprep.subr.bf16.mxu1 %v2430_v2  ;;  %v1150_v57 = vand.u32 4294901760, %v1149_v30  ;;  %v1562_v26 = vsel %vm66_vm8, %v1561_v44, 0  ;;  %p2407_p0 = scmp.ne.s32.totalorder %s2053_s29, %s2406_s30  ;;  %p2412_p2 = scmp.lt.s32.totalorder %s2406_s30, %s2406_s30 }
  0x22   :  { %2340 = vmatpush3.bf16.msra.mxu0 %v2696_v21  ;;  %2198 = vmatprep.mubr.msk.f32.mxu0 %vm2431_vm0, %v2432_v6  ;;  %v1631_v48 = vand.u32 4294901760, %v1562_v26 }
  0x23   :  { %2344 = vmatprep.subr.bf16.mxu0 %v2430_v2  ;;  %2220 = vmatmul.mubr.f32.vlgmr.msra.gmra.mrb[8].mxu1 %v621_v11  ;;  %v1151_v27 = vsub.f32 %v1149_v30, %v1150_v57  ;;  %p2413_p3 = por %p2412_p2, %p2411_p1 }
  0x24   :  { %2355 = vmatpush3.bf16.msra.mxu1 %v2696_v21  ;;  %2233 = vmatprep.mubr.msk.f32.mxu1 %vm2431_vm0, %v2432_v6  ;;  %v1632_v54 = vsub.f32 %v1562_v26, %v1631_v48 }
  0x25   :  { %2199 = vmatmul.mubr.f32.vlgmr.msra.gmra.mrb[6].mxu0 %v623_v29  ;;  %2359 = vmatprep.subr.bf16.mxu1 %v2430_v2  ;;  %p2414_p4 = pnand %p2413_p3, %p2407_p0 }
  0x26   :  { %2346 = vmatpush3.bf16.msra.mxu0 %v2713_v40  ;;  %2212 = vmatprep.mubr.msk.f32.mxu0 %vm2431_vm0, %v2432_v6  ;;  %v1633_v58 = vand.u32 4294901760, %v1632_v54 }
  0x27   :  { %2350 = vmatprep.subr.bf16.mxu0 %v2430_v2  ;;  %2234 = vmatmul.mubr.f32.vlgmr.msra.gmra.mrb[10].mxu1 %v2637_v43 }
  0x28   :  { %2361 = vmatpush3.bf16.msra.mxu1 %v2536_v42  ;;  %2247 = vmatprep.mubr.msk.f32.mxu1 %vm2431_vm0, %v2432_v6  ;;  %v1152_v42 = vand.u32 4294901760, %v1151_v27 }
  0x29   :  { %2213 = vmatmul.mubr.f32.vlgmr.msra.gmra.mrb[8].mxu0 %v2652_v56  ;;  %2365 = vmatprep.subr.bf16.mxu1 %v2430_v2 }
  0x2a   :  { %2352 = vmatpush3.bf16.msra.mxu0 %v2351_v25  ;;  %2226 = vmatprep.mubr.msk.f32.mxu0 %vm2431_vm0, %v2432_v6 }
  0x2b   :  { %2356 = vmatprep.subr.bf16.mxu0 %v2430_v2  ;;  %2248 = vmatmul.mubr.f32.vlgmr.msra.gmra.mrb[12].mxu1 %v2686_v17 }
  0x2c   :  { %2367 = vmatpush3.bf16.msra.mxu1 %v2480_v10  ;;  %2261 = vmatprep.mubr.msk.f32.mxu1 %vm2431_vm0, %v2432_v6 }
  0x2d   :  { %2227 = vmatmul.mubr.f32.vlgmr.msra.gmra.mrb[10].mxu0 %v2637_v43  ;;  %2371 = vmatprep.subr.bf16.mxu1 %v2430_v2 }
  0x2e   :  { %2358 = vmatpush3.bf16.msra.mxu0 %v2480_v10  ;;  %2240 = vmatprep.mubr.msk.f32.mxu0 %vm2431_vm0, %v2432_v6 }
  0x2f   :  { %2362 = vmatprep.subr.bf16.mxu0 %v2430_v2  ;;  %2262 = vmatmul.mubr.f32.vlgmr.msra.gmra.mrb[14].mxu1 %v1150_v57 }
  0x30   :  { %2373 = vmatpush3.bf16.msra.mxu1 %v2480_v10  ;;  %2275 = vmatprep.mubr.msk.f32.mxu1 %vm2431_vm0, %v2432_v6  ;;  %v1634_v10 = vsub.f32 %v1632_v54, %v1633_v58 }
  0x31   :  { %2241 = vmatmul.mubr.f32.vlgmr.msra.gmra.mrb[12].mxu0 %v1152_v42  ;;  %2377 = vmatprep.subr.bf16.mxu1 %v2430_v2 }
  0x32   :  { %2364 = vmatpush3.bf16.msra.mxu0 %v2609_v22  ;;  %2254 = vmatprep.mubr.msk.f32.mxu0 %vm2431_vm0, %v2432_v6  ;;  %v1635_v62 = vand.u32 4294901760, %v1634_v10 }
  0x33   :  { %2368 = vmatprep.subr.bf16.mxu0 %v2430_v2  ;;  %2276 = vmatmul.mubr.f32.vlgmr.msra.gmra.mrb[16].mxu1 %v2686_v17 }
  0x34   :  { %2379 = vmatpush3.bf16.msra.mxu1 %v2635_v41  ;;  %2289 = vmatprep.mubr.msk.f32.mxu1 %vm2431_vm0, %v2432_v6 }
  0x35   :  { %2255 = vmatmul.mubr.f32.vlgmr.msra.gmra.mrb[14].mxu0 %v1149_v30  ;;  %2383 = vmatprep.subr.bf16.mxu1 %v2430_v2 }
  0x36   :  { %2370 = vmatpush3.bf16.msra.mxu0 %v2659_v63  ;;  %2268 = vmatprep.mubr.msk.f32.mxu0 %vm2431_vm0, %v2432_v6 }
  0x37   :  { %2374 = vmatprep.subr.bf16.mxu0 %v2430_v2  ;;  %2290 = vmatmul.mubr.f32.vlgmr.msra.gmra.mrb[18].mxu1 %v1631_v48 }
  0x38   :  { %2385 = vmatpush3.bf16.msra.mxu1 %v2696_v21  ;;  %2303 = vmatprep.mubr.msk.f32.mxu1 %vm2431_vm0, %v2432_v6 }
  0x39   :  { %2269 = vmatmul.mubr.f32.vlgmr.msra.gmra.mrb[16].mxu0 %v2686_v17  ;;  %2389 = vmatprep.subr.bf16.mxu1 %v2430_v2 }
  0x3a   :  { %2376 = vmatpush3.bf16.msra.mxu0 %v2696_v21  ;;  %2282 = vmatprep.mubr.msk.f32.mxu0 %vm2431_vm0, %v2432_v6 }
  0x3b   :  { %2380 = vmatprep.subr.bf16.mxu0 %v2430_v2  ;;  %2304 = vmatmul.mubr.f32.vlgmr.msra.gmra.mrb[20].mxu1 %v1633_v58 }
  0x3c   :  { %2391 = vmatpush3.bf16.msra.mxu1 %v2696_v21  ;;  %2317 = vmatprep.mubr.msk.f32.mxu1 %vm2431_vm0, %v2432_v6 }
  0x3d   :  { %2283 = vmatmul.mubr.f32.vlgmr.msra.gmra.mrb[18].mxu0 %v1635_v62 }
  0x3e   :  { %2382 = vmatpush3.bf16.msra.mxu0 %v2713_v40  ;;  %2296 = vmatprep.mubr.msk.f32.mxu0 %vm2431_vm0, %v2432_v6 }
  0x3f   :  { %2386 = vmatprep.subr.bf16.mxu0 %v2430_v2  ;;  %2318 = vmatmul.mubr.f32.vlgmr.msra.gmra.mrb[22].mxu1 %v1631_v48 }
  0x41   :  { %2297 = vmatmul.mubr.f32.vlgmr.msra.gmra.mrb[20].mxu0 %v1632_v54 }
  0x42   :  { %2388 = vmatpush3.bf16.msra.mxu0 %v2351_v25  ;;  %2310 = vmatprep.mubr.msk.f32.mxu0 %vm2431_vm0, %v2432_v6 }
  0x45   :  { %2311 = vmatmul.mubr.f32.vlgmr.msra.gmra.mrb[22].mxu0 %v1631_v48 }
  0xe4   :  { %v223_v22 = vpop.f32.mrb[0].mxu1 }
  0xe5   :  { %v2165_v28 = vpop.f32.mrb[1].mxu1 }
  0xe8   :  { %v374_v31 = vpop.f32.mrb[2].mxu1 }
  0xe9   :  { %v2179_v32 = vpop.f32.mrb[3].mxu1 }
  0xec   :  { %v142_v33 = vpop.f32.mrb[0].mxu0  ;;  %v524_v34 = vpop.f32.mrb[4].mxu1 }
  0xed   :  { %v224_v35 = vadd.f32 %v223_v22, %v142_v33  ;;  %v2158_v36 = vpop.f32.mrb[1].mxu0  ;;  %v2193_v37 = vpop.f32.mrb[5].mxu1 }
  0xf0   :  { %v299_v38 = vpop.f32.mrb[2].mxu0 }
  0xf1   :  { %v300_v39 = vadd.f32 %v299_v38, %v224_v35  ;;  %v2172_v41 = vpop.f32.mrb[3].mxu0 }
  0xf2   :  { %v706_v2 = vpop.f32.mrb[6].mxu1 }
  0xf3   :  { %v375_v43 = vadd.f32 %v374_v31, %v300_v39  ;;  %v2207_v45 = vpop.f32.mrb[7].mxu1 }
  0xf4   :  { %v451_v46 = vpop.f32.mrb[4].mxu0 }
  0xf5   :  { %v452_v47 = vadd.f32 %v451_v46, %v375_v43  ;;  %v2186_v49 = vpop.f32.mrb[5].mxu0 }
  0xf6   :  { %v857_v6 = vpop.f32.mrb[8].mxu1 }
  0xf7   :  { %v525_v50 = vadd.f32 %v524_v34, %v452_v47  ;;  %v2221_v51 = vpop.f32.mrb[9].mxu1 }
  0xf8   :  { %v625_v52 = vpop.f32.mrb[6].mxu0 }
  0xf9   :  { %v626_v53 = vadd.f32 %v625_v52, %v525_v50  ;;  %v2200_v55 = vpop.f32.mrb[7].mxu0 }
  0xfa   :  { %v1007_v56 = vpop.f32.mrb[10].mxu1 }
  0xfb   :  { %v707_v59 = vadd.f32 %v706_v2, %v626_v53  ;;  %v2235_v60 = vpop.f32.mrb[11].mxu1 }
  0xfc   :  { %v782_v61 = vpop.f32.mrb[8].mxu0 }
  0xfd   :  { %v783_v63 = vadd.f32 %v782_v61, %v707_v59  ;;  %v2214_v0 = vpop.f32.mrb[9].mxu0 }
  0xfe   :  { %v1235_v1 = vpop.f32.mrb[12].mxu1 }
  0xff   :  { %v858_v3 = vadd.f32 %v857_v6, %v783_v63  ;;  %v2249_v5 = vpop.f32.mrb[13].mxu1 }
 0x100   :  { %v934_v11 = vpop.f32.mrb[10].mxu0 }
 0x101   :  { %v935_v12 = vadd.f32 %v934_v11, %v858_v3  ;;  %v2228_v19 = vpop.f32.mrb[11].mxu0 }
 0x102   :  { %v1386_v7 = vpop.f32.mrb[14].mxu1 }
 0x103   :  { %v1008_v8 = vadd.f32 %v1007_v56, %v935_v12  ;;  %v2263_v9 = vpop.f32.mrb[15].mxu1 }
 0x104   :  { %v1154_v13 = vpop.f32.mrb[12].mxu0 }
 0x105   :  { %v2787_v14 = vadd.f32 %v2071_v20, %v1008_v8  ;;  %v1236_v15 = vadd.f32 %v1235_v1, %v1154_v13  ;;  %v2242_v16 = vpop.f32.mrb[13].mxu0 }
 0x106   :  { %v1536_v17 = vpop.f32.mrb[16].mxu1 }
 0x107   :  { %v1019_v18 = vsel %vm1018_vm9, %v2787_v14, -inf  ;;  %v2277_v21 = vpop.f32.mrb[17].mxu1 }
 0x108   :  { %v1020_v23 = vrot.slane %v1019_v18, 4  ;;  %v1311_v4 = vpop.f32.mrb[14].mxu0 }
 0x109   :  { %v1312_v24 = vadd.f32 %v1311_v4, %v1236_v15  ;;  %v2256_v29 = vpop.f32.mrb[15].mxu0 }
 0x10a   :  { %v1021_v30 = vmax.f32 %v1019_v18, %v1020_v23  ;;  %v1718_v40 = vpop.f32.mrb[18].mxu1 }
 0x10b   :  { %v1387_v44 = vadd.f32 %v1386_v7, %v1312_v24  ;;  %v2291_v57 = vpop.f32.mrb[19].mxu1 }
 0x10c   :  { %v1022_v25 = vrot.slane %v1021_v30, 2  ;;  %v1463_v26 = vpop.f32.mrb[16].mxu0 }
 0x10d   :  { %v1464_v27 = vadd.f32 %v1463_v26, %v1387_v44  ;;  %v2270_v48 = vpop.f32.mrb[17].mxu0 }
 0x10e   :  { %v1023_v42 = vmax.f32 %v1021_v30, %v1022_v25  ;;  %v1869_v54 = vpop.f32.mrb[20].mxu1 }
 0x10f   :  { %v1537_v58 = vadd.f32 %v1536_v17, %v1464_v27  ;;  %v2305_v10 = vpop.f32.mrb[21].mxu1 }
 0x110   :  { %v1024_v62 = vrot.slane %v1023_v42, 1  ;;  %v1637_v22 = vpop.f32.mrb[18].mxu0 }
 0x111   :  { %v1638_v28 = vadd.f32 %v1637_v22, %v1537_v58  ;;  %v2284_v31 = vpop.f32.mrb[19].mxu0 }
 0x112   :  { %v1025_v32 = vmax.f32 %v1023_v42, %v1024_v62  ;;  %v2019_v33 = vpop.f32.mrb[22].mxu1 }
 0x113   :  { %v1719_v34 = vadd.f32 %v1718_v40, %v1638_v28  ;;  %v2319_v35 = vpop.f32.mrb[23].mxu1 }
 0x114   :  { %v1026_v36 = vsub.f32 %v2787_v14, %v1025_v32  ;;  %v1794_v37 = vpop.f32.mrb[20].mxu0 }
 0x115   :  { %v1795_v38 = vadd.f32 %v1794_v37, %v1719_v34  ;;  %v2298_v39 = vpop.f32.mrb[21].mxu0 }
 0x116   :  { %v1027_v41 = vmul.f32 1.442695, %v1026_v36 }
 0x117   :  { %v1870_v2 = vadd.f32 %v1869_v54, %v1795_v38 }
 0x118   :  { %2398 = vpow2.f32 %v1027_v41  ;;  %v1946_v43 = vpop.f32.mrb[22].mxu0 }
 0x119   :  { %v1947_v45 = vadd.f32 %v1946_v43, %v1870_v2  ;;  %v2312_v46 = vpop.f32.mrb[23].mxu0 }
 0x11b   :  { %v2020_v47 = vadd.f32 %v2019_v33, %v1947_v45 }
 0x11d   :  { %v2023_v49 = vadd.f32 %v2071_v20, %v2020_v47 }
 0x11f   :  { %v2024_v6 = vsel %vm1018_vm9, %v2023_v49, -inf }
 0x120   :  { %v2025_v50 = vrot.slane %v2024_v6, 4 }
 0x122   :  { %v2399_v51 = vpop.eup %2398  ;;  %v2026_v52 = vmax.f32 %v2024_v6, %v2025_v50 }
 0x123   :  { %v1029_v53 = vsel %vm1018_vm9, %v2399_v51, 0.0 }
 0x124   :  { %v1030_v55 = vrot.slane %v1029_v53, 4  ;;  %v2027_v56 = vrot.slane %v2026_v52, 2 }
 0x126   :  { %v1031_v59 = vadd.f32 %v1030_v55, %v1029_v53  ;;  %v2028_v60 = vmax.f32 %v2026_v52, %v2027_v56 }
 0x128   :  { %v1032_v61 = vrot.slane %v1031_v59, 2  ;;  %v2029_v63 = vrot.slane %v2028_v60, 1 }
 0x12a   :  { %v1033_v0 = vadd.f32 %v1032_v61, %v1031_v59  ;;  %v2030_v1 = vmax.f32 %v2028_v60, %v2029_v63 }
 0x12c   :  { %v1034_v3 = vrot.slane %v1033_v0, 1  ;;  %v2031_v5 = vsub.f32 %v2023_v49, %v2030_v1 }
 0x12e   :  { %v1035_v11 = vadd.f32 %v1034_v3, %v1033_v0  ;;  %v2032_v12 = vmul.f32 1.442695, %v2031_v5 }
 0x130   :  { %2400 = vlog2.f32 %v1035_v11 }
 0x131   :  { %2402 = vpow2.f32 %v2032_v12 }
 0x13a   :  { %v2401_v19 = vpop.eup %2400 }
 0x13b   :  { %v2403_v20 = vpop.eup %2402  ;;  %v1037_v7 = vmul.f32 0.6931472, %v2401_v19 }
 0x13c   :  { %v2034_v8 = vsel %vm1018_vm9, %v2403_v20, 0.0 }
 0x13d   :  { %v1038_v9 = vadd.f32 %v1037_v7, %v1025_v32  ;;  %v2035_v13 = vrot.slane %v2034_v8, 4 }
 0x13f   :  { %v1039_v15 = vsub.f32 %v2787_v14, %v1038_v9  ;;  %v2036_v16 = vadd.f32 %v2035_v13, %v2034_v8 }
 0x141   :  { %1040 = vst.msk [vmem:[#allocation2] sm:$0xff] %vm1018_vm9, %v1039_v15  ;;  %v2037_v17 = vrot.slane %v2036_v16, 2 }
 0x143   :  { %v2038_v18 = vadd.f32 %v2037_v17, %v2036_v16 }
 0x145   :  { %v2039_v21 = vrot.slane %v2038_v18, 1 }
 0x147   :  { %v2040_v23 = vadd.f32 %v2039_v21, %v2038_v18 }
 0x149   :  { %2404 = vlog2.f32 %v2040_v23 }
 0x153   :  { %v2405_v4 = vpop.eup %2404 }
 0x154   :  { %v2042_v24 = vmul.f32 0.6931472, %v2405_v4 }
 0x156   :  { %v2043_v29 = vadd.f32 %v2042_v24, %v2030_v1 }
 0x158   :  { %v2044_v30 = vsub.f32 %v2023_v49, %v2043_v29 }
 0x15a   :  { %2046 = vst.msk [vmem:[#allocation2 + $0x8] sm:$0xff] %vm1018_vm9, %v2044_v30 }
 0x15b   :  { %2417 = shalt.err (!%p2414_p4)
}
 0x15c   :  { %s2418_s6 = scalar_lea.hbm %s2813_s3, 256 }
 0x15d   :  { %p2419_p5 = scmp.ne.s32.totalorder %s2813_s3, %s2418_s6  ;;  %p2422_p6 = scmp.lt.u32.totalorder %s2418_s6, %s2813_s3 }
 0x15f   :  { %p2424_p7 = pnand %p2422_p6, %p2419_p5 }
 0x161   :  { %2427 = shalt.err (!%p2424_p7)
}
 0x162   :  { %s2434_s11 = smov 128   ;;  %s2435_s12 = smov 8  }
 0x163   :  { %2058 = dma.vmem_to_hbm [thread:$0]  %s2053_s29, 256, %s2813_s3, [#allocation3], %s2434_s11, %s2434_s11, %s2435_s12  }
 0x164   :  { %2428 = dma.done.wait [#allocation3], 256  }
 0x165   :  { %2429 = vsyncadd [#allocation3], 4294967040 }
 0x166   :  { %2062 = vsyncpa [#allocation3], 1 }

// kernel: pos_tagger_forward.5
= control target key start
LH: loop header
LB: loop body
LE: loop exit
PB: predicated region body
PF: predicated region fallthrough
CT: control target
= control target key end

     0   :  { %s7882_s24 = smov 0   ;;  %s8723_s0 = inlined_call_operand.vmem [shape: f32[2,8,2,16], index: 0, kind: input, shape index: {}]   ;;  %s8724_s1 = inlined_call_operand.vmem [shape: f32[2,32,48], index: 1, kind: input, shape index: {}]   ;;  %s8725_s2 = inlined_call_operand.vmem [shape: f32[2,16,48], index: 2, kind: input, shape index: {}]   ;;  %s8726_s3 = inlined_call_operand.vmem [shape: f32[2,1,48], index: 3, kind: input, shape index: {}]   ;;  %s8727_s4 = inlined_call_operand.vmem [shape: f32[2,1,16], index: 4, kind: input, shape index: {}]   ;;  %s8728_s5 = inlined_call_operand.vmem [shape: f32[2,2,16], index: 5, kind: input, shape index: {}]   ;;  %s8729_s6 = inlined_call_operand.vmem [shape: s32[2,1], index: 6, kind: input, shape index: {}]   ;;  %s8730_s7 = inlined_call_operand.vmem [shape: f32[2,8,2,16], index: 7, kind: output, shape index: {}]  }
   0x1 LB: > { %s7888_s25 = sadd.s32 4294967295, %s7831_s24   ;;  %p6695_p0 = scmp.ge.s32.totalorder %s7831_s24, 1  ;;  %s7831_s24 = sphi %s7882_s24, %s17_s24  }
   0x2   : > { %p272_p1 = scmp.lt.s32.totalorder %s7831_s24, 3 }
   0x4   : > { %p273_p2 = pnand %p6695_p0, %p272_p1 }
   0x5   : > { %p319_p3 = scmp.lt.s32.totalorder (!%p273_p2), %s7888_s25, 1  ;;  %v6703_v0 = vld [vmem:[%s8723_s0 + $0x10] sm:$0x1] (!%p273_p2)  ;;  %v7833_v1 = vmov (!%p273_p2), 0.0|0.0   ;;  %v6704_v2 = vld [vmem:[%s8723_s0 + $0x12] sm:$0x1] (!%p273_p2) }
   0x6   : > { %276 = sbr.rel (%p273_p2) target bundleno = 6029 (0x178d), region = 48  ;;  %7462 = vmatprep.subr.bf16.mxu0 (!%p273_p2), %v7833_v1  ;;  %7465 = vmatprep.subr.bf16.mxu1 (!%p273_p2), %v7833_v1  ;;  %v6705_v3 = vld [vmem:[%s8723_s0 + $0x14] sm:$0x1] (!%p273_p2)  ;;  %v6706_v4 = vld [vmem:[%s8723_s0 + $0x16] sm:$0x1] (!%p273_p2)  ;;  %vm7834_vm0 = vmmov (!%p273_p2), 0  }
   0x7   : > { %v7835_v5 = vmov (!%p273_p2), 0.0   ;;  %v6707_v6 = vld [vmem:[%s8723_s0 + $0x18] sm:$0x1] (!%p273_p2)  ;;  %v6708_v7 = vld [vmem:[%s8723_s0 + $0x1a] sm:$0x1] (!%p273_p2)  ;;  %v374_v8 = vrot.slane (!%p273_p2), %v6704_v2, 7 }
   0x8   : > { %6962 = vmatprep.mubr.msk.f32.mxu0 (!%p273_p2), %vm7834_vm0, %v7835_v5  ;;  %6969 = vmatprep.mubr.msk.f32.mxu1 (!%p273_p2), %vm7834_vm0, %v7835_v5  ;;  %v6709_v9 = vld [vmem:[%s8723_s0 + $0x1c] sm:$0x1] (!%p273_p2)  ;;  %vm375_vm1 = vcmask (!%p273_p2), 1041409   ;;  %v377_v10 = vrot.slane (!%p273_p2), %v6705_v3, 6  ;;  %vm378_vm2 = vcmask (!%p273_p2), 1042434   ;;  %v380_v12 = vrot.slane (!%p273_p2), %v6706_v4, 5 }
   0x9   : > { %v376_v11 = vsel (!%p273_p2), %vm375_vm1, %v374_v8, %v6703_v0  ;;  %vm381_vm3 = vcmask (!%p273_p2), 1043459   ;;  %v6710_v13 = vld [vmem:[%s8723_s0 + $0x1e] sm:$0x1] (!%p273_p2)  ;;  %v383_v15 = vrot.slane (!%p273_p2), %v6707_v6, 4  ;;  %vm384_vm4 = vcmask (!%p273_p2), 1044484   ;;  %s7836_s23 = smov (!%p273_p2), 32  }
   0xa   : > { %v379_v14 = vsel (!%p273_p2), %vm378_vm2, %v377_v10, %v376_v11  ;;  %v386_v16 = vrot.slane (!%p273_p2), %v6708_v7, 3  ;;  %vm387_vm5 = vcmask (!%p273_p2), 1045509   ;;  %v389_v20 = vrot.slane (!%p273_p2), %v6709_v9, 2  ;;  %v346_v32 = vld [vmem:[%s8723_s0 + $0x2] sm:$0x1] (!%p273_p2)  ;;  %s7839_s29 = smov (!%p273_p2), 96  }
   0xb   : > { %v382_v19 = vsel (!%p273_p2), %vm381_vm3, %v380_v12, %v379_v14  ;;  %vm390_vm6 = vcmask (!%p273_p2), 1046534   ;;  %v392_v26 = vrot.slane (!%p273_p2), %v6710_v13, 1  ;;  %vm393_vm7 = vcmask (!%p273_p2), 1047559   ;;  %v347_v35 = vld [vmem:[%s8723_s0 + $0x4] sm:$0x1] (!%p273_p2)  ;;  %p2471_p4 = scmp.eq.s32.totalorder (!%p273_p2), %s7888_s25, 1 }
   0xc   : > { %v385_v23 = vsel (!%p273_p2), %vm384_vm4, %v383_v15, %v382_v19  ;;  %vm395_vm8 = vcmask (!%p273_p2), 130048   ;;  %v345_v39 = vld [vmem:[%s8723_s0] sm:$0x1] (!%p273_p2)  ;;  %v348_v43 = vld [vmem:[%s8723_s0 + $0x6] sm:$0x1] (!%p273_p2)  ;;  %v865_v44 = vrot.slane (!%p273_p2), %v346_v32, 7 }
   0xd   : > { %s7908_s11 = scalar_select %p319_p3, %s7888_s25, 1  ;;  %v388_v25 = vsel %vm387_vm5, %v386_v16, %v385_v23  ;;  %v867_v47 = vrot.slane %v347_v35, 6  ;;  %v349_v51 = vld [vmem:[%s8723_s0 + $0x8] sm:$0x1]  ;;  %v350_v52 = vld [vmem:[%s8723_s0 + $0xa] sm:$0x1] }
   0xe   : > { %v391_v30 = vsel %vm390_vm6, %v389_v20, %v388_v25  ;;  %v351_v55 = vld [vmem:[%s8723_s0 + $0xc] sm:$0x1]  ;;  %v866_v56 = vsel %vm375_vm1, %v865_v44, %v345_v39  ;;  %v869_v57 = vrot.slane %v348_v43, 5  ;;  %v352_v61 = vld [vmem:[%s8723_s0 + $0xe] sm:$0x1]  ;;  %v871_v3 = vrot.slane %v349_v51, 4 }
   0xf   : > { %s6739_s18 = sshll.u32 %s7908_s11, 5  ;;  %v394_v33 = vsel %vm393_vm7, %v392_v26, %v391_v30  ;;  %v868_v62 = vsel %vm378_vm2, %v867_v47, %v866_v56  ;;  %v6713_v63 = vld [vmem:[%s8723_s0 + $0x13] sm:$0x1]  ;;  %v873_v4 = vrot.slane %v350_v52, 3  ;;  %v6712_v6 = vld [vmem:[%s8723_s0 + $0x11] sm:$0x1]  ;;  %s334_s22 = scalar_lea.vmem %s8727_s4, %s7908_s11 }
  0x10   : > { %s323_s21 = scalar_lea.vmem %s8724_s1, %s6739_s18  ;;  %v396_v38 = vsel %vm395_vm8, %v394_v33, 0  ;;  %v870_v2 = vsel %vm381_vm3, %v869_v57, %v868_v62  ;;  %v6714_v7 = vld [vmem:[%s8723_s0 + $0x15] sm:$0x1]  ;;  %v6715_v8 = vld [vmem:[%s8723_s0 + $0x17] sm:$0x1]  ;;  %v875_v11 = vrot.slane %v351_v55, 2  ;;  %s331_s28 = scalar_lea.vmem %s8726_s3, %s7908_s11 }
  0x11   : > { %v364_v17 = vld [vmem:[%s323_s21 + $0x10] sm:$0xff]  ;;  %v365_v18 = vld [vmem:[%s323_s21 + $0x18] sm:$0xff]  ;;  %v7934_v24 = vld [vmem:[%s323_s21] sm:$0xff]  ;;  %v7956_v40 = vand.u32 4294901760, %v396_v38  ;;  %v872_v16 = vsel %vm384_vm4, %v871_v3, %v870_v2  ;;  %v1442_v23 = vrot.slane %v6713_v63, 7  ;;  %s6740_s12 = sshll.u32 %s7908_s11, 4 }
  0x12   : > { %v399_v21 = vand.u32 4294901760, %v364_v17  ;;  %v402_v22 = vand.u32 4294901760, %v365_v18  ;;  %v7940_v31 = vld [vmem:[%s323_s21 + $0x8] sm:$0xff]  ;;  %v882_v34 = vand.u32 4294901760, %v7934_v24  ;;  %v6716_v12 = vld [vmem:[%s8723_s0 + $0x19] sm:$0x1]  ;;  %s328_s16 = scalar_lea.vmem %s8725_s2, %s6740_s12 }
  0x13   : > { %v885_v41 = vand.u32 4294901760, %v7940_v31  ;;  %v7968_v48 = vsub.f32 %v396_v38, %v7956_v40  ;;  %v6717_v13 = vld [vmem:[%s8723_s0 + $0x1b] sm:$0x1]  ;;  %v6719_v19 = vld [vmem:[%s8723_s0 + $0x1f] sm:$0x1]  ;;  %v1448_v30 = vrot.slane %v6716_v12, 4 }
  0x14   : > { %v7937_v27 = vpack.c.bf16 %v402_v22, %v399_v21  ;;  %v477_v28 = vsub.f32 %v364_v17, %v399_v21  ;;  %v484_v29 = vsub.f32 %v365_v18, %v402_v22  ;;  %v7962_v42 = vsub.f32 %v7934_v24, %v882_v34  ;;  %v6718_v18 = vld [vmem:[%s8723_s0 + $0x1d] sm:$0x1]  ;;  %v1415_v25 = vld [vmem:[%s8723_s0 + $0x3] sm:$0x1]  ;;  %v1414_v32 = vld [vmem:[%s8723_s0 + $0x1] sm:$0x1] }
  0x15   : > { %v7973_v49 = vsub.f32 %v7940_v31, %v885_v41  ;;  %v467_v58 = vand.u32 4294901760, %v7968_v48  ;;  %v877_v17 = vrot.slane %v352_v61, 1  ;;  %v874_v22 = vsel %vm387_vm5, %v873_v4, %v872_v16  ;;  %v1416_v33 = vld [vmem:[%s8723_s0 + $0x5] sm:$0x1]  ;;  %v1417_v39 = vld [vmem:[%s8723_s0 + $0x7] sm:$0x1] }
  0x16   : > { %7464 = vmatpush3.bf16.msra.mxu0 %v7937_v27  ;;  %v478_v36 = vand.u32 4294901760, %v477_v28  ;;  %v485_v37 = vand.u32 4294901760, %v484_v29  ;;  %v961_v50 = vand.u32 4294901760, %v7962_v42  ;;  %v8025_v14 = vpack.c.bf16 %v484_v29, %v477_v28  ;;  %v1418_v43 = vld [vmem:[%s8723_s0 + $0x9] sm:$0x1]  ;;  %s6700_s13 = sshll.u32 %s7908_s11, 1 }
  0x17   : > { %7468 = vmatprep.subr.bf16.mxu0 %v7833_v1  ;;  %v968_v60 = vand.u32 4294901760, %v7973_v49  ;;  %v468_v9 = vsub.f32 %v7968_v48, %v467_v58  ;;  %v876_v26 = vsel %vm390_vm6, %v875_v11, %v874_v22  ;;  %v1450_v38 = vrot.slane %v6717_v13, 3  ;;  %v1419_v51 = vld [vmem:[%s8723_s0 + $0xb] sm:$0x1]  ;;  %v1421_v61 = vld [vmem:[%s8723_s0 + $0xf] sm:$0x1]  ;;  %s338_s19 = scalar_lea.vmem %s8728_s5, %s6700_s13 }
  0x18   : > { %v479_v45 = vsub.f32 %v477_v28, %v478_v36  ;;  %v486_v46 = vsub.f32 %v484_v29, %v485_v37  ;;  %v7990_v59 = vsub.f32 %v7962_v42, %v961_v50  ;;  %v8027_v15 = vpack.c.bf16 %v485_v37, %v478_v36  ;;  %s8335_s30 = scalar_select %p2471_p4, 7, 0 }
  0x19   : > { %v969_v10 = vsub.f32 %v7973_v49, %v968_v60  ;;  %v469_v20 = vand.u32 4294901760, %v468_v9  ;;  %v1444_v28 = vrot.slane %v6714_v7, 6  ;;  %v1446_v29 = vrot.slane %v6715_v8, 5  ;;  %s7840_s14 = smov 16   ;;  %s7841_s15 = smov 112  }
  0x1a   : > { %v480_v53 = vand.u32 4294901760, %v479_v45  ;;  %v487_v54 = vand.u32 4294901760, %v486_v46  ;;  %v963_v21 = vand.u32 4294901760, %v7990_v59  ;;  %v878_v36 = vsel %vm393_vm7, %v877_v17, %v876_v26  ;;  %v8175_v26 = vld [vmem:[%s338_s19] sm:$0x3]  ;;  %s6720_s8 = sshll.u32 %s8335_s30, 1 }
  0x1b   : > { %6963 = vmatmul.mubr.f32.vlgmr.msra.gmra.mrb[0].mxu0 %v469_v20  ;;  %v970_v35 = vand.u32 4294901760, %v969_v10  ;;  %v1443_v37 = vsel %vm375_vm1, %v1442_v23, %v6712_v6  ;;  %v879_v44 = vsel %vm395_vm8, %v878_v36, 0  ;;  %v1452_v46 = vrot.slane %v6718_v18, 2  ;;  %v2467_v23 = vld [vmem:[%s328_s16] sm:$0xff]  ;;  %s2475_s9 = scalar_lea.vmem [#allocation2], %s6720_s8 }
  0x1c   : > { %v8000_v0 = vpack.c.bf16 %v487_v54, %v480_v53  ;;  %7470 = vmatpush3.bf16.msra.mxu0 %v8025_v14  ;;  %v1445_v45 = vsel %vm378_vm2, %v1444_v28, %v1443_v37  ;;  %v1454_v47 = vrot.slane %v6719_v19, 1  ;;  %6976 = vmatprep.mubr.msk.f32.mxu0 %vm7834_vm0, %v7835_v5  ;;  %v8068_v52 = vand.u32 4294901760, %v879_v44  ;;  %v1420_v54 = vld [vmem:[%s8723_s0 + $0xd] sm:$0x1]  ;;  %s8433_s19 = scalar_select %p2471_p4, 5, 2 }
  0x1d   : > { %7474 = vmatprep.subr.bf16.mxu0 %v7833_v1  ;;  %v1447_v53 = vsel %vm381_vm3, %v1446_v29, %v1445_v45  ;;  %v1925_v55 = vrot.slane %v1415_v25, 7  ;;  %v1927_v56 = vrot.slane %v1416_v33, 6  ;;  %v8081_v57 = vpack.c.bf16 %v885_v41, %v882_v34  ;;  %v2468_v25 = vld [vmem:[%s328_s16 + $0x8] sm:$0xff]  ;;  %s8384_s16 = scalar_select %p2471_p4, 6, 1 }
  0x1e   : > { %7467 = vmatpush3.bf16.msra.mxu1 %v8000_v0  ;;  %v1449_v59 = vsel %vm384_vm4, %v1448_v30, %v1447_v53  ;;  %v1929_v62 = vrot.slane %v1417_v39, 5  ;;  %v1931_v63 = vrot.slane %v1418_v43, 4  ;;  %v949_v2 = vsub.f32 %v879_v44, %v8068_v52  ;;  %s6725_s20 = sshll.u32 %s8433_s19, 1 }
  0x1f   : > { %7471 = vmatprep.subr.bf16.mxu1 %v7833_v1  ;;  %6977 = vmatmul.mubr.f32.vlgmr.msra.gmra.mrb[2].mxu0 %v7968_v48  ;;  %v1451_v24 = vsel %vm387_vm5, %v1450_v38, %v1449_v59  ;;  %v1926_v31 = vsel %vm375_vm1, %v1925_v55, %v1414_v32  ;;  %v1933_v34 = vrot.slane %v1419_v51, 3  ;;  %v8095_v41 = vpack.c.bf16 %v970_v35, %v963_v21  ;;  %v6722_v32 = vld [vmem:[%s334_s22] ss:$0 sm:$0xff]  ;;  %s6723_s17 = sshll.u32 %s8384_s16, 1  ;;  %s3505_s21 = scalar_lea.vmem [#allocation2], %s6725_s20 }
  0x20   : > { %7476 = vmatpush3.bf16.msra.mxu0 %v8027_v15  ;;  %v1453_v3 = vsel %vm390_vm6, %v1452_v46, %v1451_v24  ;;  %v1928_v4 = vsel %vm378_vm2, %v1927_v56, %v1926_v31  ;;  %v1935_v6 = vrot.slane %v1420_v54, 2  ;;  %6990 = vmatprep.mubr.msk.f32.mxu0 %vm7834_vm0, %v7835_v5  ;;  %v950_v48 = vand.u32 4294901760, %v949_v2  ;;  %s2995_s18 = scalar_lea.vmem [#allocation2], %s6723_s17 }
  0x21   : > { %6970 = vmatmul.mubr.f32.vlgmr.msra.gmra.mrb[0].mxu1 %v7956_v40  ;;  %7480 = vmatprep.subr.bf16.mxu0 %v7833_v1  ;;  %v1930_v7 = vsel %vm381_vm3, %v1929_v62, %v1928_v4  ;;  %v1937_v8 = vrot.slane %v1421_v61, 1  ;;  %v8118_v16 = vpack.c.bf16 %v7973_v49, %v7962_v42  ;;  %v8136_v21 = vpack.c.bf16 %v968_v60, %v961_v50  ;;  %s8478_s22 = scalar_select %p2471_p4, 4, 3 }
  0x22   : > { %7473 = vmatpush3.bf16.msra.mxu1 %v7937_v27  ;;  %6983 = vmatprep.mubr.msk.f32.mxu1 %vm7834_vm0, %v7835_v5  ;;  %v1932_v10 = vsel %vm384_vm4, %v1931_v63, %v1930_v7  ;;  %v951_v11 = vsub.f32 %v949_v2, %v950_v48  ;;  %v2481_v28 = vand.u32 4294901760, %v2467_v23  ;;  %v2484_v29 = vand.u32 4294901760, %v2468_v25  ;;  %s8572_s13 = scalar_select %p2471_p4, 2, 5 }
  0x23   : > { %7477 = vmatprep.subr.bf16.mxu1 %v7833_v1  ;;  %6991 = vmatmul.mubr.f32.vlgmr.msra.gmra.mrb[4].mxu0 %v7956_v40  ;;  %v1934_v13 = vsel %vm387_vm5, %v1933_v34, %v1932_v10  ;;  %v2478_v30 = vsel %vm395_vm8, %v8175_v26, 0  ;;  %vm1405_vm9 = vcmask 385024   ;;  %s6727_s26 = sshll.u32 %s8478_s22, 1 }
  0x24   : > { %7482 = vmatpush3.bf16.msra.mxu0 %v8081_v57  ;;  %v1936_v17 = vsel %vm390_vm6, %v1935_v6, %v1934_v13  ;;  %7004 = vmatprep.mubr.msk.f32.mxu0 %vm7834_vm0, %v7835_v5  ;;  %v8201_v35 = vsub.f32 %v2467_v23, %v2481_v28  ;;  %v8203_v36 = vsub.f32 %v2468_v25, %v2484_v29  ;;  %s4015_s27 = scalar_lea.vmem [#allocation2], %s6727_s26 }
  0x25   : > { %6984 = vmatmul.mubr.f32.vlgmr.msra.gmra.mrb[2].mxu1 %v467_v58  ;;  %v1455_v58 = vsel %vm393_vm7, %v1454_v47, %v1453_v3  ;;  %7486 = vmatprep.subr.bf16.mxu0 %v7833_v1  ;;  %v1938_v19 = vsel %vm393_vm7, %v1937_v8, %v1936_v17  ;;  %v8237_v46 = vpack.c.bf16 %v2484_v29, %v2481_v28  ;;  %v6711_v29 = vld [vmem:[%s331_s28] ss:$0 sm:$0xff]  ;;  %s8525_s28 = scalar_select %p2471_p4, 3, 4 }
  0x26   : > { %7479 = vmatpush3.bf16.msra.mxu1 %v7937_v27  ;;  %6997 = vmatprep.mubr.msk.f32.mxu1 %vm7834_vm0, %v7835_v5  ;;  %v1456_v9 = vsel %vm395_vm8, %v1455_v58, 0  ;;  %v1939_v22 = vsel %vm395_vm8, %v1938_v19, 0  ;;  %v2560_v38 = vand.u32 4294901760, %v8201_v35  ;;  %v8265_v54 = vpack.c.bf16 %v8203_v36, %v8201_v35 }
  0x27   : > { %7483 = vmatprep.subr.bf16.mxu1 %v7833_v1  ;;  %v8111_v12 = vand.u32 4294901760, %v1456_v9  ;;  %v8146_v49 = vand.u32 4294901760, %v1939_v22  ;;  %2951 = vrot.lane.b32.xlu0 %v6722_v32, %s7836_s23 }
  0x28   : > { %v2561_v43 = vsub.f32 %v8201_v35, %v2560_v38 }
  0x29   : > { %6998 = vmatmul.mubr.f32.vlgmr.msra.gmra.mrb[4].mxu1 %v7956_v40  ;;  %v952_v40 = vand.u32 4294901760, %v951_v11  ;;  %v1526_v18 = vsub.f32 %v1456_v9, %v8111_v12  ;;  %v8168_v60 = vsub.f32 %v1939_v22, %v8146_v49 }
  0x2a   : > { %7485 = vmatpush3.bf16.msra.mxu1 %v8095_v41  ;;  %7011 = vmatprep.mubr.msk.f32.mxu1 %vm7834_vm0, %v7835_v5  ;;  %v2562_v47 = vand.u32 4294901760, %v2561_v43 }
  0x2b   : > { %7489 = vmatprep.subr.bf16.mxu1 %v7833_v1  ;;  %7005 = vmatmul.mubr.f32.vlgmr.msra.gmra.mrb[6].mxu0 %v952_v40  ;;  %v1527_v20 = vand.u32 4294901760, %v1526_v18  ;;  %v1352_v40 = vlaneseq }
  0x2c   : > { %7488 = vmatpush3.bf16.msra.mxu0 %v8118_v16  ;;  %7018 = vmatprep.mubr.msk.f32.mxu0 %vm7834_vm0, %v7835_v5 }
  0x2d   : > { %7012 = vmatmul.mubr.f32.vlgmr.msra.gmra.mrb[6].mxu1 %v8068_v52  ;;  %7492 = vmatprep.subr.bf16.mxu0 %v7833_v1  ;;  %v1528_v42 = vsub.f32 %v1526_v18, %v1527_v20 }
  0x2e   : > { %7491 = vmatpush3.bf16.msra.mxu1 %v8081_v57  ;;  %7025 = vmatprep.mubr.msk.f32.mxu1 %vm7834_vm0, %v7835_v5 }
  0x2f   : > { %7495 = vmatprep.subr.bf16.mxu1 %v7833_v1  ;;  %7019 = vmatmul.mubr.f32.vlgmr.msra.gmra.mrb[8].mxu0 %v949_v2  ;;  %v1529_v50 = vand.u32 4294901760, %v1528_v42 }
  0x30   : > { %7494 = vmatpush3.bf16.msra.mxu0 %v8136_v21  ;;  %7032 = vmatprep.mubr.msk.f32.mxu0 %vm7834_vm0, %v7835_v5 }
  0x31   : > { %7026 = vmatmul.mubr.f32.vlgmr.msra.gmra.mrb[8].mxu1 %v950_v48  ;;  %7498 = vmatprep.subr.bf16.mxu0 %v7833_v1 }
  0x32   : > { %7497 = vmatpush3.bf16.msra.mxu1 %v8081_v57  ;;  %7039 = vmatprep.mubr.msk.f32.mxu1 %vm7834_vm0, %v7835_v5 }
  0x33   : > { %7501 = vmatprep.subr.bf16.mxu1 %v7833_v1  ;;  %7033 = vmatmul.mubr.f32.vlgmr.msra.gmra.mrb[10].mxu0 %v8068_v52 }
  0x34   : > { %7500 = vmatpush3.bf16.msra.mxu0 %v7937_v27  ;;  %7046 = vmatprep.mubr.msk.f32.mxu0 %vm7834_vm0, %v7835_v5 }
  0x35   : > { %7040 = vmatmul.mubr.f32.vlgmr.msra.gmra.mrb[10].mxu1 %v8068_v52  ;;  %7504 = vmatprep.subr.bf16.mxu0 %v7833_v1 }
  0x36   : > { %7503 = vmatpush3.bf16.msra.mxu1 %v8000_v0  ;;  %7053 = vmatprep.mubr.msk.f32.mxu1 %vm7834_vm0, %v7835_v5  ;;  %v2010_v0 = vand.u32 4294901760, %v8168_v60 }
  0x37   : > { %7507 = vmatprep.subr.bf16.mxu1 %v7833_v1  ;;  %7047 = vmatmul.mubr.f32.vlgmr.msra.gmra.mrb[12].mxu0 %v1529_v50  ;;  %v1353_v50 = vshrl.u32 %v1352_v40, 7 }
  0x38   : > { %7506 = vmatpush3.bf16.msra.mxu0 %v8025_v14  ;;  %7060 = vmatprep.mubr.msk.f32.mxu0 %vm7834_vm0, %v7835_v5  ;;  %v2011_v33 = vsub.f32 %v8168_v60, %v2010_v0  ;;  %v8197_v14 = vand.u32 4294901760, %v2478_v30 }
  0x39   : > { %7054 = vmatmul.mubr.f32.vlgmr.msra.gmra.mrb[12].mxu1 %v8111_v12  ;;  %7510 = vmatprep.subr.bf16.mxu0 %v7833_v1 }
  0x3a   : > { %7509 = vmatpush3.bf16.msra.mxu1 %v7937_v27  ;;  %7067 = vmatprep.mubr.msk.f32.mxu1 %vm7834_vm0, %v7835_v5  ;;  %v2548_v37 = vsub.f32 %v2478_v30, %v8197_v14 }
  0x3b   : > { %7513 = vmatprep.subr.bf16.mxu1 %v7833_v1  ;;  %7061 = vmatmul.mubr.f32.vlgmr.msra.gmra.mrb[14].mxu0 %v1526_v18 }
  0x3c   : > { %7512 = vmatpush3.bf16.msra.mxu0 %v8027_v15  ;;  %7074 = vmatprep.mubr.msk.f32.mxu0 %vm7834_vm0, %v7835_v5  ;;  %v2012_v15 = vand.u32 4294901760, %v2011_v33  ;;  %v2549_v39 = vand.u32 4294901760, %v2548_v37 }
  0x3d   : > { %7068 = vmatmul.mubr.f32.vlgmr.msra.gmra.mrb[14].mxu1 %v1527_v20  ;;  %7516 = vmatprep.subr.bf16.mxu0 %v7833_v1 }
  0x3e   : > { %7515 = vmatpush3.bf16.msra.mxu1 %v7937_v27  ;;  %7081 = vmatprep.mubr.msk.f32.mxu1 %vm7834_vm0, %v7835_v5  ;;  %v2567_v27 = vand.u32 4294901760, %v8203_v36  ;;  %v2550_v45 = vsub.f32 %v2548_v37, %v2549_v39 }
  0x3f   : > { %7075 = vmatmul.mubr.f32.vlgmr.msra.gmra.mrb[16].mxu0 %v8111_v12  ;;  %7519 = vmatprep.subr.bf16.mxu1 %v7833_v1 }
  0x40   : > { %7518 = vmatpush3.bf16.msra.mxu0 %v8081_v57  ;;  %7088 = vmatprep.mubr.msk.f32.mxu0 %vm7834_vm0, %v7835_v5  ;;  %v2568_v44 = vsub.f32 %v8203_v36, %v2567_v27  ;;  %v2551_v52 = vand.u32 4294901760, %v2550_v45  ;;  %v8276_v55 = vpack.c.bf16 %v2567_v27, %v2560_v38 }
  0x41   : > { %7082 = vmatmul.mubr.f32.vlgmr.msra.gmra.mrb[16].mxu1 %v8111_v12  ;;  %7522 = vmatprep.subr.bf16.mxu0 %v7833_v1 }
  0x42   : > { %7521 = vmatpush3.bf16.msra.mxu1 %v8095_v41  ;;  %7095 = vmatprep.mubr.msk.f32.mxu1 %vm7834_vm0, %v7835_v5  ;;  %v2569_v51 = vand.u32 4294901760, %v2568_v44 }
  0x43   : > { %7089 = vmatmul.mubr.f32.vlgmr.msra.gmra.mrb[18].mxu0 %v2012_v15  ;;  %7525 = vmatprep.subr.bf16.mxu1 %v7833_v1 }
  0x44   : > { %7524 = vmatpush3.bf16.msra.mxu0 %v8118_v16  ;;  %7102 = vmatprep.mubr.msk.f32.mxu0 %vm7834_vm0, %v7835_v5  ;;  %v8250_v53 = vpack.c.bf16 %v2569_v51, %v2562_v47  ;;  %v7837_v16 = vmov 1966171168  }
  0x45   : > { %7096 = vmatmul.mubr.f32.vlgmr.msra.gmra.mrb[18].mxu1 %v8146_v49  ;;  %7528 = vmatprep.subr.bf16.mxu0 %v7833_v1  ;;  %v1350_v17 = vunpack.c.l.s4 %v7837_v16 }
  0x46   : > { %7527 = vmatpush3.bf16.msra.mxu1 %v8081_v57  ;;  %7109 = vmatprep.mubr.msk.f32.mxu1 %vm7834_vm0, %v7835_v5 }
  0x47   : > { %7103 = vmatmul.mubr.f32.vlgmr.msra.gmra.mrb[20].mxu0 %v8168_v60  ;;  %7531 = vmatprep.subr.bf16.mxu1 %v7833_v1 }
  0x48   : > { %7530 = vmatpush3.bf16.msra.mxu0 %v8136_v21  ;;  %7116 = vmatprep.mubr.msk.f32.mxu0 %vm7834_vm0, %v7835_v5 }
  0x49   : > { %7110 = vmatmul.mubr.f32.vlgmr.msra.gmra.mrb[20].mxu1 %v2010_v0  ;;  %7534 = vmatprep.subr.bf16.mxu0 %v7833_v1 }
  0x4a   : > { %7533 = vmatpush3.bf16.msra.mxu1 %v8081_v57  ;;  %7123 = vmatprep.mubr.msk.f32.mxu1 %vm7834_vm0, %v7835_v5 }
  0x4b   : > { %7117 = vmatmul.mubr.f32.vlgmr.msra.gmra.mrb[22].mxu0 %v8146_v49  ;;  %7552 = vmatprep.subr.bf16.mxu1 %v7833_v1 }
  0x4c   : > { %7536 = vmatpush3.bf16.msra.mxu0 %v8237_v46  ;;  %7130 = vmatprep.mubr.msk.f32.mxu0 %vm7834_vm0, %v7835_v5 }
  0x4d   : > { %7124 = vmatmul.mubr.f32.vlgmr.msra.gmra.mrb[22].mxu1 %v8146_v49  ;;  %7537 = vmatprep.subr.bf16.mxu0 %v7833_v1  ;;  %v1351_v49 = vunpack.c.0.s8 %v1350_v17 }
  0x4e   : > { %7554 = vmatpush3.bf16.msra.mxu1 %v8237_v46  ;;  %7172 = vmatprep.mubr.msk.f32.mxu1 %vm7834_vm0, %v7835_v5 }
  0x4f   : > { %7131 = vmatmul.mubr.f32.vlgmr.msra.gmra.mrb[24].mxu0 %v2551_v52  ;;  %7555 = vmatprep.subr.bf16.mxu1 %v7833_v1  ;;  %v8296_v32 = vsub.s32 %v1351_v49, %v1353_v50 }
  0x50   : > { %7539 = vmatpush3.bf16.msra.mxu0 %v8250_v53  ;;  %7137 = vmatprep.mubr.msk.f32.mxu0 %vm7834_vm0, %v7835_v5 }
  0x51   : > { %7540 = vmatprep.subr.bf16.mxu0 %v7833_v1 }
  0x57   : > { %7138 = vmatmul.mubr.f32.vlgmr.msra.gmra.mrb[24].mxu0 %v8197_v14 }
  0x58   : > { %7542 = vmatpush3.bf16.msra.mxu0 %v8265_v54  ;;  %7144 = vmatprep.mubr.msk.f32.mxu0 %vm7834_vm0, %v7835_v5 }
  0x59   : > { %7543 = vmatprep.subr.bf16.mxu0 %v7833_v1 }
  0x5f   : > { %7145 = vmatmul.mubr.f32.vlgmr.msra.gmra.mrb[24].mxu0 %v2548_v37 }
  0x60   : > { %7545 = vmatpush3.bf16.msra.mxu0 %v8237_v46  ;;  %7151 = vmatprep.mubr.msk.f32.mxu0 %vm7834_vm0, %v7835_v5 }
  0x61   : > { %7546 = vmatprep.subr.bf16.mxu0 %v7833_v1 }
  0x67   : > { %7152 = vmatmul.mubr.f32.vlgmr.msra.gmra.mrb[24].mxu0 %v2549_v39 }
  0x68   : > { %7548 = vmatpush3.bf16.msra.mxu0 %v8276_v55  ;;  %7158 = vmatprep.mubr.msk.f32.mxu0 %vm7834_vm0, %v7835_v5 }
  0x69   : > { %7549 = vmatprep.subr.bf16.mxu0 %v7833_v1 }
  0x6f   : > { %7159 = vmatmul.mubr.f32.vlgmr.msra.gmra.mrb[24].mxu0 %v8197_v14 }
  0x70   : > { %7551 = vmatpush3.bf16.msra.mxu0 %v8237_v46  ;;  %7165 = vmatprep.mubr.msk.f32.mxu0 %vm7834_vm0, %v7835_v5 }
  0x71   : > { %7570 = vmatprep.subr.bf16.mxu0 %v7833_v1 }
  0x77   : > { %7166 = vmatmul.mubr.f32.vlgmr.msra.gmra.mrb[24].mxu0 %v8197_v14 }
  0x78   : > { %7572 = vmatpush3.bf16.msra.mxu0 %v8237_v46  ;;  %7214 = vmatprep.mubr.msk.f32.mxu0 %vm7834_vm0, %v7835_v5 }
  0x79   : > { %7573 = vmatprep.subr.bf16.mxu0 %v7833_v1 }
  0xee   : > { %v471_v56 = vpop.f32.mrb[0].mxu0 }
  0xef   : > { %v6964_v59 = vpop.f32.mrb[1].mxu0 }
  0xf2   : > { %v628_v63 = vpop.f32.mrb[2].mxu0 }
  0xf3   : > { %v6978_v31 = vpop.f32.mrb[3].mxu0 }
  0xf4   : > { %v552_v57 = vpop.f32.mrb[0].mxu1 }
  0xf5   : > { %v553_v61 = vadd.f32 %v552_v57, %v471_v56  ;;  %v6971_v62 = vpop.f32.mrb[1].mxu1 }
  0xf6   : > { %v780_v3 = vpop.f32.mrb[4].mxu0 }
  0xf7   : > { %v629_v24 = vadd.f32 %v628_v63, %v553_v61  ;;  %v6992_v48 = vpop.f32.mrb[5].mxu0 }
  0xf8   : > { %v703_v2 = vpop.f32.mrb[2].mxu1 }
  0xf9   : > { %v6985_v34 = vpop.f32.mrb[3].mxu1  ;;  %v704_v41 = vadd.f32 %v703_v2, %v629_v24 }
  0xfb   : > { %v781_v6 = vadd.f32 %v780_v3, %v704_v41 }
  0xfc   : > { %v853_v4 = vpop.f32.mrb[4].mxu1 }
  0xfd   : > { %v6999_v58 = vpop.f32.mrb[5].mxu1  ;;  %v854_v7 = vadd.f32 %v853_v4, %v781_v6 }
  0xfe   : > { %v954_v8 = vpop.f32.mrb[6].mxu0 }
  0xff   : > { %v955_v10 = vadd.f32 %v954_v8, %v854_v7  ;;  %v7006_v11 = vpop.f32.mrb[7].mxu0 }
 0x100   : > { %v1035_v9 = vpop.f32.mrb[6].mxu1 }
 0x101   : > { %v7013_v12 = vpop.f32.mrb[7].mxu1  ;;  %v1036_v13 = vadd.f32 %v1035_v9, %v955_v10 }
 0x102   : > { %v1111_v18 = vpop.f32.mrb[8].mxu0 }
 0x103   : > { %v1112_v20 = vadd.f32 %v1111_v18, %v1036_v13  ;;  %v7020_v21 = vpop.f32.mrb[9].mxu0 }
 0x104   : > { %v1186_v19 = vpop.f32.mrb[8].mxu1 }
 0x105   : > { %v7027_v22 = vpop.f32.mrb[9].mxu1  ;;  %v1187_v42 = vadd.f32 %v1186_v19, %v1112_v20 }
 0x106   : > { %v1263_v60 = vpop.f32.mrb[10].mxu0 }
 0x107   : > { %v1264_v25 = vadd.f32 %v1263_v60, %v1187_v42  ;;  %v7034_v0 = vpop.f32.mrb[11].mxu0 }
 0x108   : > { %v1336_v23 = vpop.f32.mrb[10].mxu1 }
 0x109   : > { %v7041_v28 = vpop.f32.mrb[11].mxu1  ;;  %v1337_v30 = vadd.f32 %v1336_v23, %v1264_v25 }
 0x10a   : > { %v1531_v33 = vpop.f32.mrb[12].mxu0 }
 0x10b   : > { %v1346_v35 = vadd.f32 %v6711_v29, %v1337_v30  ;;  %v7048_v36 = vpop.f32.mrb[13].mxu0 }
 0x10c   : > { %v1612_v14 = vpop.f32.mrb[12].mxu1 }
 0x10d   : > { %v1613_v15 = vadd.f32 %v1612_v14, %v1531_v33  ;;  %v7055_v37 = vpop.f32.mrb[13].mxu1  ;;  %v1348_v38 = vcombine.high %v1346_v35, %v1346_v35  ;;  %v1355_v27 = vrot.slane %v1346_v35, %v8296_v32 }
 0x10e   : > { %v1688_v39 = vpop.f32.mrb[14].mxu0 }
 0x10f   : > { %v1362_v43 = vrot.slane %v1348_v38, %v8296_v32  ;;  %v1363_v44 = vcombine.high %v1355_v27, %v1355_v27  ;;  %v1371_v45 = vrot.slane %v1355_v27, %v8296_v32  ;;  %v1689_v47 = vadd.f32 %v1688_v39, %v1613_v15  ;;  %v7062_v51 = vpop.f32.mrb[15].mxu0  ;;  %v8328_v27 = vpop.permute.xlu0 %2951 }
 0x110   : > { %v1763_v52 = vpop.f32.mrb[14].mxu1 }
 0x111   : > { %v7069_v56 = vpop.f32.mrb[15].mxu1  ;;  %v1364_v57 = vcombine.high %v1362_v43, %v1362_v43  ;;  %v1378_v59 = vrot.slane %v1362_v43, %v8296_v32  ;;  %v1385_v61 = vrot.slane %v1363_v44, %v8296_v32  ;;  %v1393_v62 = vcombine.high %v1371_v45, %v1371_v45  ;;  %1406 = vst.msk [vmem:[#allocation2] sm:$0x1] %vm1405_vm9, %v1371_v45 }
 0x112   : > { %v1764_v63 = vadd.f32 %v1763_v52, %v1689_v47  ;;  %v1840_v2 = vpop.f32.mrb[16].mxu0 }
 0x113   : > { %v1392_v24 = vrot.slane %v1364_v57, %v8296_v32  ;;  %v1394_v31 = vcombine.high %v1378_v59, %v1378_v59  ;;  %v1395_v34 = vcombine.high %v1385_v61, %v1385_v61  ;;  %1407 = vst.msk [vmem:[#allocation2 + $0x2] sm:$0x1] %vm1405_vm9, %v1385_v61  ;;  %1408 = vst.msk [vmem:[#allocation2 + $0x4] sm:$0x1] %vm1405_vm9, %v1393_v62  ;;  %v7076_v41 = vpop.f32.mrb[17].mxu0 }
 0x114   : > { %1410 = vst.msk [vmem:[#allocation2 + $0x8] sm:$0x1] %vm1405_vm9, %v1378_v59  ;;  %v1913_v3 = vpop.f32.mrb[16].mxu1  ;;  %v1841_v4 = vadd.f32 %v1840_v2, %v1764_v63  ;;  %v8343_v57 = vld [vmem:[%s8729_s6] sm:$0x3]  ;;  %v2977_v59 = vstv %s8335_s30 }
 0x115   : > { %v7083_v6 = vpop.f32.mrb[17].mxu1  ;;  %v1396_v48 = vcombine.high %v1392_v24, %v1392_v24  ;;  %1409 = vst.msk [vmem:[#allocation2 + $0x6] sm:$0x1] %vm1405_vm9, %v1395_v34  ;;  %1411 = vst.msk [vmem:[#allocation2 + $0xa] sm:$0x1] %vm1405_vm9, %v1392_v24  ;;  %vm2978_vm10 = vcmp.lt.s32.totalorder %v2977_v59, %v8343_v57 }
 0x116   : > { %1412 = vst.msk [vmem:[#allocation2 + $0xc] sm:$0x1] %vm1405_vm9, %v1394_v31  ;;  %v1914_v58 = vadd.f32 %v1913_v3, %v1841_v4  ;;  %v2014_v7 = vpop.f32.mrb[18].mxu0 }
 0x117   : > { %1413 = vst.msk [vmem:[#allocation2 + $0xe] sm:$0x1] %vm1405_vm9, %v1396_v48  ;;  %v7090_v8 = vpop.f32.mrb[19].mxu0 }
 0x118   : > { %v2095_v9 = vpop.f32.mrb[18].mxu1  ;;  %v2015_v10 = vadd.f32 %v2014_v7, %v1914_v58 }
 0x119   : > { %v7097_v11 = vpop.f32.mrb[19].mxu1 }
 0x11a   : > { %v2096_v12 = vadd.f32 %v2095_v9, %v2015_v10  ;;  %v2171_v13 = vpop.f32.mrb[20].mxu0 }
 0x11b   : > { %v7104_v16 = vpop.f32.mrb[21].mxu0 }
 0x11c   : > { %v2246_v17 = vpop.f32.mrb[20].mxu1  ;;  %v2172_v40 = vadd.f32 %v2171_v13, %v2096_v12 }
 0x11d   : > { %v7111_v18 = vpop.f32.mrb[21].mxu1 }
 0x11e   : > { %v2247_v19 = vadd.f32 %v2246_v17, %v2172_v40  ;;  %v2323_v20 = vpop.f32.mrb[22].mxu0  ;;  %v3488_v40 = vstv %s8384_s16 }
 0x11f   : > { %v7118_v21 = vpop.f32.mrb[23].mxu0  ;;  %vm3489_vm12 = vcmp.lt.s32.totalorder %v3488_v40, %v8343_v57 }
 0x120   : > { %v2396_v22 = vpop.f32.mrb[22].mxu1  ;;  %v2324_v42 = vadd.f32 %v2323_v20, %v2247_v19 }
 0x121   : > { %v7125_v49 = vpop.f32.mrb[23].mxu1 }
 0x122   : > { %v2397_v50 = vadd.f32 %v2396_v22, %v2324_v42 }
 0x124   : > { %v2400_v60 = vadd.f32 %v6711_v29, %v2397_v50 }
 0x126   : > { %v2402_v23 = vcombine.high %v2400_v60, %v2400_v60  ;;  %v2409_v25 = vrot.slane %v2400_v60, %v8296_v32 }
 0x128   : > { %v2416_v0 = vrot.slane %v2402_v23, %v8296_v32  ;;  %v2417_v28 = vcombine.high %v2409_v25, %v2409_v25  ;;  %v2425_v30 = vrot.slane %v2409_v25, %v8296_v32 }
 0x12a   : > { %v2418_v33 = vcombine.high %v2416_v0, %v2416_v0  ;;  %v2432_v14 = vrot.slane %v2416_v0, %v8296_v32  ;;  %v2439_v35 = vrot.slane %v2417_v28, %v8296_v32  ;;  %v2447_v36 = vcombine.high %v2425_v30, %v2425_v30  ;;  %2459 = vst.msk [vmem:[#allocation2 + $0x1] sm:$0x1] %vm1405_vm9, %v2425_v30 }
 0x12c   : > { %v2446_v15 = vrot.slane %v2418_v33, %v8296_v32  ;;  %v2448_v37 = vcombine.high %v2432_v14, %v2432_v14  ;;  %v2449_v29 = vcombine.high %v2439_v35, %v2439_v35  ;;  %2460 = vst.msk [vmem:[#allocation2 + $0x3] sm:$0x1] %vm1405_vm9, %v2439_v35  ;;  %2461 = vst.msk [vmem:[#allocation2 + $0x5] sm:$0x1] %vm1405_vm9, %v2447_v36  ;;  %v7838_v32 = vmov 0  }
 0x12d   : > { %2463 = vst.msk [vmem:[#allocation2 + $0x9] sm:$0x1] %vm1405_vm9, %v2432_v14  ;;  %7775 = vset.pattern.permute.xlu1 %v7838_v32  ;;  %7776 = vset.pattern.permute.xlu0 %v7838_v32  ;;  %v2979_v2 = vsel %vm2978_vm10, 1, %v7838_v32  ;;  %v3490_v21 = vsel %vm3489_vm12, 1, %v7838_v32 }
 0x12e   : > { %v2450_v38 = vcombine.high %v2446_v15, %v2446_v15  ;;  %2462 = vst.msk [vmem:[#allocation2 + $0x7] sm:$0x1] %vm1405_vm9, %v2449_v29  ;;  %2464 = vst.msk [vmem:[#allocation2 + $0xb] sm:$0x1] %vm1405_vm9, %v2446_v15 }
 0x12f   : > { %2465 = vst.msk [vmem:[#allocation2 + $0xd] sm:$0x1] %vm1405_vm9, %v2448_v37 }
 0x130   : > { %2466 = vst.msk [vmem:[#allocation2 + $0xf] sm:$0x1] %vm1405_vm9, %v2450_v38 }
 0x137   : > { %v2476_v45 = vld [vmem:[%s2475_s9] sm:$0x3]  ;;  %s6729_s9 = sshll.u32 %s8525_s28, 1 }
 0x138   : > { %v2996_v22 = vld [vmem:[%s2995_s18] sm:$0x3]  ;;  %s4525_s10 = scalar_lea.vmem [#allocation2], %s6729_s9 }
 0x14a   : > { %v2935_v39 = vpop.f32.mrb[24].mxu0 }
 0x14b   : > { %v2954_v43 = vadd.f32 %v8328_v27, %v2935_v39  ;;  %v7167_v44 = vpop.f32.mrb[25].mxu0  ;;  %v2939_v47 = vadd.f32 %v2935_v39, %v2476_v45 }
 0x14d   : > { %2956 = vrot.lane.b32.xlu0 %v2954_v43, %s7839_s29  ;;  %v6721_v51 = vmul.f32 -1.442695, %v2939_v47 }
 0x14f   : > { %7777 = vpow2.f32 %v6721_v51 }
 0x159   : > { %v7778_v52 = vpop.eup %7777 }
 0x15a   : > { %v2943_v56 = vadd.f32 1.0, %v7778_v52 }
 0x15c   : > { %7779 = vrcp.f32 %v2943_v56 }
 0x166   : > { %v7780_v61 = vpop.eup %7779 }
 0x167   : > { %v2966_v4 = vsub.f32 1.0, %v7780_v61 }
 0x1bf   : > { %v2957_v62 = vpop.permute.xlu0 %2956 }
 0x1c0   : > { %v2959_v63 = vmul.f32 %v7780_v61, %v2957_v62 }
 0x1c2   : > { %2961 = vrot.lane.b32.xlu1 %v2959_v63, %s7836_s23  ;;  %v3506_v63 = vld [vmem:[%s3505_s21] sm:$0x3]  ;;  %s8614_s21 = scalar_select %p2471_p4, 1, 6 }
 0x1c6   : > { %2981 = vperm.xlu1 %7775, %v2979_v2  }
 0x1ca   : > { %2972 = vrot.lane.b32.xlu1 %v8175_v26, %s7840_s14  ;;  %s8732_s14 = sshll.u32 %s8572_s13, 1 }
 0x1cb   : > { %s5035_s18 = scalar_lea.vmem [#allocation2], %s8732_s14  ;;  %s8677_s14 = scalar_lea.vmem %s8730_s7, %s6740_s12 }
 0x1cc   : > { %s3501_s11 = scalar_lea.vmem %s8677_s14, %s6723_s17  ;;  %s4011_s12 = scalar_lea.vmem %s8677_s14, %s6725_s20 }
 0x1cd   : > { %s5031_s30 = scalar_lea.vmem %s8677_s14, %s6729_s9  ;;  %s8734_s17 = sshll.u32 %s8614_s21, 1 }
 0x234   : > { %v2962_v24 = vpop.permute.xlu1 %2961 }
 0x235   : > { %v2964_v31 = vadd.f32 %v2962_v24, %v2476_v45 }
 0x237   : > { %7781 = vtanh.f32 %v2964_v31 }
 0x241   : > { %v7782_v34 = vpop.eup %7781 }
 0x242   : > { %2968 = vrot.lane.b32.xlu0 %v7782_v34, %s7841_s15 }
 0x245   : > { %v2982_v41 = vpop.permute.xlu1 %2981 }
 0x246   : > { %vm2983_vm11 = vcmp.eq.s32.totalorder %v2982_v41, 1  ;;  %v3998_v41 = vstv %s8433_s19  ;;  %s6051_s19 = scalar_lea.vmem %s8677_s14, %s8734_s17 }
 0x247   : > { %vm3999_vm14 = vcmp.lt.s32.totalorder %v3998_v41, %v8343_v57 }
 0x249   : > { %v2973_v3 = vpop.permute.xlu1 %2972 }
 0x24a   : > { %v2975_v48 = vmul.f32 %v7780_v61, %v2973_v3 }
 0x2b4   : > { %v2969_v6 = vpop.permute.xlu0 %2968 }
 0x2b5   : > { %v2971_v58 = vmul.f32 %v2969_v6, %v2966_v4 }
 0x2b7   : > { %v2976_v7 = vadd.f32 %v2975_v48, %v2971_v58 }
 0x2b9   : > { %v8351_v8 = vsel %vm2983_vm11, %v2976_v7, %v2973_v3  ;;  %v8353_v9 = vsel %vm2983_vm11, %v2976_v7, 0.0  ;;  %v4000_v3 = vsel %vm3999_vm14, 1, %v7838_v32 }
 0x2ba   : > { %2998 = vrot.lane.b32.xlu0 %v8351_v8, %s7841_s15 }
 0x32c   : > { %v2999_v26 = vpop.permute.xlu0 %2998 }
 0x32d   : > { %v3000_v10 = vsel %vm395_vm8, %v2999_v26, 0 }
 0x32e   : > { %v3069_v11 = vand.u32 4294901760, %v3000_v10 }
 0x330   : > { %v3070_v12 = vsub.f32 %v3000_v10, %v3069_v11 }
 0x332   : > { %v3071_v13 = vand.u32 4294901760, %v3070_v12 }
 0x334   : > { %v3072_v16 = vsub.f32 %v3070_v12, %v3071_v13 }
 0x336   : > { %v3073_v17 = vand.u32 4294901760, %v3072_v16 }
 0x338   : > { %7173 = vmatmul.mubr.f32.vlgmr.msra.gmra.mrb[24].mxu1 %v3073_v17 }
 0x339   : > { %7557 = vmatpush3.bf16.msra.mxu1 %v8250_v53  ;;  %7179 = vmatprep.mubr.msk.f32.mxu1 %vm7834_vm0, %v7835_v5 }
 0x33a   : > { %7558 = vmatprep.subr.bf16.mxu1 %v7833_v1 }
 0x340   : > { %7180 = vmatmul.mubr.f32.vlgmr.msra.gmra.mrb[24].mxu1 %v3069_v11 }
 0x341   : > { %7560 = vmatpush3.bf16.msra.mxu1 %v8265_v54  ;;  %7186 = vmatprep.mubr.msk.f32.mxu1 %vm7834_vm0, %v7835_v5 }
 0x342   : > { %7561 = vmatprep.subr.bf16.mxu1 %v7833_v1 }
 0x348   : > { %7187 = vmatmul.mubr.f32.vlgmr.msra.gmra.mrb[24].mxu1 %v3070_v12 }
 0x349   : > { %7563 = vmatpush3.bf16.msra.mxu1 %v8237_v46  ;;  %7193 = vmatprep.mubr.msk.f32.mxu1 %vm7834_vm0, %v7835_v5 }
 0x34a   : > { %7564 = vmatprep.subr.bf16.mxu1 %v7833_v1 }
 0x350   : > { %7194 = vmatmul.mubr.f32.vlgmr.msra.gmra.mrb[24].mxu1 %v3071_v13 }
 0x351   : > { %7566 = vmatpush3.bf16.msra.mxu1 %v8276_v55  ;;  %7200 = vmatprep.mubr.msk.f32.mxu1 %vm7834_vm0, %v7835_v5 }
 0x352   : > { %7567 = vmatprep.subr.bf16.mxu1 %v7833_v1 }
 0x358   : > { %7201 = vmatmul.mubr.f32.vlgmr.msra.gmra.mrb[24].mxu1 %v3069_v11 }
 0x359   : > { %7569 = vmatpush3.bf16.msra.mxu1 %v8237_v46  ;;  %7207 = vmatprep.mubr.msk.f32.mxu1 %vm7834_vm0, %v7835_v5 }
 0x35a   : > { %7588 = vmatprep.subr.bf16.mxu1 %v7833_v1 }
 0x360   : > { %7208 = vmatmul.mubr.f32.vlgmr.msra.gmra.mrb[24].mxu1 %v3069_v11 }
 0x361   : > { %7590 = vmatpush3.bf16.msra.mxu1 %v8237_v46  ;;  %7256 = vmatprep.mubr.msk.f32.mxu1 %vm7834_vm0, %v7835_v5 }
 0x362   : > { %7591 = vmatprep.subr.bf16.mxu1 %v7833_v1 }
 0x433   : > { %v3457_v18 = vpop.f32.mrb[24].mxu1 }
 0x434   : > { %v3468_v19 = vadd.f32 %v3457_v18, %v8328_v27  ;;  %v7209_v20 = vpop.f32.mrb[25].mxu1  ;;  %v3461_v42 = vadd.f32 %v3457_v18, %v2996_v22 }
 0x436   : > { %3470 = vrot.lane.b32.xlu1 %v3468_v19, %s7839_s29  ;;  %v6724_v49 = vmul.f32 -1.442695, %v3461_v42 }
 0x438   : > { %7783 = vpow2.f32 %v6724_v49 }
 0x43a   : > { %3492 = vperm.xlu1 %7775, %v3490_v21  }
 0x442   : > { %v7784_v50 = vpop.eup %7783 }
 0x443   : > { %v3465_v60 = vadd.f32 1.0, %v7784_v50  ;;  %v4508_v50 = vstv %s8478_s22 }
 0x444   : > { %vm4509_vm1 = vcmp.lt.s32.totalorder %v4508_v50, %v8343_v57 }
 0x445   : > { %7785 = vrcp.f32 %v3465_v60 }
 0x44f   : > { %v7786_v23 = vpop.eup %7785 }
 0x450   : > { %v3480_v14 = vsub.f32 1.0, %v7786_v23  ;;  %v3486_v15 = vmul.f32 %v7786_v23, %v8351_v8 }
 0x4a8   : > { %v3471_v25 = vpop.permute.xlu1 %3470 }
 0x4a9   : > { %v3473_v0 = vmul.f32 %v7786_v23, %v3471_v25 }
 0x4ab   : > { %3475 = vrot.lane.b32.xlu0 %v3473_v0, %s7836_s23  ;;  %v4510_v0 = vsel %vm4509_vm1, 1, %v7838_v32 }
 0x4b9   : > { %v3493_v36 = vpop.permute.xlu1 %3492 }
 0x4ba   : > { %vm3494_vm13 = vcmp.eq.s32.totalorder %v3493_v36, 1 }
 0x51d   : > { %v3476_v28 = vpop.permute.xlu0 %3475 }
 0x51e   : > { %v3478_v30 = vadd.f32 %v3476_v28, %v2996_v22  ;;  %v4016_v28 = vld [vmem:[%s4015_s27] sm:$0x3]  ;;  %s8731_s27 = sshll.u32 %s8614_s21, 1 }
 0x520   : > { %7787 = vtanh.f32 %v3478_v30 }
 0x52a   : > { %v7788_v33 = vpop.eup %7787 }
 0x52b   : > { %3482 = vrot.lane.b32.xlu0 %v7788_v33, %s7841_s15 }
 0x59d   : > { %v3483_v35 = vpop.permute.xlu0 %3482 }
 0x59e   : > { %v3485_v37 = vmul.f32 %v3483_v35, %v3480_v14 }
 0x5a0   : > { %v3487_v29 = vadd.f32 %v3486_v15, %v3485_v37 }
 0x5a2   : > { %v8398_v38 = vsel %vm3494_vm13, %v3487_v29, %v8351_v8  ;;  %v8400_v39 = vsel %vm3494_vm13, %v3487_v29, 0.0 }
 0x5a3   : > { %3508 = vrot.lane.b32.xlu1 %v8398_v38, %s7841_s15 }
 0x615   : > { %v3509_v43 = vpop.permute.xlu1 %3508 }
 0x616   : > { %v3510_v44 = vsel %vm395_vm8, %v3509_v43, 0 }
 0x617   : > { %v3579_v45 = vand.u32 4294901760, %v3510_v44 }
 0x619   : > { %v3580_v47 = vsub.f32 %v3510_v44, %v3579_v45 }
 0x61b   : > { %v3581_v51 = vand.u32 4294901760, %v3580_v47 }
 0x61d   : > { %v3582_v52 = vsub.f32 %v3580_v47, %v3581_v51 }
 0x61f   : > { %v3583_v56 = vand.u32 4294901760, %v3582_v52 }
 0x621   : > { %7215 = vmatmul.mubr.f32.vlgmr.msra.gmra.mrb[26].mxu0 %v3583_v56 }
 0x622   : > { %7575 = vmatpush3.bf16.msra.mxu0 %v8250_v53  ;;  %7221 = vmatprep.mubr.msk.f32.mxu0 %vm7834_vm0, %v7835_v5 }
 0x623   : > { %7576 = vmatprep.subr.bf16.mxu0 %v7833_v1 }
 0x629   : > { %7222 = vmatmul.mubr.f32.vlgmr.msra.gmra.mrb[26].mxu0 %v3579_v45 }
 0x62a   : > { %7578 = vmatpush3.bf16.msra.mxu0 %v8265_v54  ;;  %7228 = vmatprep.mubr.msk.f32.mxu0 %vm7834_vm0, %v7835_v5 }
 0x62b   : > { %7579 = vmatprep.subr.bf16.mxu0 %v7833_v1 }
 0x631   : > { %7229 = vmatmul.mubr.f32.vlgmr.msra.gmra.mrb[26].mxu0 %v3580_v47 }
 0x632   : > { %7581 = vmatpush3.bf16.msra.mxu0 %v8237_v46  ;;  %7235 = vmatprep.mubr.msk.f32.mxu0 %vm7834_vm0, %v7835_v5 }
 0x633   : > { %7582 = vmatprep.subr.bf16.mxu0 %v7833_v1 }
 0x639   : > { %7236 = vmatmul.mubr.f32.vlgmr.msra.gmra.mrb[26].mxu0 %v3581_v51 }
 0x63a   : > { %7584 = vmatpush3.bf16.msra.mxu0 %v8276_v55  ;;  %7242 = vmatprep.mubr.msk.f32.mxu0 %vm7834_vm0, %v7835_v5 }
 0x63b   : > { %7585 = vmatprep.subr.bf16.mxu0 %v7833_v1 }
 0x641   : > { %7243 = vmatmul.mubr.f32.vlgmr.msra.gmra.mrb[26].mxu0 %v3579_v45 }
 0x642   : > { %7587 = vmatpush3.bf16.msra.mxu0 %v8237_v46  ;;  %7249 = vmatprep.mubr.msk.f32.mxu0 %vm7834_vm0, %v7835_v5 }
 0x643   : > { %7606 = vmatprep.subr.bf16.mxu0 %v7833_v1 }
 0x649   : > { %7250 = vmatmul.mubr.f32.vlgmr.msra.gmra.mrb[26].mxu0 %v3579_v45 }
 0x64a   : > { %7608 = vmatpush3.bf16.msra.mxu0 %v8237_v46  ;;  %7298 = vmatprep.mubr.msk.f32.mxu0 %vm7834_vm0, %v7835_v5 }
 0x64b   : > { %7609 = vmatprep.subr.bf16.mxu0 %v7833_v1 }
 0x71c   : > { %v3967_v59 = vpop.f32.mrb[26].mxu0 }
 0x71d   : > { %v3978_v61 = vadd.f32 %v3967_v59, %v8328_v27  ;;  %v7251_v62 = vpop.f32.mrb[27].mxu0  ;;  %v3971_v2 = vadd.f32 %v3967_v59, %v3506_v63 }
 0x71f   : > { %3980 = vrot.lane.b32.xlu0 %v3978_v61, %s7839_s29  ;;  %v6726_v24 = vmul.f32 -1.442695, %v3971_v2 }
 0x721   : > { %7789 = vpow2.f32 %v6726_v24 }
 0x723   : > { %4002 = vperm.xlu0 %7776, %v4000_v3   ;;  %v5018_v3 = vstv %s8525_s28 }
 0x724   : > { %vm5019_vm3 = vcmp.lt.s32.totalorder %v5018_v3, %v8343_v57 }
 0x72b   : > { %v7790_v31 = vpop.eup %7789 }
 0x72c   : > { %v3975_v34 = vadd.f32 1.0, %v7790_v31 }
 0x72e   : > { %7791 = vrcp.f32 %v3975_v34 }
 0x738   : > { %v7792_v4 = vpop.eup %7791 }
 0x739   : > { %v3990_v26 = vsub.f32 1.0, %v7792_v4  ;;  %v3996_v12 = vmul.f32 %v7792_v4, %v8398_v38 }
 0x791   : > { %v3981_v6 = vpop.permute.xlu0 %3980 }
 0x792   : > { %v3983_v48 = vmul.f32 %v7792_v4, %v3981_v6 }
 0x794   : > { %3985 = vrot.lane.b32.xlu1 %v3983_v48, %s7836_s23 }
 0x7a2   : > { %v4003_v10 = vpop.permute.xlu0 %4002 }
 0x7a3   : > { %vm4004_vm15 = vcmp.eq.s32.totalorder %v4003_v10, 1 }
 0x806   : > { %v3986_v58 = vpop.permute.xlu1 %3985 }
 0x807   : > { %v3988_v7 = vadd.f32 %v3986_v58, %v3506_v63  ;;  %v5020_v58 = vsel %vm5019_vm3, 1, %v7838_v32 }
 0x809   : > { %7793 = vtanh.f32 %v3988_v7  ;;  %v4526_v7 = vld [vmem:[%s4525_s10] sm:$0x3]  ;;  %s5545_s10 = scalar_lea.vmem [#allocation2], %s8731_s27 }
 0x813   : > { %v7794_v8 = vpop.eup %7793 }
 0x814   : > { %3992 = vrot.lane.b32.xlu1 %v7794_v8, %s7841_s15 }
 0x886   : > { %v3993_v11 = vpop.permute.xlu1 %3992 }
 0x887   : > { %v3995_v13 = vmul.f32 %v3993_v11, %v3990_v26 }
 0x889   : > { %v3997_v16 = vadd.f32 %v3996_v12, %v3995_v13 }
 0x88b   : > { %v8444_v17 = vsel %vm4004_vm15, %v3997_v16, 0.0  ;;  %v8447_v40 = vsel %vm4004_vm15, %v3997_v16, %v8398_v38 }
 0x88c   : > { %4018 = vrot.lane.b32.xlu1 %v8447_v40, %s7841_s15 }
 0x8fe   : > { %v4019_v18 = vpop.permute.xlu1 %4018 }
 0x8ff   : > { %v4020_v19 = vsel %vm395_vm8, %v4019_v18, 0 }
 0x900   : > { %v4089_v20 = vand.u32 4294901760, %v4020_v19 }
 0x902   : > { %v4090_v21 = vsub.f32 %v4020_v19, %v4089_v20 }
 0x904   : > { %v4091_v22 = vand.u32 4294901760, %v4090_v21 }
 0x906   : > { %v4092_v42 = vsub.f32 %v4090_v21, %v4091_v22 }
 0x908   : > { %v4093_v49 = vand.u32 4294901760, %v4092_v42 }
 0x90a   : > { %7257 = vmatmul.mubr.f32.vlgmr.msra.gmra.mrb[26].mxu1 %v4093_v49 }
 0x90b   : > { %7593 = vmatpush3.bf16.msra.mxu1 %v8250_v53  ;;  %7263 = vmatprep.mubr.msk.f32.mxu1 %vm7834_vm0, %v7835_v5 }
 0x90c   : > { %7594 = vmatprep.subr.bf16.mxu1 %v7833_v1 }
 0x912   : > { %7264 = vmatmul.mubr.f32.vlgmr.msra.gmra.mrb[26].mxu1 %v4089_v20 }
 0x913   : > { %7596 = vmatpush3.bf16.msra.mxu1 %v8265_v54  ;;  %7270 = vmatprep.mubr.msk.f32.mxu1 %vm7834_vm0, %v7835_v5 }
 0x914   : > { %7597 = vmatprep.subr.bf16.mxu1 %v7833_v1 }
 0x91a   : > { %7271 = vmatmul.mubr.f32.vlgmr.msra.gmra.mrb[26].mxu1 %v4090_v21 }
 0x91b   : > { %7599 = vmatpush3.bf16.msra.mxu1 %v8237_v46  ;;  %7277 = vmatprep.mubr.msk.f32.mxu1 %vm7834_vm0, %v7835_v5 }
 0x91c   : > { %7600 = vmatprep.subr.bf16.mxu1 %v7833_v1 }
 0x922   : > { %7278 = vmatmul.mubr.f32.vlgmr.msra.gmra.mrb[26].mxu1 %v4091_v22 }
 0x923   : > { %7602 = vmatpush3.bf16.msra.mxu1 %v8276_v55  ;;  %7284 = vmatprep.mubr.msk.f32.mxu1 %vm7834_vm0, %v7835_v5 }
 0x924   : > { %7603 = vmatprep.subr.bf16.mxu1 %v7833_v1 }
 0x92a   : > { %7285 = vmatmul.mubr.f32.vlgmr.msra.gmra.mrb[26].mxu1 %v4089_v20 }
 0x92b   : > { %7605 = vmatpush3.bf16.msra.mxu1 %v8237_v46  ;;  %7291 = vmatprep.mubr.msk.f32.mxu1 %vm7834_vm0, %v7835_v5 }
 0x92c   : > { %7624 = vmatprep.subr.bf16.mxu1 %v7833_v1 }
 0x932   : > { %7292 = vmatmul.mubr.f32.vlgmr.msra.gmra.mrb[26].mxu1 %v4089_v20 }
 0x933   : > { %7626 = vmatpush3.bf16.msra.mxu1 %v8237_v46  ;;  %7340 = vmatprep.mubr.msk.f32.mxu1 %vm7834_vm0, %v7835_v5 }
 0x934   : > { %7627 = vmatprep.subr.bf16.mxu1 %v7833_v1 }
 0xa05   : > { %v4477_v60 = vpop.f32.mrb[26].mxu1 }
 0xa06   : > { %v4488_v23 = vadd.f32 %v4477_v60, %v8328_v27  ;;  %v7293_v25 = vpop.f32.mrb[27].mxu1  ;;  %v4481_v30 = vadd.f32 %v4477_v60, %v4016_v28 }
 0xa08   : > { %4490 = vrot.lane.b32.xlu0 %v4488_v23, %s7839_s29  ;;  %v6728_v33 = vmul.f32 -1.442695, %v4481_v30 }
 0xa0a   : > { %7795 = vpow2.f32 %v6728_v33 }
 0xa0c   : > { %4512 = vperm.xlu0 %7776, %v4510_v0  }
 0xa14   : > { %v7796_v14 = vpop.eup %7795 }
 0xa15   : > { %v4485_v35 = vadd.f32 1.0, %v7796_v14 }
 0xa17   : > { %7797 = vrcp.f32 %v4485_v35 }
 0xa21   : > { %v7798_v36 = vpop.eup %7797 }
 0xa22   : > { %v4500_v44 = vsub.f32 1.0, %v7798_v36  ;;  %v4506_v51 = vmul.f32 %v7798_v36, %v8447_v40 }
 0xa7a   : > { %v4491_v15 = vpop.permute.xlu0 %4490 }
 0xa7b   : > { %v4493_v37 = vmul.f32 %v7798_v36, %v4491_v15  ;;  %v5528_v36 = vstv %s8572_s13 }
 0xa7c   : > { %vm5529_vm5 = vcmp.lt.s32.totalorder %v5528_v36, %v8343_v57 }
 0xa7d   : > { %4495 = vrot.lane.b32.xlu1 %v4493_v37, %s7836_s23 }
 0xa8b   : > { %v4513_v47 = vpop.permute.xlu0 %4512 }
 0xa8c   : > { %vm4514_vm2 = vcmp.eq.s32.totalorder %v4513_v47, 1 }
 0xaef   : > { %v4496_v29 = vpop.permute.xlu1 %4495 }
 0xaf0   : > { %v4498_v38 = vadd.f32 %v4496_v29, %v4016_v28 }
 0xaf2   : > { %7799 = vtanh.f32 %v4498_v38  ;;  %v5530_v38 = vsel %vm5529_vm5, 1, %v7838_v32 }
 0xafc   : > { %v7800_v43 = vpop.eup %7799 }
 0xafd   : > { %4502 = vrot.lane.b32.xlu1 %v7800_v43, %s7841_s15  ;;  %v5036_v43 = vld [vmem:[%s5035_s18] sm:$0x3]  ;;  %s8654_s18 = scalar_select %p2471_p4, 0, 7 }
 0xaff   : > { %s6735_s25 = sshll.u32 %s8654_s18, 1 }
 0xb6f   : > { %v4503_v45 = vpop.permute.xlu1 %4502 }
 0xb70   : > { %v4505_v52 = vmul.f32 %v4503_v45, %v4500_v44 }
 0xb72   : > { %v4507_v56 = vadd.f32 %v4506_v51, %v4505_v52 }
 0xb74   : > { %v8492_v59 = vsel %vm4514_vm2, %v4507_v56, %v8447_v40  ;;  %v8494_v61 = vsel %vm4514_vm2, %v4507_v56, 0.0 }
 0xb75   : > { %4528 = vrot.lane.b32.xlu0 %v8492_v59, %s7841_s15 }
 0xbe7   : > { %v4529_v62 = vpop.permute.xlu0 %4528 }
 0xbe8   : > { %v4530_v63 = vsel %vm395_vm8, %v4529_v62, 0 }
 0xbe9   : > { %v4599_v2 = vand.u32 4294901760, %v4530_v63 }
 0xbeb   : > { %v4600_v24 = vsub.f32 %v4530_v63, %v4599_v2 }
 0xbed   : > { %v4601_v31 = vand.u32 4294901760, %v4600_v24 }
 0xbef   : > { %v4602_v34 = vsub.f32 %v4600_v24, %v4601_v31 }
 0xbf1   : > { %v4603_v41 = vand.u32 4294901760, %v4602_v34 }
 0xbf3   : > { %7299 = vmatmul.mubr.f32.vlgmr.msra.gmra.mrb[28].mxu0 %v4603_v41 }
 0xbf4   : > { %7611 = vmatpush3.bf16.msra.mxu0 %v8250_v53  ;;  %7305 = vmatprep.mubr.msk.f32.mxu0 %vm7834_vm0, %v7835_v5 }
 0xbf5   : > { %7612 = vmatprep.subr.bf16.mxu0 %v7833_v1 }
 0xbfb   : > { %7306 = vmatmul.mubr.f32.vlgmr.msra.gmra.mrb[28].mxu0 %v4599_v2 }
 0xbfc   : > { %7614 = vmatpush3.bf16.msra.mxu0 %v8265_v54  ;;  %7312 = vmatprep.mubr.msk.f32.mxu0 %vm7834_vm0, %v7835_v5 }
 0xbfd   : > { %7615 = vmatprep.subr.bf16.mxu0 %v7833_v1 }
 0xc03   : > { %7313 = vmatmul.mubr.f32.vlgmr.msra.gmra.mrb[28].mxu0 %v4600_v24 }
 0xc04   : > { %7617 = vmatpush3.bf16.msra.mxu0 %v8237_v46  ;;  %7319 = vmatprep.mubr.msk.f32.mxu0 %vm7834_vm0, %v7835_v5 }
 0xc05   : > { %7618 = vmatprep.subr.bf16.mxu0 %v7833_v1 }
 0xc0b   : > { %7320 = vmatmul.mubr.f32.vlgmr.msra.gmra.mrb[28].mxu0 %v4601_v31 }
 0xc0c   : > { %7620 = vmatpush3.bf16.msra.mxu0 %v8276_v55  ;;  %7326 = vmatprep.mubr.msk.f32.mxu0 %vm7834_vm0, %v7835_v5 }
 0xc0d   : > { %7621 = vmatprep.subr.bf16.mxu0 %v7833_v1 }
 0xc13   : > { %7327 = vmatmul.mubr.f32.vlgmr.msra.gmra.mrb[28].mxu0 %v4599_v2 }
 0xc14   : > { %7623 = vmatpush3.bf16.msra.mxu0 %v8237_v46  ;;  %7333 = vmatprep.mubr.msk.f32.mxu0 %vm7834_vm0, %v7835_v5 }
 0xc15   : > { %7642 = vmatprep.subr.bf16.mxu0 %v7833_v1 }
 0xc1b   : > { %7334 = vmatmul.mubr.f32.vlgmr.msra.gmra.mrb[28].mxu0 %v4599_v2 }
 0xc1c   : > { %7644 = vmatpush3.bf16.msra.mxu0 %v8237_v46  ;;  %7382 = vmatprep.mubr.msk.f32.mxu0 %vm7834_vm0, %v7835_v5 }
 0xc1d   : > { %7645 = vmatprep.subr.bf16.mxu0 %v7833_v1 }
 0xcee   : > { %v4987_v4 = vpop.f32.mrb[28].mxu0 }
 0xcef   : > { %v4998_v6 = vadd.f32 %v4987_v4, %v8328_v27  ;;  %v7335_v48 = vpop.f32.mrb[29].mxu0  ;;  %v4991_v8 = vadd.f32 %v4987_v4, %v4526_v7 }
 0xcf1   : > { %5000 = vrot.lane.b32.xlu1 %v4998_v6, %s7839_s29  ;;  %v6730_v26 = vmul.f32 -1.442695, %v4991_v8 }
 0xcf3   : > { %7801 = vpow2.f32 %v6730_v26 }
 0xcf5   : > { %5022 = vperm.xlu1 %7775, %v5020_v58  }
 0xcfd   : > { %v7802_v10 = vpop.eup %7801 }
 0xcfe   : > { %v4995_v11 = vadd.f32 1.0, %v7802_v10 }
 0xd00   : > { %7803 = vrcp.f32 %v4995_v11 }
 0xd0a   : > { %v7804_v12 = vpop.eup %7803 }
 0xd0b   : > { %v5010_v20 = vsub.f32 1.0, %v7804_v12  ;;  %v5016_v42 = vmul.f32 %v7804_v12, %v8492_v59 }
 0xd63   : > { %v5001_v13 = vpop.permute.xlu1 %5000 }
 0xd64   : > { %v5003_v16 = vmul.f32 %v7804_v12, %v5001_v13  ;;  %v6038_v13 = vstv %s8614_s21 }
 0xd65   : > { %vm6039_vm7 = vcmp.lt.s32.totalorder %v6038_v13, %v8343_v57 }
 0xd66   : > { %5005 = vrot.lane.b32.xlu0 %v5003_v16, %s7836_s23 }
 0xd74   : > { %v5023_v22 = vpop.permute.xlu1 %5022 }
 0xd75   : > { %vm5024_vm4 = vcmp.eq.s32.totalorder %v5023_v22, 1 }
 0xdd8   : > { %v5006_v40 = vpop.permute.xlu0 %5005 }
 0xdd9   : > { %v5008_v18 = vadd.f32 %v5006_v40, %v4526_v7 }
 0xddb   : > { %7805 = vtanh.f32 %v5008_v18 }
 0xde5   : > { %v7806_v19 = vpop.eup %7805 }
 0xde6   : > { %5012 = vrot.lane.b32.xlu0 %v7806_v19, %s7841_s15  ;;  %v6040_v19 = vsel %vm6039_vm7, 1, %v7838_v32 }
 0xe58   : > { %v5013_v21 = vpop.permute.xlu0 %5012 }
 0xe59   : > { %v5015_v49 = vmul.f32 %v5013_v21, %v5010_v20  ;;  %v5546_v20 = vld [vmem:[%s5545_s10] sm:$0x3]  ;;  %s6055_s10 = scalar_lea.vmem [#allocation2], %s6735_s25 }
 0xe5b   : > { %v5017_v50 = vadd.f32 %v5016_v42, %v5015_v49 }
 0xe5d   : > { %v8539_v60 = vsel %vm5024_vm4, %v5017_v50, %v8492_v59  ;;  %v8541_v23 = vsel %vm5024_vm4, %v5017_v50, 0.0 }
 0xe5e   : > { %5038 = vrot.lane.b32.xlu1 %v8539_v60, %s7841_s15 }
 0xed0   : > { %v5039_v25 = vpop.permute.xlu1 %5038 }
 0xed1   : > { %v5040_v0 = vsel %vm395_vm8, %v5039_v25, 0 }
 0xed2   : > { %v5109_v28 = vand.u32 4294901760, %v5040_v0 }
 0xed4   : > { %v5110_v30 = vsub.f32 %v5040_v0, %v5109_v28 }
 0xed6   : > { %v5111_v33 = vand.u32 4294901760, %v5110_v30 }
 0xed8   : > { %v5112_v14 = vsub.f32 %v5110_v30, %v5111_v33 }
 0xeda   : > { %v5113_v35 = vand.u32 4294901760, %v5112_v14 }
 0xedc   : > { %7341 = vmatmul.mubr.f32.vlgmr.msra.gmra.mrb[28].mxu1 %v5113_v35 }
 0xedd   : > { %7629 = vmatpush3.bf16.msra.mxu1 %v8250_v53  ;;  %7347 = vmatprep.mubr.msk.f32.mxu1 %vm7834_vm0, %v7835_v5 }
 0xede   : > { %7630 = vmatprep.subr.bf16.mxu1 %v7833_v1 }
 0xee4   : > { %7348 = vmatmul.mubr.f32.vlgmr.msra.gmra.mrb[28].mxu1 %v5109_v28 }
 0xee5   : > { %7632 = vmatpush3.bf16.msra.mxu1 %v8265_v54  ;;  %7354 = vmatprep.mubr.msk.f32.mxu1 %vm7834_vm0, %v7835_v5 }
 0xee6   : > { %7633 = vmatprep.subr.bf16.mxu1 %v7833_v1 }
 0xeec   : > { %7355 = vmatmul.mubr.f32.vlgmr.msra.gmra.mrb[28].mxu1 %v5110_v30 }
 0xeed   : > { %7635 = vmatpush3.bf16.msra.mxu1 %v8237_v46  ;;  %7361 = vmatprep.mubr.msk.f32.mxu1 %vm7834_vm0, %v7835_v5 }
 0xeee   : > { %7636 = vmatprep.subr.bf16.mxu1 %v7833_v1 }
 0xef4   : > { %7362 = vmatmul.mubr.f32.vlgmr.msra.gmra.mrb[28].mxu1 %v5111_v33 }
 0xef5   : > { %7638 = vmatpush3.bf16.msra.mxu1 %v8276_v55  ;;  %7368 = vmatprep.mubr.msk.f32.mxu1 %vm7834_vm0, %v7835_v5 }
 0xef6   : > { %7639 = vmatprep.subr.bf16.mxu1 %v7833_v1 }
 0xefc   : > { %7369 = vmatmul.mubr.f32.vlgmr.msra.gmra.mrb[28].mxu1 %v5109_v28 }
 0xefd   : > { %7641 = vmatpush3.bf16.msra.mxu1 %v8237_v46  ;;  %7375 = vmatprep.mubr.msk.f32.mxu1 %vm7834_vm0, %v7835_v5 }
 0xefe   : > { %7660 = vmatprep.subr.bf16.mxu1 %v7833_v1 }
 0xf04   : > { %7376 = vmatmul.mubr.f32.vlgmr.msra.gmra.mrb[28].mxu1 %v5109_v28 }
 0xf05   : > { %7662 = vmatpush3.bf16.msra.mxu1 %v8237_v46  ;;  %7424 = vmatprep.mubr.msk.f32.mxu1 %vm7834_vm0, %v7835_v5 }
 0xf06   : > { %7663 = vmatprep.subr.bf16.mxu1 %v7833_v1 }
 0xfd7   : > { %v5497_v15 = vpop.f32.mrb[28].mxu1 }
 0xfd8   : > { %v5508_v37 = vadd.f32 %v5497_v15, %v8328_v27  ;;  %v7377_v29 = vpop.f32.mrb[29].mxu1  ;;  %v5501_v44 = vadd.f32 %v5497_v15, %v5036_v43 }
 0xfda   : > { %5510 = vrot.lane.b32.xlu0 %v5508_v37, %s7839_s29  ;;  %v6732_v45 = vmul.f32 -1.442695, %v5501_v44 }
 0xfdc   : > { %7807 = vpow2.f32 %v6732_v45 }
 0xfde   : > { %5532 = vperm.xlu0 %7776, %v5530_v38  }
 0xfe6   : > { %v7808_v47 = vpop.eup %7807 }
 0xfe7   : > { %v5505_v51 = vadd.f32 1.0, %v7808_v47 }
 0xfe9   : > { %7809 = vrcp.f32 %v5505_v51 }
 0xff3   : > { %v7810_v52 = vpop.eup %7809 }
 0xff4   : > { %v5520_v24 = vsub.f32 1.0, %v7810_v52  ;;  %v5526_v41 = vmul.f32 %v7810_v52, %v8539_v60 }
0x104c   : > { %v5511_v56 = vpop.permute.xlu0 %5510 }
0x104d   : > { %v5513_v59 = vmul.f32 %v7810_v52, %v5511_v56 }
0x104f   : > { %5515 = vrot.lane.b32.xlu1 %v5513_v59, %s7836_s23 }
0x105d   : > { %v5533_v34 = vpop.permute.xlu0 %5532 }
0x105e   : > { %vm5534_vm6 = vcmp.eq.s32.totalorder %v5533_v34, 1 }
0x10c1   : > { %v5516_v62 = vpop.permute.xlu1 %5515 }
0x10c2   : > { %v5518_v63 = vadd.f32 %v5516_v62, %v5036_v43 }
0x10c4   : > { %7811 = vtanh.f32 %v5518_v63 }
0x10ce   : > { %v7812_v2 = vpop.eup %7811 }
0x10cf   : > { %5522 = vrot.lane.b32.xlu1 %v7812_v2, %s7841_s15 }
0x1141   : > { %v5523_v31 = vpop.permute.xlu1 %5522 }
0x1142   : > { %v5525_v3 = vmul.f32 %v5523_v31, %v5520_v24 }
0x1144   : > { %v5527_v4 = vadd.f32 %v5526_v41, %v5525_v3 }
0x1146   : > { %v8586_v6 = vsel %vm5534_vm6, %v5527_v4, %v8539_v60  ;;  %v8588_v48 = vsel %vm5534_vm6, %v5527_v4, 0.0 }
0x1147   : > { %5548 = vrot.lane.b32.xlu0 %v8586_v6, %s7841_s15 }
0x11b9   : > { %v5549_v58 = vpop.permute.xlu0 %5548 }
0x11ba   : > { %v5550_v7 = vsel %vm395_vm8, %v5549_v58, 0 }
0x11bb   : > { %v5619_v8 = vand.u32 4294901760, %v5550_v7 }
0x11bd   : > { %v5620_v26 = vsub.f32 %v5550_v7, %v5619_v8 }
0x11bf   : > { %v5621_v10 = vand.u32 4294901760, %v5620_v26 }
0x11c1   : > { %v5622_v11 = vsub.f32 %v5620_v26, %v5621_v10 }
0x11c3   : > { %v5623_v12 = vand.u32 4294901760, %v5622_v11 }
0x11c5   : > { %7383 = vmatmul.mubr.f32.vlgmr.msra.gmra.mrb[30].mxu0 %v5623_v12 }
0x11c6   : > { %7647 = vmatpush3.bf16.msra.mxu0 %v8250_v53  ;;  %7389 = vmatprep.mubr.msk.f32.mxu0 %vm7834_vm0, %v7835_v5 }
0x11c7   : > { %7648 = vmatprep.subr.bf16.mxu0 %v7833_v1 }
0x11cd   : > { %7390 = vmatmul.mubr.f32.vlgmr.msra.gmra.mrb[30].mxu0 %v5619_v8 }
0x11ce   : > { %7650 = vmatpush3.bf16.msra.mxu0 %v8265_v54  ;;  %7396 = vmatprep.mubr.msk.f32.mxu0 %vm7834_vm0, %v7835_v5 }
0x11cf   : > { %7651 = vmatprep.subr.bf16.mxu0 %v7833_v1 }
0x11d5   : > { %7397 = vmatmul.mubr.f32.vlgmr.msra.gmra.mrb[30].mxu0 %v5620_v26 }
0x11d6   : > { %7653 = vmatpush3.bf16.msra.mxu0 %v8237_v46  ;;  %7403 = vmatprep.mubr.msk.f32.mxu0 %vm7834_vm0, %v7835_v5 }
0x11d7   : > { %7654 = vmatprep.subr.bf16.mxu0 %v7833_v1 }
0x11dd   : > { %7404 = vmatmul.mubr.f32.vlgmr.msra.gmra.mrb[30].mxu0 %v5621_v10 }
0x11de   : > { %7656 = vmatpush3.bf16.msra.mxu0 %v8276_v55  ;;  %7410 = vmatprep.mubr.msk.f32.mxu0 %vm7834_vm0, %v7835_v5 }
0x11df   : > { %7657 = vmatprep.subr.bf16.mxu0 %v7833_v1 }
0x11e5   : > { %7411 = vmatmul.mubr.f32.vlgmr.msra.gmra.mrb[30].mxu0 %v5619_v8 }
0x11e6   : > { %7659 = vmatpush3.bf16.msra.mxu0 %v8237_v46  ;;  %7417 = vmatprep.mubr.msk.f32.mxu0 %vm7834_vm0, %v7835_v5 }
0x11ed   : > { %7418 = vmatmul.mubr.f32.vlgmr.msra.gmra.mrb[30].mxu0 %v5619_v8 }
0x12c0   : > { %v6007_v16 = vpop.f32.mrb[30].mxu0 }
0x12c1   : > { %v6018_v40 = vadd.f32 %v6007_v16, %v8328_v27  ;;  %v7419_v18 = vpop.f32.mrb[31].mxu0  ;;  %v6011_v21 = vadd.f32 %v6007_v16, %v5546_v20 }
0x12c3   : > { %6020 = vrot.lane.b32.xlu1 %v6018_v40, %s7839_s29  ;;  %v6734_v22 = vmul.f32 -1.442695, %v6011_v21 }
0x12c5   : > { %7813 = vpow2.f32 %v6734_v22 }
0x12c7   : > { %6042 = vperm.xlu1 %7775, %v6040_v19  }
0x12cf   : > { %v7814_v42 = vpop.eup %7813 }
0x12d0   : > { %v6015_v49 = vadd.f32 1.0, %v7814_v42 }
0x12d2   : > { %7815 = vrcp.f32 %v6015_v49 }
0x12dc   : > { %v7816_v50 = vpop.eup %7815 }
0x12dd   : > { %v6030_v33 = vsub.f32 1.0, %v7816_v50  ;;  %v6036_v36 = vmul.f32 %v7816_v50, %v8586_v6 }
0x1335   : > { %v6021_v60 = vpop.permute.xlu1 %6020 }
0x1336   : > { %v6023_v25 = vmul.f32 %v7816_v50, %v6021_v60 }
0x1338   : > { %6025 = vrot.lane.b32.xlu0 %v6023_v25, %s7836_s23 }
0x1346   : > { %v6043_v35 = vpop.permute.xlu1 %6042 }
0x1347   : > { %vm6044_vm9 = vcmp.eq.s32.totalorder %v6043_v35, 1 }
0x13aa   : > { %v6026_v0 = vpop.permute.xlu0 %6025 }
0x13ab   : > { %v6028_v28 = vadd.f32 %v6026_v0, %v5546_v20 }
0x13ad   : > { %7817 = vtanh.f32 %v6028_v28 }
0x13b7   : > { %v7818_v30 = vpop.eup %7817 }
0x13b8   : > { %6032 = vrot.lane.b32.xlu0 %v7818_v30, %s7841_s15 }
0x142a   : > { %v6033_v14 = vpop.permute.xlu0 %6032 }
0x142b   : > { %v6035_v15 = vmul.f32 %v6033_v14, %v6030_v33 }
0x142d   : > { %v6037_v37 = vadd.f32 %v6036_v36, %v6035_v15 }
0x142f   : > { %v8628_v29 = vsel %vm6044_vm9, %v6037_v37, %v8586_v6  ;;  %v6046_v38 = vsel %vm6044_vm9, %v6037_v37, 0.0 }
0x1430   : > { %6058 = vrot.lane.b32.xlu1 %v8628_v29, %s7841_s15 }
0x14a2   : > { %v6059_v43 = vpop.permute.xlu1 %6058 }
0x14a3   : > { %v6060_v44 = vsel %vm395_vm8, %v6059_v43, 0 }
0x14a4   : > { %v6129_v45 = vand.u32 4294901760, %v6060_v44 }
0x14a6   : > { %v6130_v47 = vsub.f32 %v6060_v44, %v6129_v45 }
0x14a8   : > { %v6131_v51 = vand.u32 4294901760, %v6130_v47 }
0x14aa   : > { %v6132_v52 = vsub.f32 %v6130_v47, %v6131_v51 }
0x14ac   : > { %v6133_v56 = vand.u32 4294901760, %v6132_v52 }
0x14ae   : > { %7425 = vmatmul.mubr.f32.vlgmr.msra.gmra.mrb[30].mxu1 %v6133_v56 }
0x14af   : > { %7665 = vmatpush3.bf16.msra.mxu1 %v8250_v53  ;;  %7431 = vmatprep.mubr.msk.f32.mxu1 %vm7834_vm0, %v7835_v5  ;;  %v6548_v53 = vstv %s8654_s18 }
0x14b0   : > { %7666 = vmatprep.subr.bf16.mxu1 %v7833_v1  ;;  %vm6549_vm8 = vcmp.lt.s32.totalorder %v6548_v53, %v8343_v57 }
0x14b6   : > { %7432 = vmatmul.mubr.f32.vlgmr.msra.gmra.mrb[30].mxu1 %v6129_v45 }
0x14b7   : > { %7668 = vmatpush3.bf16.msra.mxu1 %v8265_v54  ;;  %7438 = vmatprep.mubr.msk.f32.mxu1 %vm7834_vm0, %v7835_v5 }
0x14b8   : > { %7669 = vmatprep.subr.bf16.mxu1 %v7833_v1 }
0x14be   : > { %7439 = vmatmul.mubr.f32.vlgmr.msra.gmra.mrb[30].mxu1 %v6130_v47 }
0x14bf   : > { %7671 = vmatpush3.bf16.msra.mxu1 %v8237_v46  ;;  %7445 = vmatprep.mubr.msk.f32.mxu1 %vm7834_vm0, %v7835_v5 }
0x14c0   : > { %7672 = vmatprep.subr.bf16.mxu1 %v7833_v1 }
0x14c6   : > { %7446 = vmatmul.mubr.f32.vlgmr.msra.gmra.mrb[30].mxu1 %v6131_v51 }
0x14c7   : > { %7674 = vmatpush3.bf16.msra.mxu1 %v8276_v55  ;;  %7452 = vmatprep.mubr.msk.f32.mxu1 %vm7834_vm0, %v7835_v5 }
0x14c8   : > { %7675 = vmatprep.subr.bf16.mxu1 %v7833_v1  ;;  %v6550_v1 = vsel %vm6549_vm8, 1, %v7838_v32 }
0x14ce   : > { %7453 = vmatmul.mubr.f32.vlgmr.msra.gmra.mrb[30].mxu1 %v6129_v45 }
0x14cf   : > { %7677 = vmatpush3.bf16.msra.mxu1 %v8237_v46  ;;  %7459 = vmatprep.mubr.msk.f32.mxu1 %vm7834_vm0, %v7835_v5  ;;  %v6056_v5 = vld [vmem:[%s6055_s10] sm:$0x3]  ;;  %s2990_s10 = scalar_lea.vmem %s8677_s14, %s6720_s8  ;;  %vm2991_vm0 = vcmask 123904   ;;  %s8733_s8 = sshll.u32 %s8572_s13, 1 }
0x14d0   : > { %s5541_s16 = scalar_lea.vmem %s8677_s14, %s8733_s8 }
0x14d6   : > { %7460 = vmatmul.mubr.f32.vlgmr.msra.gmra.mrb[30].mxu1 %v6129_v45 }
0x15a9   : > { %v6517_v54 = vpop.f32.mrb[30].mxu1 }
0x15aa   : > { %v6528_v55 = vadd.f32 %v6517_v54, %v8328_v27  ;;  %v7461_v59 = vpop.f32.mrb[31].mxu1  ;;  %v6521_v46 = vadd.f32 %v6517_v54, %v6056_v5 }
0x15ac   : > { %6530 = vrot.lane.b32.xlu0 %v6528_v55, %s7839_s29  ;;  %v6736_v32 = vmul.f32 -1.442695, %v6521_v46 }
0x15ae   : > { %7819 = vpow2.f32 %v6736_v32 }
0x15b0   : > { %6552 = vperm.xlu0 %7776, %v6550_v1  }
0x15b4   : > { %2987 = vrot.lane.b32.xlu0 %v8353_v9, %s7841_s15 }
0x15b8   : > { %4008 = vrot.lane.b32.xlu0 %v8444_v17, %s7841_s15  ;;  %v7820_v27 = vpop.eup %7819 }
0x15b9   : > { %v6525_v57 = vadd.f32 1.0, %v7820_v27 }
0x15bb   : > { %7821 = vrcp.f32 %v6525_v57 }
0x15bc   : > { %5028 = vrot.lane.b32.xlu0 %v8541_v23, %s7841_s15 }
0x15c0   : > { %6048 = vrot.lane.b32.xlu0 %v6046_v38, %s7841_s15 }
0x15c5   : > { %v7822_v9 = vpop.eup %7821 }
0x15c6   : > { %v6540_v34 = vsub.f32 1.0, %v7822_v9  ;;  %v6546_v4 = vmul.f32 %v7822_v9, %v8628_v29 }
0x161e   : > { %v6531_v62 = vpop.permute.xlu0 %6530 }
0x161f   : > { %v6533_v17 = vmul.f32 %v7822_v9, %v6531_v62 }
0x1621   : > { %6535 = vrot.lane.b32.xlu1 %v6533_v17, %s7836_s23  ;;  %s4521_s23 = scalar_lea.vmem %s8677_s14, %s6727_s26 }
0x162f   : > { %v6553_v23 = vpop.permute.xlu0 %6552 }
0x1630   : > { %vm6554_vm10 = vcmp.eq.s32.totalorder %v6553_v23, 1 }
0x1633   : > { %v2988_v63 = vpop.permute.xlu0 %2987 }
0x1634   : > { %2992 = vst.msk [vmem:[%s2990_s10] sm:$0x3] %vm2991_vm0, %v2988_v63 }
0x1637   : > { %v4009_v3 = vpop.permute.xlu0 %4008 }
0x163b   : > { %v5029_v58 = vpop.permute.xlu0 %5028 }
0x163f   : > { %v6049_v26 = vpop.permute.xlu0 %6048 }
0x1693   : > { %v6536_v2 = vpop.permute.xlu1 %6535 }
0x1694   : > { %v6538_v24 = vadd.f32 %v6536_v2, %v6056_v5 }
0x1696   : > { %7823 = vtanh.f32 %v6538_v24 }
0x16a0   : > { %v7824_v31 = vpop.eup %7823 }
0x16a1   : > { %6542 = vrot.lane.b32.xlu1 %v7824_v31, %s7841_s15 }
0x16a5   : > { %3498 = vrot.lane.b32.xlu1 %v8400_v39, %s7841_s15 }
0x16a9   : > { %4518 = vrot.lane.b32.xlu1 %v8494_v61, %s7841_s15 }
0x16ad   : > { %5538 = vrot.lane.b32.xlu1 %v8588_v48, %s7841_s15 }
0x1713   : > { %v6543_v41 = vpop.permute.xlu1 %6542 }
0x1714   : > { %v6545_v6 = vmul.f32 %v6543_v41, %v6540_v34 }
0x1716   : > { %v6547_v39 = vadd.f32 %v6546_v4, %v6545_v6 }
0x1717   : > { %v3499_v61 = vpop.permute.xlu1 %3498 }
0x1718   : > { %3502 = vst.msk [vmem:[%s3501_s11] sm:$0x3] %vm2991_vm0, %v3499_v61  ;;  %v6555_v48 = vsel %vm6554_vm10, %v6547_v39, 0.0 }
0x1719   : > { %4012 = vst.msk [vmem:[%s4011_s12] sm:$0x3] %vm2991_vm0, %v4009_v3  ;;  %6557 = vrot.lane.b32.xlu1 %v6555_v48, %s7841_s15  ;;  %s6560_s15 = scalar_lea.vmem %s8677_s14, %s6735_s25 }
0x171b   : > { %v4519_v7 = vpop.permute.xlu1 %4518 }
0x171c   : > { %4522 = vst.msk [vmem:[%s4521_s23] sm:$0x3] %vm2991_vm0, %v4519_v7 }
0x171d   : > { %5032 = vst.msk [vmem:[%s5031_s30] sm:$0x3] %vm2991_vm0, %v5029_v58 }
0x171f   : > { %v5539_v8 = vpop.permute.xlu1 %5538 }
0x1720   : > { %5542 = vst.msk [vmem:[%s5541_s16] sm:$0x3] %vm2991_vm0, %v5539_v8 }
0x1721   : > { %6052 = vst.msk [vmem:[%s6051_s19] sm:$0x3] %vm2991_vm0, %v6049_v26 }
0x178b   : > { %v6558_v10 = vpop.permute.xlu1 %6557 }
0x178c   : > { %6561 = vst.msk [vmem:[%s6560_s15] sm:$0x3] %vm2991_vm0, %v6558_v10 }
0x178d PF: > { %s17_s24 = sadd.s32 1, %s7831_s24  }
0x178e   : > { %p14_p5 = scmp.ge.s32.totalorder %s17_s24, 4  }
0x1790   :  { %16 = sbr.rel (!%p14_p5) target bundleno = 1 (0x1), region = 107 }

// kernel: pos_tagger_forward.4
= control target key start
LH: loop header
LB: loop body
LE: loop exit
PB: predicated region body
PF: predicated region fallthrough
CT: control target
= control target key end

     0   :  { %s6578_s24 = smov 0   ;;  %s7137_s0 = inlined_call_operand.vmem [shape: f32[2,8,8], index: 0, kind: input, shape index: {}]   ;;  %s7138_s1 = inlined_call_operand.vmem [shape: f32[2,8,48], index: 1, kind: input, shape index: {}]   ;;  %s7139_s2 = inlined_call_operand.vmem [shape: f32[2,16,48], index: 2, kind: input, shape index: {}]   ;;  %s7140_s3 = inlined_call_operand.vmem [shape: f32[2,1,48], index: 3, kind: input, shape index: {}]   ;;  %s7141_s4 = inlined_call_operand.vmem [shape: f32[2,1,16], index: 4, kind: input, shape index: {}]   ;;  %s7142_s5 = inlined_call_operand.vmem [shape: f32[2,2,16], index: 5, kind: input, shape index: {}]   ;;  %s7143_s6 = inlined_call_operand.vmem [shape: s32[2,1], index: 6, kind: input, shape index: {}]   ;;  %s7144_s7 = inlined_call_operand.vmem [shape: f32[2,8,2,16], index: 7, kind: output, shape index: {}]  }
   0x1 LB: > { %s6584_s25 = sadd.s32 4294967295, %s6527_s24   ;;  %p5614_p0 = scmp.ge.s32.totalorder %s6527_s24, 1  ;;  %s6527_s24 = sphi %s6578_s24, %s17_s24  }
   0x2   : > { %p271_p1 = scmp.lt.s32.totalorder %s6527_s24, 3 }
   0x4   : > { %p272_p2 = pnand %p5614_p0, %p271_p1 }
   0x5   : > { %p317_p3 = scmp.lt.s32.totalorder (!%p272_p2), %s6584_s25, 1  ;;  %v342_v0 = vld [vmem:[%s7137_s0] sm:$0xff] (!%p272_p2)  ;;  %vm350_vm0 = vcmask (!%p272_p2), 64512   ;;  %v5622_v1 = vld [vmem:[%s7137_s0 + $0x8] sm:$0xff] (!%p272_p2)  ;;  %v6529_v2 = vmov (!%p272_p2), 0.0   ;;  %vm6530_vm1 = vmmov (!%p272_p2), 0   ;;  %v805_v48 = vlaneseq (!%p272_p2) }
   0x6   : > { %275 = sbr.rel (%p272_p2) target bundleno = 6016 (0x1780), region = 48  ;;  %5812 = vmatprep.subr.mxu0 (!%p272_p2), %v6529_v2  ;;  %5842 = vmatprep.subr.mxu1 (!%p272_p2), %v6529_v2  ;;  %v352_v3 = vsel (!%p272_p2), %vm350_vm0, %v342_v0, 0  ;;  %v871_v4 = vsel (!%p272_p2), %vm350_vm0, %v5622_v1, 0  ;;  %s6531_s15 = smov (!%p272_p2), 32   ;;  %vm1395_vm2 = vcmask (!%p272_p2), 130048   ;;  %v6532_v37 = vmov (!%p272_p2), 0.0|0.0  }
   0x7   : > { %5814 = vmatprep.mubr.msk.f32.mxu0 (!%p272_p2), %vm6530_vm1, %v6529_v2  ;;  %5844 = vmatprep.mubr.msk.f32.mxu1 (!%p272_p2), %vm6530_vm1, %v6529_v2  ;;  %v6604_v5 = vand.u32 (!%p272_p2), 4294901760, %v352_v3  ;;  %v6606_v6 = vand.u32 (!%p272_p2), 4294901760, %v871_v4  ;;  %v6533_v46 = vmov (!%p272_p2), 1966171168   ;;  %v806_v50 = vshrl.u32 (!%p272_p2), %v805_v48, 7  ;;  %s6535_s29 = smov (!%p272_p2), 96  }
   0x8   : > { %v803_v47 = vunpack.c.l.s4 (!%p272_p2), %v6533_v46  ;;  %vm858_vm3 = vcmask (!%p272_p2), 385024   ;;  %p1389_p4 = scmp.eq.s32.totalorder (!%p272_p2), %s6584_s25, 1  ;;  %s6536_s13 = smov (!%p272_p2), 16  }
   0x9   : > { %v421_v7 = vsub.f32 (!%p272_p2), %v352_v3, %v6604_v5  ;;  %v940_v8 = vsub.f32 (!%p272_p2), %v871_v4, %v6606_v6 }
   0xa   : > { %v804_v49 = vunpack.c.0.s8 (!%p272_p2), %v803_v47 }
   0xb   : > { %v422_v10 = vand.u32 (!%p272_p2), 4294901760, %v421_v7  ;;  %v941_v11 = vand.u32 (!%p272_p2), 4294901760, %v940_v8 }
   0xc   : > { %v807_v52 = vsub.s32 (!%p272_p2), %v804_v49, %v806_v50 }
   0xd   : > { %s6598_s30 = scalar_select %p317_p3, %s6584_s25, 1  ;;  %v423_v14 = vsub.f32 %v421_v7, %v422_v10  ;;  %v942_v15 = vsub.f32 %v940_v8, %v941_v11 }
   0xe   : > { %s6986_s12 = scalar_select %p1389_p4, 2, 5 }
   0xf   : > { %s5615_s8 = sshll.u32 %s6598_s30, 3  ;;  %s331_s14 = scalar_lea.vmem %s7141_s4, %s6598_s30  ;;  %v424_v17 = vand.u32 4294901760, %v423_v14  ;;  %v943_v18 = vand.u32 4294901760, %v942_v15 }
  0x10   : > { %s320_s11 = scalar_lea.vmem %s7138_s1, %s5615_s8  ;;  %v5625_v13 = vld [vmem:[%s331_s14] ss:$0 sm:$0xff]  ;;  %s5642_s16 = sshll.u32 %s6598_s30, 4 }
  0x11   : > { %v343_v9 = vld [vmem:[%s320_s11] sm:$0xff]  ;;  %1870 = vrot.lane.b32.xlu0 %v5625_v13, %s6531_s15  ;;  %s5618_s17 = sshll.u32 %s6598_s30, 1  ;;  %s325_s20 = scalar_lea.vmem %s7139_s2, %s5642_s16 }
  0x12   : > { %v6618_v12 = vand.u32 4294901760, %v343_v9  ;;  %s335_s23 = scalar_lea.vmem %s7142_s5, %s5618_s17  ;;  %v1385_v22 = vld [vmem:[%s325_s20] sm:$0xff]  ;;  %v1386_v23 = vld [vmem:[%s325_s20 + $0x8] sm:$0xff]  ;;  %s328_s28 = scalar_lea.vmem %s7140_s3, %s6598_s30 }
  0x13   : > { %v6656_v24 = vld [vmem:[%s335_s23] sm:$0x3]  ;;  %v1400_v25 = vand.u32 4294901760, %v1385_v22  ;;  %v1403_v26 = vand.u32 4294901760, %v1386_v23  ;;  %s6749_s8 = scalar_select %p1389_p4, 7, 0 }
  0x14   : > { %5813 = vmatpush3.msra.mxu0 %v6618_v12  ;;  %v432_v16 = vsub.f32 %v343_v9, %v6618_v12  ;;  %5843 = vmatpush3.msra.mxu1 %v6618_v12  ;;  %v1397_v27 = vsel %vm1395_vm2, %v6656_v24, 0  ;;  %v5621_v51 = vld [vmem:[%s328_s28] ss:$0 sm:$0xff]  ;;  %s6537_s14 = smov 112  }
  0x15   : > { %5817 = vmatprep.subr.mxu0 %v6529_v2  ;;  %5847 = vmatprep.subr.mxu1 %v6529_v2  ;;  %v1466_v28 = vand.u32 4294901760, %v1397_v27  ;;  %v1478_v29 = vsub.f32 %v1385_v22, %v1400_v25  ;;  %v1485_v30 = vsub.f32 %v1386_v23, %v1403_v26  ;;  %v6678_v39 = vpack.c.bf16 %v1403_v26, %v1400_v25  ;;  %s5623_s9 = sshll.u32 %s6749_s8, 1 }
  0x16   : > { %v433_v19 = vand.u32 4294901760, %v432_v16  ;;  %5815 = vmatmul.mubr.f32.vlgmr.msra.gmra.mrb[0].mxu0 %v424_v17  ;;  %5845 = vmatmul.mubr.f32.vlgmr.msra.gmra.mrb[0].mxu1 %v943_v18  ;;  %v6534_v22 = vmov 0   ;;  %s1393_s10 = scalar_lea.vmem [#allocation2], %s5623_s9 }
  0x17   : > { %5819 = vmatprep.mubr.msk.f32.mxu0 %vm6530_vm1, %v6529_v2  ;;  %5849 = vmatprep.mubr.msk.f32.mxu1 %vm6530_vm1, %v6529_v2  ;;  %v1467_v31 = vsub.f32 %v1397_v27, %v1466_v28  ;;  %v1479_v32 = vand.u32 4294901760, %v1478_v29  ;;  %v1486_v33 = vand.u32 4294901760, %v1485_v30  ;;  %v6696_v44 = vpack.c.bf16 %v1485_v30, %v1478_v29  ;;  %s6798_s17 = scalar_select %p1389_p4, 6, 1 }
  0x18   : > { %v434_v20 = vsub.f32 %v432_v16, %v433_v19  ;;  %6471 = vset.pattern.permute.xlu1 %v6534_v22  ;;  %6472 = vset.pattern.permute.xlu0 %v6534_v22  ;;  %s6847_s20 = scalar_select %p1389_p4, 5, 2 }
  0x19   : > { %v1468_v34 = vand.u32 4294901760, %v1467_v31  ;;  %v1480_v35 = vsub.f32 %v1478_v29, %v1479_v32  ;;  %v1487_v36 = vsub.f32 %v1485_v30, %v1486_v33  ;;  %v6706_v45 = vpack.c.bf16 %v1486_v33, %v1479_v32  ;;  %v6757_v33 = vld [vmem:[%s7143_s6] sm:$0x3]  ;;  %s5626_s18 = sshll.u32 %s6798_s17, 1 }
  0x1a   : > { %v435_v21 = vand.u32 4294901760, %v434_v20  ;;  %s1914_s19 = scalar_lea.vmem [#allocation2], %s5626_s18  ;;  %s5628_s21 = sshll.u32 %s6847_s20, 1 }
  0x1b   : > { %v1469_v38 = vsub.f32 %v1467_v31, %v1468_v34  ;;  %v1481_v40 = vand.u32 4294901760, %v1480_v35  ;;  %v1488_v41 = vand.u32 4294901760, %v1487_v36  ;;  %s2424_s22 = scalar_lea.vmem [#allocation2], %s5628_s21 }
  0x1c   : > { %5818 = vmatpush3.msra.mxu0 %v435_v21  ;;  %5848 = vmatpush3.msra.mxu1 %v435_v21  ;;  %s6892_s23 = scalar_select %p1389_p4, 4, 3 }
  0x1d   : > { %5822 = vmatprep.subr.mxu0 %v6529_v2  ;;  %5852 = vmatprep.subr.mxu1 %v6529_v2  ;;  %v1470_v42 = vand.u32 4294901760, %v1469_v38  ;;  %v6685_v43 = vpack.c.bf16 %v1488_v41, %v1481_v40  ;;  %s6939_s28 = scalar_select %p1389_p4, 3, 4 }
  0x1e   : > { %5820 = vmatmul.mubr.f32.vlgmr.msra.gmra.mrb[0].mxu0 %v6604_v5  ;;  %5850 = vmatmul.mubr.f32.vlgmr.msra.gmra.mrb[0].mxu1 %v6606_v6  ;;  %s5630_s26 = sshll.u32 %s6892_s23, 1 }
  0x1f   : > { %5823 = vmatpush3.msra.mxu0 %v432_v16  ;;  %5824 = vmatprep.mubr.msk.f32.mxu0 %vm6530_vm1, %v6529_v2  ;;  %s2934_s27 = scalar_lea.vmem [#allocation2], %s5630_s26 }
  0x20   : > { %5853 = vmatpush3.msra.mxu1 %v432_v16  ;;  %5854 = vmatprep.mubr.msk.f32.mxu1 %vm6530_vm1, %v6529_v2 }
  0x21   : > { %5827 = vmatprep.subr.mxu0 %v6529_v2  ;;  %5857 = vmatprep.subr.mxu1 %v6529_v2 }
  0x26   : > { %5825 = vmatmul.mubr.f32.vlgmr.msra.gmra.mrb[0].mxu0 %v421_v7  ;;  %5855 = vmatmul.mubr.f32.vlgmr.msra.gmra.mrb[0].mxu1 %v940_v8 }
  0x27   : > { %5828 = vmatpush3.msra.mxu0 %v6618_v12  ;;  %5829 = vmatprep.mubr.msk.f32.mxu0 %vm6530_vm1, %v6529_v2 }
  0x28   : > { %5858 = vmatpush3.msra.mxu1 %v6618_v12  ;;  %5859 = vmatprep.mubr.msk.f32.mxu1 %vm6530_vm1, %v6529_v2 }
  0x29   : > { %5832 = vmatprep.subr.mxu0 %v6529_v2  ;;  %5862 = vmatprep.subr.mxu1 %v6529_v2 }
  0x2e   : > { %5830 = vmatmul.mubr.f32.vlgmr.msra.gmra.mrb[0].mxu0 %v422_v10  ;;  %5860 = vmatmul.mubr.f32.vlgmr.msra.gmra.mrb[0].mxu1 %v941_v11 }
  0x2f   : > { %5833 = vmatpush3.msra.mxu0 %v433_v19  ;;  %5834 = vmatprep.mubr.msk.f32.mxu0 %vm6530_vm1, %v6529_v2 }
  0x30   : > { %5863 = vmatpush3.msra.mxu1 %v433_v19  ;;  %5864 = vmatprep.mubr.msk.f32.mxu1 %vm6530_vm1, %v6529_v2 }
  0x31   : > { %5837 = vmatprep.subr.mxu0 %v6529_v2  ;;  %5867 = vmatprep.subr.mxu1 %v6529_v2 }
  0x36   : > { %5835 = vmatmul.mubr.f32.vlgmr.msra.gmra.mrb[0].mxu0 %v6604_v5  ;;  %5865 = vmatmul.mubr.f32.vlgmr.msra.gmra.mrb[0].mxu1 %v6606_v6 }
  0x37   : > { %5838 = vmatpush3.msra.mxu0 %v6618_v12  ;;  %5839 = vmatprep.mubr.msk.f32.mxu0 %vm6530_vm1, %v6529_v2 }
  0x38   : > { %5868 = vmatpush3.msra.mxu1 %v6618_v12  ;;  %5869 = vmatprep.mubr.msk.f32.mxu1 %vm6530_vm1, %v6529_v2 }
  0x39   : > { %6208 = vmatprep.subr.bf16.mxu0 %v6532_v37  ;;  %6226 = vmatprep.subr.bf16.mxu1 %v6532_v37 }
  0x3e   : > { %5840 = vmatmul.mubr.f32.vlgmr.msra.gmra.mrb[0].mxu0 %v6604_v5  ;;  %5870 = vmatmul.mubr.f32.vlgmr.msra.gmra.mrb[0].mxu1 %v6606_v6 }
  0x3f   : > { %6210 = vmatpush3.bf16.msra.mxu0 %v6678_v39  ;;  %5876 = vmatprep.mubr.msk.f32.mxu0 %vm6530_vm1, %v6529_v2 }
  0x40   : > { %6211 = vmatprep.subr.bf16.mxu0 %v6532_v37  ;;  %6228 = vmatpush3.bf16.msra.mxu1 %v6678_v39 }
  0x41   : > { %5918 = vmatprep.mubr.msk.f32.mxu1 %vm6530_vm1, %v6529_v2  ;;  %6229 = vmatprep.subr.bf16.mxu1 %v6532_v37 }
  0x42   : > { %5877 = vmatmul.mubr.f32.vlgmr.msra.gmra.mrb[2].mxu0 %v1470_v42 }
  0x43   : > { %6213 = vmatpush3.bf16.msra.mxu0 %v6685_v43  ;;  %5883 = vmatprep.mubr.msk.f32.mxu0 %vm6530_vm1, %v6529_v2 }
  0x44   : > { %6214 = vmatprep.subr.bf16.mxu0 %v6532_v37 }
  0x4a   : > { %5884 = vmatmul.mubr.f32.vlgmr.msra.gmra.mrb[2].mxu0 %v1466_v28 }
  0x4b   : > { %6216 = vmatpush3.bf16.msra.mxu0 %v6696_v44  ;;  %5890 = vmatprep.mubr.msk.f32.mxu0 %vm6530_vm1, %v6529_v2 }
  0x4c   : > { %6217 = vmatprep.subr.bf16.mxu0 %v6532_v37 }
  0x52   : > { %5891 = vmatmul.mubr.f32.vlgmr.msra.gmra.mrb[2].mxu0 %v1467_v31 }
  0x53   : > { %6219 = vmatpush3.bf16.msra.mxu0 %v6678_v39  ;;  %5897 = vmatprep.mubr.msk.f32.mxu0 %vm6530_vm1, %v6529_v2 }
  0x54   : > { %6220 = vmatprep.subr.bf16.mxu0 %v6532_v37 }
  0x5a   : > { %5898 = vmatmul.mubr.f32.vlgmr.msra.gmra.mrb[2].mxu0 %v1468_v34  ;;  %v1896_v34 = vstv %s6749_s8 }
  0x5b   : > { %6222 = vmatpush3.bf16.msra.mxu0 %v6706_v45  ;;  %5904 = vmatprep.mubr.msk.f32.mxu0 %vm6530_vm1, %v6529_v2  ;;  %vm1897_vm4 = vcmp.lt.s32.totalorder %v1896_v34, %v6757_v33 }
  0x5c   : > { %6223 = vmatprep.subr.bf16.mxu0 %v6532_v37  ;;  %v1898_v40 = vsel %vm1897_vm4, 1, %v6534_v22 }
  0x62   : > { %5905 = vmatmul.mubr.f32.vlgmr.msra.gmra.mrb[2].mxu0 %v1466_v28 }
  0x63   : > { %6225 = vmatpush3.bf16.msra.mxu0 %v6678_v39  ;;  %5911 = vmatprep.mubr.msk.f32.mxu0 %vm6530_vm1, %v6529_v2 }
  0x64   : > { %6244 = vmatprep.subr.bf16.mxu0 %v6532_v37 }
  0x6a   : > { %5912 = vmatmul.mubr.f32.vlgmr.msra.gmra.mrb[2].mxu0 %v1466_v28 }
  0x6b   : > { %6246 = vmatpush3.bf16.msra.mxu0 %v6678_v39  ;;  %5960 = vmatprep.mubr.msk.f32.mxu0 %vm6530_vm1, %v6529_v2 }
  0x6c   : > { %6247 = vmatprep.subr.bf16.mxu0 %v6532_v37 }
  0x83   : > { %v6742_v23 = vpop.permute.xlu0 %1870 }
 0x111   : > { %v796_v53 = vpop.f32.mrb[0].mxu0  ;;  %v1315_v54 = vpop.f32.mrb[0].mxu1 }
 0x112   : > { %v6352_v55 = vadd.f32 %v5621_v51, %v796_v53  ;;  %v6353_v56 = vadd.f32 %v5621_v51, %v1315_v54  ;;  %v5841_v57 = vpop.f32.mrb[1].mxu0  ;;  %v5871_v58 = vpop.f32.mrb[1].mxu1 }
 0x114   : > { %v801_v59 = vcombine.high %v6352_v55, %v6352_v55  ;;  %v808_v60 = vrot.slane %v6352_v55, %v807_v52  ;;  %v1320_v61 = vcombine.high %v6353_v56, %v6353_v56  ;;  %v1327_v62 = vrot.slane %v6353_v56, %v807_v52 }
 0x116   : > { %v815_v63 = vrot.slane %v801_v59, %v807_v52  ;;  %v816_v0 = vcombine.high %v808_v60, %v808_v60  ;;  %v824_v1 = vrot.slane %v808_v60, %v807_v52  ;;  %v1334_v3 = vrot.slane %v1320_v61, %v807_v52 }
 0x117   : > { %v1335_v4 = vcombine.high %v1327_v62, %v1327_v62  ;;  %v1343_v5 = vrot.slane %v1327_v62, %v807_v52  ;;  %v2407_v62 = vstv %s6798_s17 }
 0x118   : > { %v817_v6 = vcombine.high %v815_v63, %v815_v63  ;;  %v831_v7 = vrot.slane %v815_v63, %v807_v52  ;;  %v838_v8 = vrot.slane %v816_v0, %v807_v52  ;;  %v846_v9 = vcombine.high %v824_v1, %v824_v1  ;;  %859 = vst.msk [vmem:[#allocation2] sm:$0x1] %vm858_vm3, %v824_v1 }
 0x119   : > { %v1336_v10 = vcombine.high %v1334_v3, %v1334_v3  ;;  %v1350_v11 = vrot.slane %v1334_v3, %v807_v52  ;;  %v1357_v12 = vrot.slane %v1335_v4, %v807_v52  ;;  %v1365_v13 = vcombine.high %v1343_v5, %v1343_v5  ;;  %1377 = vst.msk [vmem:[#allocation2 + $0x1] sm:$0x1] %vm858_vm3, %v1343_v5 }
 0x11a   : > { %v845_v14 = vrot.slane %v817_v6, %v807_v52  ;;  %v847_v15 = vcombine.high %v831_v7, %v831_v7  ;;  %v848_v16 = vcombine.high %v838_v8, %v838_v8  ;;  %860 = vst.msk [vmem:[#allocation2 + $0x2] sm:$0x1] %vm858_vm3, %v838_v8  ;;  %861 = vst.msk [vmem:[#allocation2 + $0x4] sm:$0x1] %vm858_vm3, %v846_v9 }
 0x11b   : > { %863 = vst.msk [vmem:[#allocation2 + $0x8] sm:$0x1] %vm858_vm3, %v831_v7  ;;  %v1364_v17 = vrot.slane %v1336_v10, %v807_v52  ;;  %v1366_v18 = vcombine.high %v1350_v11, %v1350_v11  ;;  %v1367_v19 = vcombine.high %v1357_v12, %v1357_v12  ;;  %1378 = vst.msk [vmem:[#allocation2 + $0x3] sm:$0x1] %vm858_vm3, %v1357_v12 }
 0x11c   : > { %1379 = vst.msk [vmem:[#allocation2 + $0x5] sm:$0x1] %vm858_vm3, %v1365_v13  ;;  %1381 = vst.msk [vmem:[#allocation2 + $0x9] sm:$0x1] %vm858_vm3, %v1350_v11  ;;  %v849_v20 = vcombine.high %v845_v14, %v845_v14  ;;  %vm2408_vm6 = vcmp.lt.s32.totalorder %v2407_v62, %v6757_v33 }
 0x11d   : > { %862 = vst.msk [vmem:[#allocation2 + $0x6] sm:$0x1] %vm858_vm3, %v848_v16  ;;  %864 = vst.msk [vmem:[#allocation2 + $0xa] sm:$0x1] %vm858_vm3, %v845_v14  ;;  %v1368_v21 = vcombine.high %v1364_v17, %v1364_v17  ;;  %v2409_v3 = vsel %vm2408_vm6, 1, %v6534_v22 }
 0x11e   : > { %865 = vst.msk [vmem:[#allocation2 + $0xc] sm:$0x1] %vm858_vm3, %v847_v15  ;;  %1380 = vst.msk [vmem:[#allocation2 + $0x7] sm:$0x1] %vm858_vm3, %v1367_v19 }
 0x11f   : > { %1382 = vst.msk [vmem:[#allocation2 + $0xb] sm:$0x1] %vm858_vm3, %v1364_v17  ;;  %1383 = vst.msk [vmem:[#allocation2 + $0xd] sm:$0x1] %vm858_vm3, %v1366_v18 }
 0x120   : > { %866 = vst.msk [vmem:[#allocation2 + $0xe] sm:$0x1] %vm858_vm3, %v849_v20  ;;  %1384 = vst.msk [vmem:[#allocation2 + $0xf] sm:$0x1] %vm858_vm3, %v1368_v21 }
 0x127   : > { %v1394_v28 = vld [vmem:[%s1393_s10] sm:$0x3]  ;;  %s5632_s10 = sshll.u32 %s6939_s28, 1 }
 0x128   : > { %v1915_v4 = vld [vmem:[%s1914_s19] sm:$0x3]  ;;  %s3444_s11 = scalar_lea.vmem [#allocation2], %s5632_s10 }
 0x13d   : > { %v1854_v25 = vpop.f32.mrb[2].mxu0 }
 0x13e   : > { %v1873_v26 = vadd.f32 %v6742_v23, %v1854_v25  ;;  %v5913_v27 = vpop.f32.mrb[3].mxu0  ;;  %v1858_v29 = vadd.f32 %v1854_v25, %v1394_v28 }
 0x140   : > { %1875 = vrot.lane.b32.xlu0 %v1873_v26, %s6535_s29  ;;  %v5624_v30 = vmul.f32 -1.442695, %v1858_v29 }
 0x142   : > { %6473 = vpow2.f32 %v5624_v30 }
 0x14c   : > { %v6474_v31 = vpop.eup %6473 }
 0x14d   : > { %v1862_v32 = vadd.f32 1.0, %v6474_v31 }
 0x14f   : > { %6475 = vrcp.f32 %v1862_v32 }
 0x159   : > { %v6476_v35 = vpop.eup %6475 }
 0x15a   : > { %v1885_v49 = vsub.f32 1.0, %v6476_v35 }
 0x1b2   : > { %v1876_v36 = vpop.permute.xlu0 %1875 }
 0x1b3   : > { %v1878_v38 = vmul.f32 %v6476_v35, %v1876_v36 }
 0x1b5   : > { %1880 = vrot.lane.b32.xlu1 %v1878_v38, %s6531_s15  ;;  %v2425_v38 = vld [vmem:[%s2424_s22] sm:$0x3]  ;;  %s7028_s22 = scalar_select %p1389_p4, 1, 6 }
 0x1b9   : > { %1900 = vperm.xlu1 %6471, %v1898_v40  }
 0x1bd   : > { %1891 = vrot.lane.b32.xlu1 %v6656_v24, %s6536_s13  ;;  %s7146_s13 = sshll.u32 %s6986_s12, 1 }
 0x1be   : > { %s3954_s19 = scalar_lea.vmem [#allocation2], %s7146_s13  ;;  %s7091_s13 = scalar_lea.vmem %s7144_s7, %s5642_s16 }
 0x1bf   : > { %s2420_s30 = scalar_lea.vmem %s7091_s13, %s5626_s18  ;;  %s3440_s16 = scalar_lea.vmem %s7091_s13, %s5630_s26 }
 0x1c0   : > { %s3950_s8 = scalar_lea.vmem %s7091_s13, %s5632_s10  ;;  %s7148_s18 = sshll.u32 %s7028_s22, 1 }
 0x227   : > { %v1881_v41 = vpop.permute.xlu1 %1880 }
 0x228   : > { %v1883_v42 = vadd.f32 %v1881_v41, %v1394_v28 }
 0x22a   : > { %6477 = vtanh.f32 %v1883_v42 }
 0x234   : > { %v6478_v46 = vpop.eup %6477 }
 0x235   : > { %1887 = vrot.lane.b32.xlu0 %v6478_v46, %s6537_s14 }
 0x238   : > { %v1901_v47 = vpop.permute.xlu1 %1900 }
 0x239   : > { %vm1902_vm5 = vcmp.eq.s32.totalorder %v1901_v47, 1  ;;  %v2917_v47 = vstv %s6847_s20  ;;  %s4970_s20 = scalar_lea.vmem %s7091_s13, %s7148_s18 }
 0x23a   : > { %vm2918_vm8 = vcmp.lt.s32.totalorder %v2917_v47, %v6757_v33 }
 0x23c   : > { %v1892_v48 = vpop.permute.xlu1 %1891 }
 0x23d   : > { %v1894_v51 = vmul.f32 %v6476_v35, %v1892_v48 }
 0x2a7   : > { %v1888_v50 = vpop.permute.xlu0 %1887 }
 0x2a8   : > { %v1890_v52 = vmul.f32 %v1888_v50, %v1885_v49 }
 0x2aa   : > { %v1895_v53 = vadd.f32 %v1894_v51, %v1890_v52 }
 0x2ac   : > { %v6765_v54 = vsel %vm1902_vm5, %v1895_v53, %v1892_v48  ;;  %v6767_v55 = vsel %vm1902_vm5, %v1895_v53, 0.0  ;;  %v2919_v48 = vsel %vm2918_vm8, 1, %v6534_v22 }
 0x2ad   : > { %1917 = vrot.lane.b32.xlu0 %v6765_v54, %s6537_s14 }
 0x31f   : > { %v1918_v24 = vpop.permute.xlu0 %1917 }
 0x320   : > { %v1919_v56 = vsel %vm1395_vm2, %v1918_v24, 0 }
 0x321   : > { %v1988_v57 = vand.u32 4294901760, %v1919_v56 }
 0x323   : > { %v1989_v58 = vsub.f32 %v1919_v56, %v1988_v57 }
 0x325   : > { %v1990_v59 = vand.u32 4294901760, %v1989_v58 }
 0x327   : > { %v1991_v60 = vsub.f32 %v1989_v58, %v1990_v59 }
 0x329   : > { %v1992_v61 = vand.u32 4294901760, %v1991_v60 }
 0x32b   : > { %5919 = vmatmul.mubr.f32.vlgmr.msra.gmra.mrb[2].mxu1 %v1992_v61 }
 0x32c   : > { %6231 = vmatpush3.bf16.msra.mxu1 %v6685_v43  ;;  %5925 = vmatprep.mubr.msk.f32.mxu1 %vm6530_vm1, %v6529_v2 }
 0x32d   : > { %6232 = vmatprep.subr.bf16.mxu1 %v6532_v37 }
 0x333   : > { %5926 = vmatmul.mubr.f32.vlgmr.msra.gmra.mrb[2].mxu1 %v1988_v57 }
 0x334   : > { %6234 = vmatpush3.bf16.msra.mxu1 %v6696_v44  ;;  %5932 = vmatprep.mubr.msk.f32.mxu1 %vm6530_vm1, %v6529_v2 }
 0x335   : > { %6235 = vmatprep.subr.bf16.mxu1 %v6532_v37 }
 0x33b   : > { %5933 = vmatmul.mubr.f32.vlgmr.msra.gmra.mrb[2].mxu1 %v1989_v58 }
 0x33c   : > { %6237 = vmatpush3.bf16.msra.mxu1 %v6678_v39  ;;  %5939 = vmatprep.mubr.msk.f32.mxu1 %vm6530_vm1, %v6529_v2 }
 0x33d   : > { %6238 = vmatprep.subr.bf16.mxu1 %v6532_v37 }
 0x343   : > { %5940 = vmatmul.mubr.f32.vlgmr.msra.gmra.mrb[2].mxu1 %v1990_v59 }
 0x344   : > { %6240 = vmatpush3.bf16.msra.mxu1 %v6706_v45  ;;  %5946 = vmatprep.mubr.msk.f32.mxu1 %vm6530_vm1, %v6529_v2 }
 0x345   : > { %6241 = vmatprep.subr.bf16.mxu1 %v6532_v37 }
 0x34b   : > { %5947 = vmatmul.mubr.f32.vlgmr.msra.gmra.mrb[2].mxu1 %v1988_v57 }
 0x34c   : > { %6243 = vmatpush3.bf16.msra.mxu1 %v6678_v39  ;;  %5953 = vmatprep.mubr.msk.f32.mxu1 %vm6530_vm1, %v6529_v2 }
 0x34d   : > { %6262 = vmatprep.subr.bf16.mxu1 %v6532_v37 }
 0x353   : > { %5954 = vmatmul.mubr.f32.vlgmr.msra.gmra.mrb[2].mxu1 %v1988_v57 }
 0x354   : > { %6264 = vmatpush3.bf16.msra.mxu1 %v6678_v39  ;;  %6002 = vmatprep.mubr.msk.f32.mxu1 %vm6530_vm1, %v6529_v2 }
 0x355   : > { %6265 = vmatprep.subr.bf16.mxu1 %v6532_v37 }
 0x426   : > { %v2376_v63 = vpop.f32.mrb[2].mxu1 }
 0x427   : > { %v2387_v0 = vadd.f32 %v2376_v63, %v6742_v23  ;;  %v5955_v1 = vpop.f32.mrb[3].mxu1  ;;  %v2380_v5 = vadd.f32 %v2376_v63, %v1915_v4 }
 0x429   : > { %2389 = vrot.lane.b32.xlu1 %v2387_v0, %s6535_s29  ;;  %v5627_v6 = vmul.f32 -1.442695, %v2380_v5 }
 0x42b   : > { %6479 = vpow2.f32 %v5627_v6 }
 0x42d   : > { %2411 = vperm.xlu1 %6471, %v2409_v3  }
 0x435   : > { %v6480_v7 = vpop.eup %6479 }
 0x436   : > { %v2384_v8 = vadd.f32 1.0, %v6480_v7  ;;  %v3427_v7 = vstv %s6892_s23 }
 0x437   : > { %vm3428_vm10 = vcmp.lt.s32.totalorder %v3427_v7, %v6757_v33 }
 0x438   : > { %6481 = vrcp.f32 %v2384_v8 }
 0x442   : > { %v6482_v9 = vpop.eup %6481 }
 0x443   : > { %v2399_v15 = vsub.f32 1.0, %v6482_v9  ;;  %v2405_v18 = vmul.f32 %v6482_v9, %v6765_v54 }
 0x49b   : > { %v2390_v10 = vpop.permute.xlu1 %2389 }
 0x49c   : > { %v2392_v11 = vmul.f32 %v6482_v9, %v2390_v10 }
 0x49e   : > { %2394 = vrot.lane.b32.xlu0 %v2392_v11, %s6531_s15  ;;  %v3429_v11 = vsel %vm3428_vm10, 1, %v6534_v22 }
 0x4ac   : > { %v2412_v17 = vpop.permute.xlu1 %2411 }
 0x4ad   : > { %vm2413_vm7 = vcmp.eq.s32.totalorder %v2412_v17, 1 }
 0x510   : > { %v2395_v12 = vpop.permute.xlu0 %2394 }
 0x511   : > { %v2397_v13 = vadd.f32 %v2395_v12, %v1915_v4  ;;  %v2935_v12 = vld [vmem:[%s2934_s27] sm:$0x3]  ;;  %s7145_s27 = sshll.u32 %s7028_s22, 1 }
 0x513   : > { %6483 = vtanh.f32 %v2397_v13 }
 0x51d   : > { %v6484_v14 = vpop.eup %6483 }
 0x51e   : > { %2401 = vrot.lane.b32.xlu0 %v6484_v14, %s6537_s14 }
 0x590   : > { %v2402_v16 = vpop.permute.xlu0 %2401 }
 0x591   : > { %v2404_v19 = vmul.f32 %v2402_v16, %v2399_v15 }
 0x593   : > { %v2406_v20 = vadd.f32 %v2405_v18, %v2404_v19 }
 0x595   : > { %v6812_v21 = vsel %vm2413_vm7, %v2406_v20, %v6765_v54  ;;  %v6814_v25 = vsel %vm2413_vm7, %v2406_v20, 0.0 }
 0x596   : > { %2427 = vrot.lane.b32.xlu1 %v6812_v21, %s6537_s14 }
 0x608   : > { %v2428_v26 = vpop.permute.xlu1 %2427 }
 0x609   : > { %v2429_v27 = vsel %vm1395_vm2, %v2428_v26, 0 }
 0x60a   : > { %v2498_v28 = vand.u32 4294901760, %v2429_v27 }
 0x60c   : > { %v2499_v29 = vsub.f32 %v2429_v27, %v2498_v28 }
 0x60e   : > { %v2500_v30 = vand.u32 4294901760, %v2499_v29 }
 0x610   : > { %v2501_v31 = vsub.f32 %v2499_v29, %v2500_v30 }
 0x612   : > { %v2502_v32 = vand.u32 4294901760, %v2501_v31 }
 0x614   : > { %5961 = vmatmul.mubr.f32.vlgmr.msra.gmra.mrb[4].mxu0 %v2502_v32 }
 0x615   : > { %6249 = vmatpush3.bf16.msra.mxu0 %v6685_v43  ;;  %5967 = vmatprep.mubr.msk.f32.mxu0 %vm6530_vm1, %v6529_v2 }
 0x616   : > { %6250 = vmatprep.subr.bf16.mxu0 %v6532_v37 }
 0x61c   : > { %5968 = vmatmul.mubr.f32.vlgmr.msra.gmra.mrb[4].mxu0 %v2498_v28 }
 0x61d   : > { %6252 = vmatpush3.bf16.msra.mxu0 %v6696_v44  ;;  %5974 = vmatprep.mubr.msk.f32.mxu0 %vm6530_vm1, %v6529_v2 }
 0x61e   : > { %6253 = vmatprep.subr.bf16.mxu0 %v6532_v37 }
 0x624   : > { %5975 = vmatmul.mubr.f32.vlgmr.msra.gmra.mrb[4].mxu0 %v2499_v29 }
 0x625   : > { %6255 = vmatpush3.bf16.msra.mxu0 %v6678_v39  ;;  %5981 = vmatprep.mubr.msk.f32.mxu0 %vm6530_vm1, %v6529_v2 }
 0x626   : > { %6256 = vmatprep.subr.bf16.mxu0 %v6532_v37 }
 0x62c   : > { %5982 = vmatmul.mubr.f32.vlgmr.msra.gmra.mrb[4].mxu0 %v2500_v30 }
 0x62d   : > { %6258 = vmatpush3.bf16.msra.mxu0 %v6706_v45  ;;  %5988 = vmatprep.mubr.msk.f32.mxu0 %vm6530_vm1, %v6529_v2 }
 0x62e   : > { %6259 = vmatprep.subr.bf16.mxu0 %v6532_v37 }
 0x634   : > { %5989 = vmatmul.mubr.f32.vlgmr.msra.gmra.mrb[4].mxu0 %v2498_v28 }
 0x635   : > { %6261 = vmatpush3.bf16.msra.mxu0 %v6678_v39  ;;  %5995 = vmatprep.mubr.msk.f32.mxu0 %vm6530_vm1, %v6529_v2 }
 0x636   : > { %6280 = vmatprep.subr.bf16.mxu0 %v6532_v37 }
 0x63c   : > { %5996 = vmatmul.mubr.f32.vlgmr.msra.gmra.mrb[4].mxu0 %v2498_v28 }
 0x63d   : > { %6282 = vmatpush3.bf16.msra.mxu0 %v6678_v39  ;;  %6044 = vmatprep.mubr.msk.f32.mxu0 %vm6530_vm1, %v6529_v2 }
 0x63e   : > { %6283 = vmatprep.subr.bf16.mxu0 %v6532_v37 }
 0x70f   : > { %v2886_v34 = vpop.f32.mrb[4].mxu0 }
 0x710   : > { %v2897_v35 = vadd.f32 %v2886_v34, %v6742_v23  ;;  %v5997_v36 = vpop.f32.mrb[5].mxu0  ;;  %v2890_v40 = vadd.f32 %v2886_v34, %v2425_v38 }
 0x712   : > { %2899 = vrot.lane.b32.xlu0 %v2897_v35, %s6535_s29  ;;  %v5629_v41 = vmul.f32 -1.442695, %v2890_v40 }
 0x714   : > { %6485 = vpow2.f32 %v5629_v41 }
 0x716   : > { %2921 = vperm.xlu0 %6472, %v2919_v48   ;;  %v3937_v48 = vstv %s6939_s28 }
 0x717   : > { %vm3938_vm12 = vcmp.lt.s32.totalorder %v3937_v48, %v6757_v33 }
 0x71e   : > { %v6486_v42 = vpop.eup %6485 }
 0x71f   : > { %v2894_v46 = vadd.f32 1.0, %v6486_v42 }
 0x721   : > { %6487 = vrcp.f32 %v2894_v46 }
 0x72b   : > { %v6488_v49 = vpop.eup %6487 }
 0x72c   : > { %v2909_v24 = vsub.f32 1.0, %v6488_v49  ;;  %v2915_v58 = vmul.f32 %v6488_v49, %v6812_v21 }
 0x784   : > { %v2900_v50 = vpop.permute.xlu0 %2899 }
 0x785   : > { %v2902_v51 = vmul.f32 %v6488_v49, %v2900_v50 }
 0x787   : > { %2904 = vrot.lane.b32.xlu1 %v2902_v51, %s6531_s15 }
 0x795   : > { %v2922_v56 = vpop.permute.xlu0 %2921 }
 0x796   : > { %vm2923_vm9 = vcmp.eq.s32.totalorder %v2922_v56, 1 }
 0x7f9   : > { %v2905_v52 = vpop.permute.xlu1 %2904 }
 0x7fa   : > { %v2907_v53 = vadd.f32 %v2905_v52, %v2425_v38  ;;  %v3939_v52 = vsel %vm3938_vm12, 1, %v6534_v22 }
 0x7fc   : > { %6489 = vtanh.f32 %v2907_v53  ;;  %v3445_v53 = vld [vmem:[%s3444_s11] sm:$0x3]  ;;  %s4464_s11 = scalar_lea.vmem [#allocation2], %s7145_s27 }
 0x806   : > { %v6490_v54 = vpop.eup %6489 }
 0x807   : > { %2911 = vrot.lane.b32.xlu1 %v6490_v54, %s6537_s14 }
 0x879   : > { %v2912_v57 = vpop.permute.xlu1 %2911 }
 0x87a   : > { %v2914_v59 = vmul.f32 %v2912_v57, %v2909_v24 }
 0x87c   : > { %v2916_v60 = vadd.f32 %v2915_v58, %v2914_v59 }
 0x87e   : > { %v6858_v61 = vsel %vm2923_vm9, %v2916_v60, 0.0  ;;  %v6861_v62 = vsel %vm2923_vm9, %v2916_v60, %v6812_v21 }
 0x87f   : > { %2937 = vrot.lane.b32.xlu1 %v6861_v62, %s6537_s14 }
 0x8f1   : > { %v2938_v63 = vpop.permute.xlu1 %2937 }
 0x8f2   : > { %v2939_v0 = vsel %vm1395_vm2, %v2938_v63, 0 }
 0x8f3   : > { %v3008_v1 = vand.u32 4294901760, %v2939_v0 }
 0x8f5   : > { %v3009_v3 = vsub.f32 %v2939_v0, %v3008_v1 }
 0x8f7   : > { %v3010_v4 = vand.u32 4294901760, %v3009_v3 }
 0x8f9   : > { %v3011_v5 = vsub.f32 %v3009_v3, %v3010_v4 }
 0x8fb   : > { %v3012_v6 = vand.u32 4294901760, %v3011_v5 }
 0x8fd   : > { %6003 = vmatmul.mubr.f32.vlgmr.msra.gmra.mrb[4].mxu1 %v3012_v6 }
 0x8fe   : > { %6267 = vmatpush3.bf16.msra.mxu1 %v6685_v43  ;;  %6009 = vmatprep.mubr.msk.f32.mxu1 %vm6530_vm1, %v6529_v2 }
 0x8ff   : > { %6268 = vmatprep.subr.bf16.mxu1 %v6532_v37 }
 0x905   : > { %6010 = vmatmul.mubr.f32.vlgmr.msra.gmra.mrb[4].mxu1 %v3008_v1 }
 0x906   : > { %6270 = vmatpush3.bf16.msra.mxu1 %v6696_v44  ;;  %6016 = vmatprep.mubr.msk.f32.mxu1 %vm6530_vm1, %v6529_v2 }
 0x907   : > { %6271 = vmatprep.subr.bf16.mxu1 %v6532_v37 }
 0x90d   : > { %6017 = vmatmul.mubr.f32.vlgmr.msra.gmra.mrb[4].mxu1 %v3009_v3 }
 0x90e   : > { %6273 = vmatpush3.bf16.msra.mxu1 %v6678_v39  ;;  %6023 = vmatprep.mubr.msk.f32.mxu1 %vm6530_vm1, %v6529_v2 }
 0x90f   : > { %6274 = vmatprep.subr.bf16.mxu1 %v6532_v37 }
 0x915   : > { %6024 = vmatmul.mubr.f32.vlgmr.msra.gmra.mrb[4].mxu1 %v3010_v4 }
 0x916   : > { %6276 = vmatpush3.bf16.msra.mxu1 %v6706_v45  ;;  %6030 = vmatprep.mubr.msk.f32.mxu1 %vm6530_vm1, %v6529_v2 }
 0x917   : > { %6277 = vmatprep.subr.bf16.mxu1 %v6532_v37 }
 0x91d   : > { %6031 = vmatmul.mubr.f32.vlgmr.msra.gmra.mrb[4].mxu1 %v3008_v1 }
 0x91e   : > { %6279 = vmatpush3.bf16.msra.mxu1 %v6678_v39  ;;  %6037 = vmatprep.mubr.msk.f32.mxu1 %vm6530_vm1, %v6529_v2 }
 0x91f   : > { %6298 = vmatprep.subr.bf16.mxu1 %v6532_v37 }
 0x925   : > { %6038 = vmatmul.mubr.f32.vlgmr.msra.gmra.mrb[4].mxu1 %v3008_v1 }
 0x926   : > { %6300 = vmatpush3.bf16.msra.mxu1 %v6678_v39  ;;  %6086 = vmatprep.mubr.msk.f32.mxu1 %vm6530_vm1, %v6529_v2 }
 0x927   : > { %6301 = vmatprep.subr.bf16.mxu1 %v6532_v37 }
 0x9f8   : > { %v3396_v8 = vpop.f32.mrb[4].mxu1 }
 0x9f9   : > { %v3407_v9 = vadd.f32 %v3396_v8, %v6742_v23  ;;  %v6039_v10 = vpop.f32.mrb[5].mxu1  ;;  %v3400_v13 = vadd.f32 %v3396_v8, %v2935_v12 }
 0x9fb   : > { %3409 = vrot.lane.b32.xlu0 %v3407_v9, %s6535_s29  ;;  %v5631_v14 = vmul.f32 -1.442695, %v3400_v13 }
 0x9fd   : > { %6491 = vpow2.f32 %v5631_v14 }
 0x9ff   : > { %3431 = vperm.xlu0 %6472, %v3429_v11  }
 0xa07   : > { %v6492_v15 = vpop.eup %6491 }
 0xa08   : > { %v3404_v16 = vadd.f32 1.0, %v6492_v15 }
 0xa0a   : > { %6493 = vrcp.f32 %v3404_v16 }
 0xa14   : > { %v6494_v17 = vpop.eup %6493 }
 0xa15   : > { %v3419_v27 = vsub.f32 1.0, %v6494_v17  ;;  %v3425_v30 = vmul.f32 %v6494_v17, %v6861_v62 }
 0xa6d   : > { %v3410_v18 = vpop.permute.xlu0 %3409 }
 0xa6e   : > { %v3412_v19 = vmul.f32 %v6494_v17, %v3410_v18  ;;  %v4447_v17 = vstv %s6986_s12 }
 0xa6f   : > { %vm4448_vm14 = vcmp.lt.s32.totalorder %v4447_v17, %v6757_v33 }
 0xa70   : > { %3414 = vrot.lane.b32.xlu1 %v3412_v19, %s6531_s15 }
 0xa7e   : > { %v3432_v29 = vpop.permute.xlu0 %3431 }
 0xa7f   : > { %vm3433_vm11 = vcmp.eq.s32.totalorder %v3432_v29, 1 }
 0xae2   : > { %v3415_v20 = vpop.permute.xlu1 %3414 }
 0xae3   : > { %v3417_v21 = vadd.f32 %v3415_v20, %v2935_v12 }
 0xae5   : > { %6495 = vtanh.f32 %v3417_v21  ;;  %v4449_v21 = vsel %vm4448_vm14, 1, %v6534_v22 }
 0xaef   : > { %v6496_v26 = vpop.eup %6495 }
 0xaf0   : > { %3421 = vrot.lane.b32.xlu1 %v6496_v26, %s6537_s14  ;;  %v3955_v26 = vld [vmem:[%s3954_s19] sm:$0x3]  ;;  %s7068_s19 = scalar_select %p1389_p4, 0, 7 }
 0xaf2   : > { %s5638_s25 = sshll.u32 %s7068_s19, 1 }
 0xb62   : > { %v3422_v28 = vpop.permute.xlu1 %3421 }
 0xb63   : > { %v3424_v31 = vmul.f32 %v3422_v28, %v3419_v27 }
 0xb65   : > { %v3426_v32 = vadd.f32 %v3425_v30, %v3424_v31 }
 0xb67   : > { %v6906_v34 = vsel %vm3433_vm11, %v3426_v32, %v6861_v62  ;;  %v6908_v35 = vsel %vm3433_vm11, %v3426_v32, 0.0 }
 0xb68   : > { %3447 = vrot.lane.b32.xlu0 %v6906_v34, %s6537_s14 }
 0xbda   : > { %v3448_v36 = vpop.permute.xlu0 %3447 }
 0xbdb   : > { %v3449_v38 = vsel %vm1395_vm2, %v3448_v36, 0 }
 0xbdc   : > { %v3518_v40 = vand.u32 4294901760, %v3449_v38 }
 0xbde   : > { %v3519_v41 = vsub.f32 %v3449_v38, %v3518_v40 }
 0xbe0   : > { %v3520_v42 = vand.u32 4294901760, %v3519_v41 }
 0xbe2   : > { %v3521_v46 = vsub.f32 %v3519_v41, %v3520_v42 }
 0xbe4   : > { %v3522_v47 = vand.u32 4294901760, %v3521_v46 }
 0xbe6   : > { %6045 = vmatmul.mubr.f32.vlgmr.msra.gmra.mrb[6].mxu0 %v3522_v47 }
 0xbe7   : > { %6285 = vmatpush3.bf16.msra.mxu0 %v6685_v43  ;;  %6051 = vmatprep.mubr.msk.f32.mxu0 %vm6530_vm1, %v6529_v2 }
 0xbe8   : > { %6286 = vmatprep.subr.bf16.mxu0 %v6532_v37 }
 0xbee   : > { %6052 = vmatmul.mubr.f32.vlgmr.msra.gmra.mrb[6].mxu0 %v3518_v40 }
 0xbef   : > { %6288 = vmatpush3.bf16.msra.mxu0 %v6696_v44  ;;  %6058 = vmatprep.mubr.msk.f32.mxu0 %vm6530_vm1, %v6529_v2 }
 0xbf0   : > { %6289 = vmatprep.subr.bf16.mxu0 %v6532_v37 }
 0xbf6   : > { %6059 = vmatmul.mubr.f32.vlgmr.msra.gmra.mrb[6].mxu0 %v3519_v41 }
 0xbf7   : > { %6291 = vmatpush3.bf16.msra.mxu0 %v6678_v39  ;;  %6065 = vmatprep.mubr.msk.f32.mxu0 %vm6530_vm1, %v6529_v2 }
 0xbf8   : > { %6292 = vmatprep.subr.bf16.mxu0 %v6532_v37 }
 0xbfe   : > { %6066 = vmatmul.mubr.f32.vlgmr.msra.gmra.mrb[6].mxu0 %v3520_v42 }
 0xbff   : > { %6294 = vmatpush3.bf16.msra.mxu0 %v6706_v45  ;;  %6072 = vmatprep.mubr.msk.f32.mxu0 %vm6530_vm1, %v6529_v2 }
 0xc00   : > { %6295 = vmatprep.subr.bf16.mxu0 %v6532_v37 }
 0xc06   : > { %6073 = vmatmul.mubr.f32.vlgmr.msra.gmra.mrb[6].mxu0 %v3518_v40 }
 0xc07   : > { %6297 = vmatpush3.bf16.msra.mxu0 %v6678_v39  ;;  %6079 = vmatprep.mubr.msk.f32.mxu0 %vm6530_vm1, %v6529_v2 }
 0xc08   : > { %6316 = vmatprep.subr.bf16.mxu0 %v6532_v37 }
 0xc0e   : > { %6080 = vmatmul.mubr.f32.vlgmr.msra.gmra.mrb[6].mxu0 %v3518_v40 }
 0xc0f   : > { %6318 = vmatpush3.bf16.msra.mxu0 %v6678_v39  ;;  %6128 = vmatprep.mubr.msk.f32.mxu0 %vm6530_vm1, %v6529_v2 }
 0xc10   : > { %6319 = vmatprep.subr.bf16.mxu0 %v6532_v37 }
 0xce1   : > { %v3906_v49 = vpop.f32.mrb[6].mxu0 }
 0xce2   : > { %v3917_v50 = vadd.f32 %v3906_v49, %v6742_v23  ;;  %v6081_v51 = vpop.f32.mrb[7].mxu0  ;;  %v3910_v54 = vadd.f32 %v3906_v49, %v3445_v53 }
 0xce4   : > { %3919 = vrot.lane.b32.xlu1 %v3917_v50, %s6535_s29  ;;  %v5633_v24 = vmul.f32 -1.442695, %v3910_v54 }
 0xce6   : > { %6497 = vpow2.f32 %v5633_v24 }
 0xce8   : > { %3941 = vperm.xlu1 %6471, %v3939_v52  }
 0xcf0   : > { %v6498_v56 = vpop.eup %6497 }
 0xcf1   : > { %v3914_v57 = vadd.f32 1.0, %v6498_v56 }
 0xcf3   : > { %6499 = vrcp.f32 %v3914_v57 }
 0xcfd   : > { %v6500_v58 = vpop.eup %6499 }
 0xcfe   : > { %v3929_v1 = vsub.f32 1.0, %v6500_v58  ;;  %v3935_v5 = vmul.f32 %v6500_v58, %v6906_v34 }
 0xd56   : > { %v3920_v59 = vpop.permute.xlu1 %3919 }
 0xd57   : > { %v3922_v60 = vmul.f32 %v6500_v58, %v3920_v59  ;;  %v4957_v59 = vstv %s7028_s22 }
 0xd58   : > { %vm4958_vm0 = vcmp.lt.s32.totalorder %v4957_v59, %v6757_v33 }
 0xd59   : > { %3924 = vrot.lane.b32.xlu0 %v3922_v60, %s6531_s15 }
 0xd67   : > { %v3942_v4 = vpop.permute.xlu1 %3941 }
 0xd68   : > { %vm3943_vm13 = vcmp.eq.s32.totalorder %v3942_v4, 1 }
 0xdcb   : > { %v3925_v62 = vpop.permute.xlu0 %3924 }
 0xdcc   : > { %v3927_v63 = vadd.f32 %v3925_v62, %v3445_v53 }
 0xdce   : > { %6501 = vtanh.f32 %v3927_v63 }
 0xdd8   : > { %v6502_v0 = vpop.eup %6501 }
 0xdd9   : > { %3931 = vrot.lane.b32.xlu0 %v6502_v0, %s6537_s14  ;;  %v4959_v0 = vsel %vm4958_vm0, 1, %v6534_v22 }
 0xe4b   : > { %v3932_v3 = vpop.permute.xlu0 %3931 }
 0xe4c   : > { %v3934_v6 = vmul.f32 %v3932_v3, %v3929_v1  ;;  %v4465_v1 = vld [vmem:[%s4464_s11] sm:$0x3]  ;;  %s4974_s11 = scalar_lea.vmem [#allocation2], %s5638_s25 }
 0xe4e   : > { %v3936_v7 = vadd.f32 %v3935_v5, %v3934_v6 }
 0xe50   : > { %v6953_v8 = vsel %vm3943_vm13, %v3936_v7, %v6906_v34  ;;  %v6955_v9 = vsel %vm3943_vm13, %v3936_v7, 0.0 }
 0xe51   : > { %3957 = vrot.lane.b32.xlu1 %v6953_v8, %s6537_s14 }
 0xec3   : > { %v3958_v10 = vpop.permute.xlu1 %3957 }
 0xec4   : > { %v3959_v11 = vsel %vm1395_vm2, %v3958_v10, 0 }
 0xec5   : > { %v4028_v12 = vand.u32 4294901760, %v3959_v11 }
 0xec7   : > { %v4029_v13 = vsub.f32 %v3959_v11, %v4028_v12 }
 0xec9   : > { %v4030_v14 = vand.u32 4294901760, %v4029_v13 }
 0xecb   : > { %v4031_v15 = vsub.f32 %v4029_v13, %v4030_v14 }
 0xecd   : > { %v4032_v16 = vand.u32 4294901760, %v4031_v15 }
 0xecf   : > { %6087 = vmatmul.mubr.f32.vlgmr.msra.gmra.mrb[6].mxu1 %v4032_v16 }
 0xed0   : > { %6303 = vmatpush3.bf16.msra.mxu1 %v6685_v43  ;;  %6093 = vmatprep.mubr.msk.f32.mxu1 %vm6530_vm1, %v6529_v2 }
 0xed1   : > { %6304 = vmatprep.subr.bf16.mxu1 %v6532_v37 }
 0xed7   : > { %6094 = vmatmul.mubr.f32.vlgmr.msra.gmra.mrb[6].mxu1 %v4028_v12 }
 0xed8   : > { %6306 = vmatpush3.bf16.msra.mxu1 %v6696_v44  ;;  %6100 = vmatprep.mubr.msk.f32.mxu1 %vm6530_vm1, %v6529_v2 }
 0xed9   : > { %6307 = vmatprep.subr.bf16.mxu1 %v6532_v37 }
 0xedf   : > { %6101 = vmatmul.mubr.f32.vlgmr.msra.gmra.mrb[6].mxu1 %v4029_v13 }
 0xee0   : > { %6309 = vmatpush3.bf16.msra.mxu1 %v6678_v39  ;;  %6107 = vmatprep.mubr.msk.f32.mxu1 %vm6530_vm1, %v6529_v2 }
 0xee1   : > { %6310 = vmatprep.subr.bf16.mxu1 %v6532_v37 }
 0xee7   : > { %6108 = vmatmul.mubr.f32.vlgmr.msra.gmra.mrb[6].mxu1 %v4030_v14 }
 0xee8   : > { %6312 = vmatpush3.bf16.msra.mxu1 %v6706_v45  ;;  %6114 = vmatprep.mubr.msk.f32.mxu1 %vm6530_vm1, %v6529_v2 }
 0xee9   : > { %6313 = vmatprep.subr.bf16.mxu1 %v6532_v37 }
 0xeef   : > { %6115 = vmatmul.mubr.f32.vlgmr.msra.gmra.mrb[6].mxu1 %v4028_v12 }
 0xef0   : > { %6315 = vmatpush3.bf16.msra.mxu1 %v6678_v39  ;;  %6121 = vmatprep.mubr.msk.f32.mxu1 %vm6530_vm1, %v6529_v2 }
 0xef1   : > { %6334 = vmatprep.subr.bf16.mxu1 %v6532_v37 }
 0xef7   : > { %6122 = vmatmul.mubr.f32.vlgmr.msra.gmra.mrb[6].mxu1 %v4028_v12 }
 0xef8   : > { %6336 = vmatpush3.bf16.msra.mxu1 %v6678_v39  ;;  %6170 = vmatprep.mubr.msk.f32.mxu1 %vm6530_vm1, %v6529_v2 }
 0xef9   : > { %6337 = vmatprep.subr.bf16.mxu1 %v6532_v37 }
 0xfca   : > { %v4416_v18 = vpop.f32.mrb[6].mxu1 }
 0xfcb   : > { %v4427_v19 = vadd.f32 %v4416_v18, %v6742_v23  ;;  %v6123_v20 = vpop.f32.mrb[7].mxu1  ;;  %v4420_v27 = vadd.f32 %v4416_v18, %v3955_v26 }
 0xfcd   : > { %4429 = vrot.lane.b32.xlu0 %v4427_v19, %s6535_s29  ;;  %v5635_v28 = vmul.f32 -1.442695, %v4420_v27 }
 0xfcf   : > { %6503 = vpow2.f32 %v5635_v28 }
 0xfd1   : > { %4451 = vperm.xlu0 %6472, %v4449_v21  }
 0xfd9   : > { %v6504_v29 = vpop.eup %6503 }
 0xfda   : > { %v4424_v30 = vadd.f32 1.0, %v6504_v29 }
 0xfdc   : > { %6505 = vrcp.f32 %v4424_v30 }
 0xfe6   : > { %v6506_v31 = vpop.eup %6505 }
 0xfe7   : > { %v4439_v41 = vsub.f32 1.0, %v6506_v31  ;;  %v4445_v47 = vmul.f32 %v6506_v31, %v6953_v8 }
0x103f   : > { %v4430_v32 = vpop.permute.xlu0 %4429 }
0x1040   : > { %v4432_v34 = vmul.f32 %v6506_v31, %v4430_v32 }
0x1042   : > { %4434 = vrot.lane.b32.xlu1 %v4432_v34, %s6531_s15 }
0x1050   : > { %v4452_v46 = vpop.permute.xlu0 %4451 }
0x1051   : > { %vm4453_vm15 = vcmp.eq.s32.totalorder %v4452_v46, 1 }
0x10b4   : > { %v4435_v36 = vpop.permute.xlu1 %4434 }
0x10b5   : > { %v4437_v38 = vadd.f32 %v4435_v36, %v3955_v26 }
0x10b7   : > { %6507 = vtanh.f32 %v4437_v38 }
0x10c1   : > { %v6508_v40 = vpop.eup %6507 }
0x10c2   : > { %4441 = vrot.lane.b32.xlu1 %v6508_v40, %s6537_s14 }
0x1134   : > { %v4442_v42 = vpop.permute.xlu1 %4441 }
0x1135   : > { %v4444_v48 = vmul.f32 %v4442_v42, %v4439_v41 }
0x1137   : > { %v4446_v49 = vadd.f32 %v4445_v47, %v4444_v48 }
0x1139   : > { %v7000_v50 = vsel %vm4453_vm15, %v4446_v49, %v6953_v8  ;;  %v7002_v51 = vsel %vm4453_vm15, %v4446_v49, 0.0 }
0x113a   : > { %4467 = vrot.lane.b32.xlu0 %v7000_v50, %s6537_s14 }
0x11ac   : > { %v4468_v52 = vpop.permute.xlu0 %4467 }
0x11ad   : > { %v4469_v53 = vsel %vm1395_vm2, %v4468_v52, 0 }
0x11ae   : > { %v4538_v54 = vand.u32 4294901760, %v4469_v53 }
0x11b0   : > { %v4539_v24 = vsub.f32 %v4469_v53, %v4538_v54 }
0x11b2   : > { %v4540_v56 = vand.u32 4294901760, %v4539_v24 }
0x11b4   : > { %v4541_v57 = vsub.f32 %v4539_v24, %v4540_v56 }
0x11b6   : > { %v4542_v58 = vand.u32 4294901760, %v4541_v57 }
0x11b8   : > { %6129 = vmatmul.mubr.f32.vlgmr.msra.gmra.mrb[8].mxu0 %v4542_v58 }
0x11b9   : > { %6321 = vmatpush3.bf16.msra.mxu0 %v6685_v43  ;;  %6135 = vmatprep.mubr.msk.f32.mxu0 %vm6530_vm1, %v6529_v2 }
0x11ba   : > { %6322 = vmatprep.subr.bf16.mxu0 %v6532_v37 }
0x11c0   : > { %6136 = vmatmul.mubr.f32.vlgmr.msra.gmra.mrb[8].mxu0 %v4538_v54 }
0x11c1   : > { %6324 = vmatpush3.bf16.msra.mxu0 %v6696_v44  ;;  %6142 = vmatprep.mubr.msk.f32.mxu0 %vm6530_vm1, %v6529_v2 }
0x11c2   : > { %6325 = vmatprep.subr.bf16.mxu0 %v6532_v37 }
0x11c8   : > { %6143 = vmatmul.mubr.f32.vlgmr.msra.gmra.mrb[8].mxu0 %v4539_v24 }
0x11c9   : > { %6327 = vmatpush3.bf16.msra.mxu0 %v6678_v39  ;;  %6149 = vmatprep.mubr.msk.f32.mxu0 %vm6530_vm1, %v6529_v2 }
0x11ca   : > { %6328 = vmatprep.subr.bf16.mxu0 %v6532_v37 }
0x11d0   : > { %6150 = vmatmul.mubr.f32.vlgmr.msra.gmra.mrb[8].mxu0 %v4540_v56 }
0x11d1   : > { %6330 = vmatpush3.bf16.msra.mxu0 %v6706_v45  ;;  %6156 = vmatprep.mubr.msk.f32.mxu0 %vm6530_vm1, %v6529_v2 }
0x11d2   : > { %6331 = vmatprep.subr.bf16.mxu0 %v6532_v37 }
0x11d8   : > { %6157 = vmatmul.mubr.f32.vlgmr.msra.gmra.mrb[8].mxu0 %v4538_v54 }
0x11d9   : > { %6333 = vmatpush3.bf16.msra.mxu0 %v6678_v39  ;;  %6163 = vmatprep.mubr.msk.f32.mxu0 %vm6530_vm1, %v6529_v2 }
0x11e0   : > { %6164 = vmatmul.mubr.f32.vlgmr.msra.gmra.mrb[8].mxu0 %v4538_v54 }
0x12b3   : > { %v4926_v60 = vpop.f32.mrb[8].mxu0 }
0x12b4   : > { %v4937_v62 = vadd.f32 %v4926_v60, %v6742_v23  ;;  %v6165_v63 = vpop.f32.mrb[9].mxu0  ;;  %v4930_v3 = vadd.f32 %v4926_v60, %v4465_v1 }
0x12b6   : > { %4939 = vrot.lane.b32.xlu1 %v4937_v62, %s6535_s29  ;;  %v5637_v4 = vmul.f32 -1.442695, %v4930_v3 }
0x12b8   : > { %6509 = vpow2.f32 %v5637_v4 }
0x12ba   : > { %4961 = vperm.xlu1 %6471, %v4959_v0  }
0x12c2   : > { %v6510_v5 = vpop.eup %6509 }
0x12c3   : > { %v4934_v6 = vadd.f32 1.0, %v6510_v5 }
0x12c5   : > { %6511 = vrcp.f32 %v4934_v6 }
0x12cf   : > { %v6512_v7 = vpop.eup %6511 }
0x12d0   : > { %v4949_v14 = vsub.f32 1.0, %v6512_v7  ;;  %v4955_v17 = vmul.f32 %v6512_v7, %v7000_v50 }
0x1328   : > { %v4940_v8 = vpop.permute.xlu1 %4939 }
0x1329   : > { %v4942_v10 = vmul.f32 %v6512_v7, %v4940_v8 }
0x132b   : > { %4944 = vrot.lane.b32.xlu0 %v4942_v10, %s6531_s15 }
0x1339   : > { %v4962_v16 = vpop.permute.xlu1 %4961 }
0x133a   : > { %vm4963_vm3 = vcmp.eq.s32.totalorder %v4962_v16, 1 }
0x139d   : > { %v4945_v11 = vpop.permute.xlu0 %4944 }
0x139e   : > { %v4947_v12 = vadd.f32 %v4945_v11, %v4465_v1 }
0x13a0   : > { %6513 = vtanh.f32 %v4947_v12 }
0x13aa   : > { %v6514_v13 = vpop.eup %6513 }
0x13ab   : > { %4951 = vrot.lane.b32.xlu0 %v6514_v13, %s6537_s14 }
0x141d   : > { %v4952_v15 = vpop.permute.xlu0 %4951 }
0x141e   : > { %v4954_v18 = vmul.f32 %v4952_v15, %v4949_v14 }
0x1420   : > { %v4956_v19 = vadd.f32 %v4955_v17, %v4954_v18 }
0x1422   : > { %v7042_v20 = vsel %vm4963_vm3, %v4956_v19, %v7000_v50  ;;  %v4965_v21 = vsel %vm4963_vm3, %v4956_v19, 0.0 }
0x1423   : > { %4977 = vrot.lane.b32.xlu1 %v7042_v20, %s6537_s14 }
0x1495   : > { %v4978_v26 = vpop.permute.xlu1 %4977 }
0x1496   : > { %v4979_v27 = vsel %vm1395_vm2, %v4978_v26, 0 }
0x1497   : > { %v5048_v28 = vand.u32 4294901760, %v4979_v27 }
0x1499   : > { %v5049_v29 = vsub.f32 %v4979_v27, %v5048_v28 }
0x149b   : > { %v5050_v30 = vand.u32 4294901760, %v5049_v29 }
0x149d   : > { %v5051_v31 = vsub.f32 %v5049_v29, %v5050_v30 }
0x149f   : > { %v5052_v32 = vand.u32 4294901760, %v5051_v31 }
0x14a1   : > { %6171 = vmatmul.mubr.f32.vlgmr.msra.gmra.mrb[8].mxu1 %v5052_v32 }
0x14a2   : > { %6339 = vmatpush3.bf16.msra.mxu1 %v6685_v43  ;;  %6177 = vmatprep.mubr.msk.f32.mxu1 %vm6530_vm1, %v6529_v2  ;;  %v5467_v43 = vstv %s7068_s19 }
0x14a3   : > { %6340 = vmatprep.subr.bf16.mxu1 %v6532_v37  ;;  %vm5468_vm2 = vcmp.lt.s32.totalorder %v5467_v43, %v6757_v33 }
0x14a9   : > { %6178 = vmatmul.mubr.f32.vlgmr.msra.gmra.mrb[8].mxu1 %v5048_v28 }
0x14aa   : > { %6342 = vmatpush3.bf16.msra.mxu1 %v6696_v44  ;;  %6184 = vmatprep.mubr.msk.f32.mxu1 %vm6530_vm1, %v6529_v2 }
0x14ab   : > { %6343 = vmatprep.subr.bf16.mxu1 %v6532_v37 }
0x14b1   : > { %6185 = vmatmul.mubr.f32.vlgmr.msra.gmra.mrb[8].mxu1 %v5049_v29 }
0x14b2   : > { %6345 = vmatpush3.bf16.msra.mxu1 %v6678_v39  ;;  %6191 = vmatprep.mubr.msk.f32.mxu1 %vm6530_vm1, %v6529_v2 }
0x14b3   : > { %6346 = vmatprep.subr.bf16.mxu1 %v6532_v37 }
0x14b9   : > { %6192 = vmatmul.mubr.f32.vlgmr.msra.gmra.mrb[8].mxu1 %v5050_v30 }
0x14ba   : > { %6348 = vmatpush3.bf16.msra.mxu1 %v6706_v45  ;;  %6198 = vmatprep.mubr.msk.f32.mxu1 %vm6530_vm1, %v6529_v2 }
0x14bb   : > { %6349 = vmatprep.subr.bf16.mxu1 %v6532_v37  ;;  %v5469_v37 = vsel %vm5468_vm2, 1, %v6534_v22 }
0x14c1   : > { %6199 = vmatmul.mubr.f32.vlgmr.msra.gmra.mrb[8].mxu1 %v5048_v28 }
0x14c2   : > { %6351 = vmatpush3.bf16.msra.mxu1 %v6678_v39  ;;  %6205 = vmatprep.mubr.msk.f32.mxu1 %vm6530_vm1, %v6529_v2  ;;  %v4975_v2 = vld [vmem:[%s4974_s11] sm:$0x3]  ;;  %s1909_s11 = scalar_lea.vmem %s7091_s13, %s5623_s9  ;;  %vm1910_vm1 = vcmask 123904   ;;  %s7147_s9 = sshll.u32 %s6986_s12, 1 }
0x14c3   : > { %s4460_s17 = scalar_lea.vmem %s7091_s13, %s7147_s9 }
0x14c9   : > { %6206 = vmatmul.mubr.f32.vlgmr.msra.gmra.mrb[8].mxu1 %v5048_v28 }
0x159c   : > { %v5436_v44 = vpop.f32.mrb[8].mxu1 }
0x159d   : > { %v5447_v45 = vadd.f32 %v5436_v44, %v6742_v23  ;;  %v6207_v34 = vpop.f32.mrb[9].mxu1  ;;  %v5440_v39 = vadd.f32 %v5436_v44, %v4975_v2 }
0x159f   : > { %5449 = vrot.lane.b32.xlu0 %v5447_v45, %s6535_s29  ;;  %v5639_v22 = vmul.f32 -1.442695, %v5440_v39 }
0x15a1   : > { %6515 = vpow2.f32 %v5639_v22 }
0x15a3   : > { %5471 = vperm.xlu0 %6472, %v5469_v37  }
0x15a7   : > { %1906 = vrot.lane.b32.xlu0 %v6767_v55, %s6537_s14 }
0x15ab   : > { %2927 = vrot.lane.b32.xlu0 %v6858_v61, %s6537_s14  ;;  %v6516_v23 = vpop.eup %6515 }
0x15ac   : > { %v5444_v33 = vadd.f32 1.0, %v6516_v23 }
0x15ae   : > { %6517 = vrcp.f32 %v5444_v33 }
0x15af   : > { %3947 = vrot.lane.b32.xlu0 %v6955_v9, %s6537_s14 }
0x15b3   : > { %4967 = vrot.lane.b32.xlu0 %v4965_v21, %s6537_s14 }
0x15b8   : > { %v6518_v55 = vpop.eup %6517 }
0x15b9   : > { %v5459_v46 = vsub.f32 1.0, %v6518_v55  ;;  %v5465_v49 = vmul.f32 %v6518_v55, %v7042_v20 }
0x1611   : > { %v5450_v36 = vpop.permute.xlu0 %5449 }
0x1612   : > { %v5452_v61 = vmul.f32 %v6518_v55, %v5450_v36 }
0x1614   : > { %5454 = vrot.lane.b32.xlu1 %v5452_v61, %s6531_s15  ;;  %s2930_s15 = scalar_lea.vmem %s7091_s13, %s5628_s21 }
0x1622   : > { %v5472_v9 = vpop.permute.xlu0 %5471 }
0x1623   : > { %vm5473_vm4 = vcmp.eq.s32.totalorder %v5472_v9, 1 }
0x1626   : > { %v1907_v38 = vpop.permute.xlu0 %1906 }
0x1627   : > { %1911 = vst.msk [vmem:[%s1909_s11] sm:$0x3] %vm1910_vm1, %v1907_v38 }
0x162a   : > { %v2928_v48 = vpop.permute.xlu0 %2927 }
0x162e   : > { %v3948_v52 = vpop.permute.xlu0 %3947 }
0x1632   : > { %v4968_v24 = vpop.permute.xlu0 %4967 }
0x1686   : > { %v5455_v40 = vpop.permute.xlu1 %5454 }
0x1687   : > { %v5457_v41 = vadd.f32 %v5455_v40, %v4975_v2 }
0x1689   : > { %6519 = vtanh.f32 %v5457_v41 }
0x1693   : > { %v6520_v42 = vpop.eup %6519 }
0x1694   : > { %5461 = vrot.lane.b32.xlu1 %v6520_v42, %s6537_s14 }
0x1698   : > { %2417 = vrot.lane.b32.xlu1 %v6814_v25, %s6537_s14 }
0x169c   : > { %3437 = vrot.lane.b32.xlu1 %v6908_v35, %s6537_s14 }
0x16a0   : > { %4457 = vrot.lane.b32.xlu1 %v7002_v51, %s6537_s14 }
0x1706   : > { %v5462_v47 = vpop.permute.xlu1 %5461 }
0x1707   : > { %v5464_v50 = vmul.f32 %v5462_v47, %v5459_v46 }
0x1709   : > { %v5466_v25 = vadd.f32 %v5465_v49, %v5464_v50 }
0x170a   : > { %v2418_v35 = vpop.permute.xlu1 %2417 }
0x170b   : > { %2421 = vst.msk [vmem:[%s2420_s30] sm:$0x3] %vm1910_vm1, %v2418_v35  ;;  %v5474_v51 = vsel %vm5473_vm4, %v5466_v25, 0.0 }
0x170c   : > { %2931 = vst.msk [vmem:[%s2930_s15] sm:$0x3] %vm1910_vm1, %v2928_v48  ;;  %5476 = vrot.lane.b32.xlu1 %v5474_v51, %s6537_s14  ;;  %s5479_s14 = scalar_lea.vmem %s7091_s13, %s5638_s25 }
0x170e   : > { %v3438_v53 = vpop.permute.xlu1 %3437 }
0x170f   : > { %3441 = vst.msk [vmem:[%s3440_s16] sm:$0x3] %vm1910_vm1, %v3438_v53 }
0x1710   : > { %3951 = vst.msk [vmem:[%s3950_s8] sm:$0x3] %vm1910_vm1, %v3948_v52 }
0x1712   : > { %v4458_v54 = vpop.permute.xlu1 %4457 }
0x1713   : > { %4461 = vst.msk [vmem:[%s4460_s17] sm:$0x3] %vm1910_vm1, %v4458_v54 }
0x1714   : > { %4971 = vst.msk [vmem:[%s4970_s20] sm:$0x3] %vm1910_vm1, %v4968_v24 }
0x177e   : > { %v5477_v56 = vpop.permute.xlu1 %5476 }
0x177f   : > { %5480 = vst.msk [vmem:[%s5479_s14] sm:$0x3] %vm1910_vm1, %v5477_v56 }
0x1780 PF: > { %s17_s24 = sadd.s32 1, %s6527_s24  }
0x1781   : > { %p14_p5 = scmp.ge.s32.totalorder %s17_s24, 4  }
0x1783   :  { %16 = sbr.rel (!%p14_p5) target bundleno = 1 (0x1), region = 107 }

</bundles_post_ra>
